<compile_context>
chip_gen: v5e
topology: v5e:2x2
jax: 0.10.0
libtpu: 0.0.40
codegen_flags: <defaults>
</compile_context>

<pallas_src>
import functools

import jax
import jax.numpy as jnp
from jax.experimental import pallas as pl
from jax.experimental.pallas import tpu as pltpu


# -----------------------------------------------------------------------------
# Fused kernel.
#   x_ref : (N*C, D, H*W)  f32   (H,W flattened onto lanes)
#   w1_ref: (C, K, 256)    bf16  with K = (D-2)*(H-2)*(W-2); w1r[c,k,:] = W1[c*K+k,:]
#   b1_ref: (1, 256) f32
#   w2_ref: (256, 64) bf16
#   b2_ref: (1, 64)  f32
#   w3_ref: (64, 3)  f32
#   b3_ref: (1, 3)   f32
#   o_ref : (N, 3)   f32
# -----------------------------------------------------------------------------
def _fused_predictor_kernel(x_ref, w1_ref, b1_ref, w2_ref, b2_ref, w3_ref,
                            b3_ref, o_ref, *, N, C, D, H, W):
    Do, Ho, Wo = D - 2, H - 2, W - 2
    K = Do * Ho * Wo
    HW = H * W
    H1 = w1_ref.shape[-1]            # 256

    x = x_ref[...]                   # (N*C, D, HW) f32

    # ---- separable 3x3x3 max pool (6 maxima) --------------------------------
    # running max along W: lane shifts 0, 1, 2
    L1 = HW - 2
    m = jnp.maximum(jnp.maximum(x[..., 0:L1], x[..., 1:L1 + 1]), x[..., 2:L1 + 2])
    # running max along H: lane shifts 0, W, 2W
    L2 = L1 - 2 * W
    m = jnp.maximum(jnp.maximum(m[..., 0:L2], m[..., W:W + L2]),
                    m[..., 2 * W:2 * W + L2])
    # running max along D: sublane shifts 0, 1, 2
    m = jnp.maximum(jnp.maximum(m[:, 0:Do, :], m[:, 1:Do + 1, :]),
                    m[:, 2:Do + 2, :])                       # (N*C, Do, L2)
    # valid pooled value for (d, h, w) lives at m[:, d, h*W + w]

    # ---- flatten (PyTorch row-major order d, h, w within each channel) ------
    slabs = [m[:, d, h * W: h * W + Wo] for d in range(Do) for h in range(Ho)]
    p2 = jnp.concatenate(slabs, axis=-1)                     # (N*C, K), lane = d*Ho*Wo + h*Wo + w
    p3 = p2.reshape(N, C, K)                                 # split leading dim only; lane untouched

    # ---- Linear(1024, 256): sum over channels of (N,K)@(K,256) on the MXU ---
    acc = jnp.zeros((N, H1), jnp.float32)
    for c in range(C):                                       # static unroll, C = 16
        acc += jnp.dot(p3[:, c, :].astype(jnp.bfloat16), w1_ref[c],
                       preferred_element_type=jnp.float32)
    h1 = jnp.maximum(acc + b1_ref[...], 0.0)                 # Dropout(0.2) -> identity (eval)

    # ---- Linear(256, 64) + ReLU ---------------------------------------------
    h2 = jnp.dot(h1.astype(jnp.bfloat16), w2_ref[...],
                 preferred_element_type=jnp.float32) + b2_ref[...]
    h2 = jnp.maximum(h2, 0.0)                                # Dropout(0.2) -> identity (eval)

    # ---- Linear(64, 3) + Sigmoid --------------------------------------------
    z = jnp.dot(h2, w3_ref[...], preferred_element_type=jnp.float32) + b3_ref[...]
    o_ref[...] = jax.nn.sigmoid(z).astype(o_ref.dtype)


# -----------------------------------------------------------------------------
# Parameter init (PyTorch-Linear-style uniform(-1/sqrt(fan_in), +)) and one-time
# kernel-layout preparation (reshape + bf16 cast of the matmul weights).
# -----------------------------------------------------------------------------
def init_params(key):
    def linear(k, fan_in, fan_out):
        kw, kb = jax.random.split(k)
        bound = 1.0 / jnp.sqrt(fan_in)
        w = jax.random.uniform(kw, (fan_in, fan_out), jnp.float32, -bound, bound)
        b = jax.random.uniform(kb, (1, fan_out), jnp.float32, -bound, bound)
        return w, b

    k1, k2, k3 = jax.random.split(key, 3)
    w1, b1 = linear(k1, 1024, 256)
    w2, b2 = linear(k2, 256, 64)
    w3, b3 = linear(k3, 64, 3)
    return (w1, b1, w2, b2, w3, b3)


def prepare_params(params, C):
    """One-time re-layout / cast of PyTorch-shaped weights for the fused kernel."""
    w1, b1, w2, b2, w3, b3 = params
    K = w1.shape[0] // C                                     # (D-2)*(H-2)*(W-2)
    w1r = w1.reshape(C, K, w1.shape[1]).astype(jnp.bfloat16)  # row c*K+k -> [c, k, :]
    w2c = w2.astype(jnp.bfloat16)
    return (w1r, b1, w2c, b2, w3, b3)


@jax.jit
def predictor3d_forward(x, prepared_params):
    # x: (N, C, D, H, W) with C*(D-2)*(H-2)*(W-2) == 1024
    N, C, D, H, W = x.shape
    Do, Ho, Wo = D - 2, H - 2, W - 2
    w1r, b1, w2c, b2, w3, b3 = prepared_params
    assert w1r.shape[0] == C and w1r.shape[1] == Do * Ho * Wo

    x2 = x.reshape(N * C, D, H * W)          # free row-major merge (no copy)
    kernel = functools.partial(_fused_predictor_kernel, N=N, C=C, D=D, H=H, W=W)
    return pl.pallas_call(
        kernel,
        out_shape=jax.ShapeDtypeStruct((N, 3), jnp.float32),
        in_specs=[pl.BlockSpec(memory_space=pltpu.MemorySpace.VMEM)] * 7,
        out_specs=pl.BlockSpec(memory_space=pltpu.MemorySpace.VMEM),
    )(x2, w1r, b1, w2c, b2, w3, b3)


# -----------------------------------------------------------------------------
# Pure-JAX reference (f32 end-to-end) for validation.
# -----------------------------------------------------------------------------
def _reference_forward(x, params):
    w1, b1, w2, b2, w3, b3 = params
    N = x.shape[0]
    p = jax.lax.reduce_window(x, -jnp.inf, jax.lax.max,
                              window_dimensions=(1, 1, 3, 3, 3),
                              window_strides=(1, 1, 1, 1, 1),
                              padding="VALID")
    f = p.reshape(N, -1)
    h1 = jax.nn.relu(f @ w1 + b1)
    h2 = jax.nn.relu(h1 @ w2 + b2)
    return jax.nn.sigmoid(h2 @ w3 + b3)


if __name__ == "__main__":
    key = jax.random.PRNGKey(0)
    k_x, k_p = jax.random.split(key)

    # N=2, C=16, D=H=W=6  ->  MaxPool3d(3,1): (2,16,4,4,4) -> Flatten -> 1024
    N, C, D, H, W = 2, 16, 6, 6, 6
    x = jax.random.normal(k_x, (N, C, D, H, W), jnp.float32)
    params = init_params(k_p)
    prepared = prepare_params(params, C)

    y = predictor3d_forward(x, prepared)
    jax.block_until_ready(y)

    y_ref = _reference_forward(x, params)
    assert y.shape == (N, 3)
    assert bool(jnp.all((y >= 0.0) & (y <= 1.0)))
    # bf16 MXU operands vs f32 reference -> small drift; tolerance is generous.
    assert bool(jnp.max(jnp.abs(y - y_ref)) < 5e-2)
    print("KERNEL_OK")
</pallas_src>

<mosaic_0001>
module attributes {stable_mosaic.version = 11 : i64} {
  func.func @_fused_predictor_kernel(%arg0: memref<32x6x36xf32, #tpu.memory_space<vmem>>, %arg1: memref<16x64x256xbf16, #tpu.memory_space<vmem>>, %arg2: memref<1x256xf32, #tpu.memory_space<vmem>>, %arg3: memref<256x64xbf16, #tpu.memory_space<vmem>>, %arg4: memref<1x64xf32, #tpu.memory_space<vmem>>, %arg5: memref<64x3xf32, #tpu.memory_space<vmem>>, %arg6: memref<1x3xf32, #tpu.memory_space<vmem>>, %arg7: memref<2x3xf32, #tpu.memory_space<vmem>>) attributes {dimension_semantics = [], scalar_prefetch = 0 : i64, scratch_operands = 0 : i64, tpu.core_type = #tpu.core_type<tc>} {
    %c0 = arith.constant 0 : index
    %c0_0 = arith.constant 0 : index
    %c0_1 = arith.constant 0 : index
    %0 = vector.load %arg0[%c0, %c0_0, %c0_1] : memref<32x6x36xf32, #tpu.memory_space<vmem>>, vector<32x6x36xf32>
    %1 = vector.extract_strided_slice %0 {offsets = [0, 0, 0], sizes = [32, 6, 34], strides = [1, 1, 1]} : vector<32x6x36xf32> to vector<32x6x34xf32>
    %2 = vector.extract_strided_slice %0 {offsets = [0, 0, 1], sizes = [32, 6, 34], strides = [1, 1, 1]} : vector<32x6x36xf32> to vector<32x6x34xf32>
    %3 = arith.maximumf %1, %2 : vector<32x6x34xf32>
    %4 = vector.extract_strided_slice %0 {offsets = [0, 0, 2], sizes = [32, 6, 34], strides = [1, 1, 1]} : vector<32x6x36xf32> to vector<32x6x34xf32>
    %5 = arith.maximumf %3, %4 : vector<32x6x34xf32>
    %6 = vector.extract_strided_slice %5 {offsets = [0, 0, 0], sizes = [32, 6, 22], strides = [1, 1, 1]} : vector<32x6x34xf32> to vector<32x6x22xf32>
    %7 = vector.extract_strided_slice %5 {offsets = [0, 0, 6], sizes = [32, 6, 22], strides = [1, 1, 1]} : vector<32x6x34xf32> to vector<32x6x22xf32>
    %8 = arith.maximumf %6, %7 : vector<32x6x22xf32>
    %9 = vector.extract_strided_slice %5 {offsets = [0, 0, 12], sizes = [32, 6, 22], strides = [1, 1, 1]} : vector<32x6x34xf32> to vector<32x6x22xf32>
    %10 = arith.maximumf %8, %9 : vector<32x6x22xf32>
    %11 = vector.extract_strided_slice %10 {offsets = [0, 0, 0], sizes = [32, 4, 22], strides = [1, 1, 1]} : vector<32x6x22xf32> to vector<32x4x22xf32>
    %12 = vector.extract_strided_slice %10 {offsets = [0, 1, 0], sizes = [32, 4, 22], strides = [1, 1, 1]} : vector<32x6x22xf32> to vector<32x4x22xf32>
    %13 = arith.maximumf %11, %12 : vector<32x4x22xf32>
    %14 = vector.extract_strided_slice %10 {offsets = [0, 2, 0], sizes = [32, 4, 22], strides = [1, 1, 1]} : vector<32x6x22xf32> to vector<32x4x22xf32>
    %15 = arith.maximumf %13, %14 : vector<32x4x22xf32>
    %16 = vector.extract_strided_slice %15 {offsets = [0, 0, 0], sizes = [32, 1, 4], strides = [1, 1, 1]} : vector<32x4x22xf32> to vector<32x1x4xf32>
    %17 = vector.shape_cast %16 : vector<32x1x4xf32> to vector<32x4xf32>
    %18 = vector.extract_strided_slice %15 {offsets = [0, 0, 6], sizes = [32, 1, 4], strides = [1, 1, 1]} : vector<32x4x22xf32> to vector<32x1x4xf32>
    %19 = vector.shape_cast %18 : vector<32x1x4xf32> to vector<32x4xf32>
    %20 = vector.extract_strided_slice %15 {offsets = [0, 0, 12], sizes = [32, 1, 4], strides = [1, 1, 1]} : vector<32x4x22xf32> to vector<32x1x4xf32>
    %21 = vector.shape_cast %20 : vector<32x1x4xf32> to vector<32x4xf32>
    %22 = vector.extract_strided_slice %15 {offsets = [0, 0, 18], sizes = [32, 1, 4], strides = [1, 1, 1]} : vector<32x4x22xf32> to vector<32x1x4xf32>
    %23 = vector.shape_cast %22 : vector<32x1x4xf32> to vector<32x4xf32>
    %24 = vector.extract_strided_slice %15 {offsets = [0, 1, 0], sizes = [32, 1, 4], strides = [1, 1, 1]} : vector<32x4x22xf32> to vector<32x1x4xf32>
    %25 = vector.shape_cast %24 : vector<32x1x4xf32> to vector<32x4xf32>
    %26 = vector.extract_strided_slice %15 {offsets = [0, 1, 6], sizes = [32, 1, 4], strides = [1, 1, 1]} : vector<32x4x22xf32> to vector<32x1x4xf32>
    %27 = vector.shape_cast %26 : vector<32x1x4xf32> to vector<32x4xf32>
    %28 = vector.extract_strided_slice %15 {offsets = [0, 1, 12], sizes = [32, 1, 4], strides = [1, 1, 1]} : vector<32x4x22xf32> to vector<32x1x4xf32>
    %29 = vector.shape_cast %28 : vector<32x1x4xf32> to vector<32x4xf32>
    %30 = vector.extract_strided_slice %15 {offsets = [0, 1, 18], sizes = [32, 1, 4], strides = [1, 1, 1]} : vector<32x4x22xf32> to vector<32x1x4xf32>
    %31 = vector.shape_cast %30 : vector<32x1x4xf32> to vector<32x4xf32>
    %32 = vector.extract_strided_slice %15 {offsets = [0, 2, 0], sizes = [32, 1, 4], strides = [1, 1, 1]} : vector<32x4x22xf32> to vector<32x1x4xf32>
    %33 = vector.shape_cast %32 : vector<32x1x4xf32> to vector<32x4xf32>
    %34 = vector.extract_strided_slice %15 {offsets = [0, 2, 6], sizes = [32, 1, 4], strides = [1, 1, 1]} : vector<32x4x22xf32> to vector<32x1x4xf32>
    %35 = vector.shape_cast %34 : vector<32x1x4xf32> to vector<32x4xf32>
    %36 = vector.extract_strided_slice %15 {offsets = [0, 2, 12], sizes = [32, 1, 4], strides = [1, 1, 1]} : vector<32x4x22xf32> to vector<32x1x4xf32>
    %37 = vector.shape_cast %36 : vector<32x1x4xf32> to vector<32x4xf32>
    %38 = vector.extract_strided_slice %15 {offsets = [0, 2, 18], sizes = [32, 1, 4], strides = [1, 1, 1]} : vector<32x4x22xf32> to vector<32x1x4xf32>
    %39 = vector.shape_cast %38 : vector<32x1x4xf32> to vector<32x4xf32>
    %40 = vector.extract_strided_slice %15 {offsets = [0, 3, 0], sizes = [32, 1, 4], strides = [1, 1, 1]} : vector<32x4x22xf32> to vector<32x1x4xf32>
    %41 = vector.shape_cast %40 : vector<32x1x4xf32> to vector<32x4xf32>
    %42 = vector.extract_strided_slice %15 {offsets = [0, 3, 6], sizes = [32, 1, 4], strides = [1, 1, 1]} : vector<32x4x22xf32> to vector<32x1x4xf32>
    %43 = vector.shape_cast %42 : vector<32x1x4xf32> to vector<32x4xf32>
    %44 = vector.extract_strided_slice %15 {offsets = [0, 3, 12], sizes = [32, 1, 4], strides = [1, 1, 1]} : vector<32x4x22xf32> to vector<32x1x4xf32>
    %45 = vector.shape_cast %44 : vector<32x1x4xf32> to vector<32x4xf32>
    %46 = vector.extract_strided_slice %15 {offsets = [0, 3, 18], sizes = [32, 1, 4], strides = [1, 1, 1]} : vector<32x4x22xf32> to vector<32x1x4xf32>
    %47 = vector.shape_cast %46 : vector<32x1x4xf32> to vector<32x4xf32>
    %48 = tpu.concatenate %17, %19, %21, %23, %25, %27, %29, %31, %33, %35, %37, %39, %41, %43, %45, %47 in 1 : vector<32x4xf32>, vector<32x4xf32>, vector<32x4xf32>, vector<32x4xf32>, vector<32x4xf32>, vector<32x4xf32>, vector<32x4xf32>, vector<32x4xf32>, vector<32x4xf32>, vector<32x4xf32>, vector<32x4xf32>, vector<32x4xf32>, vector<32x4xf32>, vector<32x4xf32>, vector<32x4xf32>, vector<32x4xf32> -> vector<32x64xf32>
    %49 = vector.shape_cast %48 : vector<32x64xf32> to vector<2x16x64xf32>
    %cst = arith.constant 0.000000e+00 : f32
    %50 = vector.broadcast %cst : f32 to vector<2x256xf32>
    %51 = vector.extract_strided_slice %49 {offsets = [0, 0, 0], sizes = [2, 1, 64], strides = [1, 1, 1]} : vector<2x16x64xf32> to vector<2x1x64xf32>
    %52 = vector.shape_cast %51 : vector<2x1x64xf32> to vector<2x64xf32>
    %53 = arith.truncf %52 : vector<2x64xf32> to vector<2x64xbf16>
    %c0_2 = arith.constant 0 : index
    %c0_3 = arith.constant 0 : index
    %c0_4 = arith.constant 0 : index
    %54 = vector.load %arg1[%c0_2, %c0_3, %c0_4] : memref<16x64x256xbf16, #tpu.memory_space<vmem>>, vector<1x64x256xbf16>
    %55 = vector.shape_cast %54 : vector<1x64x256xbf16> to vector<64x256xbf16>
    %cst_5 = arith.constant dense<0.000000e+00> : vector<2x256xf32>
    %56 = tpu.matmul %53, %55, %cst_5 {dimension_numbers = #tpu.dot_dimension_numbers<[1], [0], [0], [1], [0, 0, 1, 1], [], []>} : vector<2x64xbf16>, vector<64x256xbf16>, vector<2x256xf32> -> vector<2x256xf32>
    %57 = arith.addf %50, %56 : vector<2x256xf32>
    %58 = vector.extract_strided_slice %49 {offsets = [0, 1, 0], sizes = [2, 1, 64], strides = [1, 1, 1]} : vector<2x16x64xf32> to vector<2x1x64xf32>
    %59 = vector.shape_cast %58 : vector<2x1x64xf32> to vector<2x64xf32>
    %60 = arith.truncf %59 : vector<2x64xf32> to vector<2x64xbf16>
    %c1 = arith.constant 1 : index
    %c0_6 = arith.constant 0 : index
    %c0_7 = arith.constant 0 : index
    %61 = vector.load %arg1[%c1, %c0_6, %c0_7] : memref<16x64x256xbf16, #tpu.memory_space<vmem>>, vector<1x64x256xbf16>
    %62 = vector.shape_cast %61 : vector<1x64x256xbf16> to vector<64x256xbf16>
    %cst_8 = arith.constant dense<0.000000e+00> : vector<2x256xf32>
    %63 = tpu.matmul %60, %62, %cst_8 {dimension_numbers = #tpu.dot_dimension_numbers<[1], [0], [0], [1], [0, 0, 1, 1], [], []>} : vector<2x64xbf16>, vector<64x256xbf16>, vector<2x256xf32> -> vector<2x256xf32>
    %64 = arith.addf %57, %63 : vector<2x256xf32>
    %65 = vector.extract_strided_slice %49 {offsets = [0, 2, 0], sizes = [2, 1, 64], strides = [1, 1, 1]} : vector<2x16x64xf32> to vector<2x1x64xf32>
    %66 = vector.shape_cast %65 : vector<2x1x64xf32> to vector<2x64xf32>
    %67 = arith.truncf %66 : vector<2x64xf32> to vector<2x64xbf16>
    %c2 = arith.constant 2 : index
    %c0_9 = arith.constant 0 : index
    %c0_10 = arith.constant 0 : index
    %68 = vector.load %arg1[%c2, %c0_9, %c0_10] : memref<16x64x256xbf16, #tpu.memory_space<vmem>>, vector<1x64x256xbf16>
    %69 = vector.shape_cast %68 : vector<1x64x256xbf16> to vector<64x256xbf16>
    %cst_11 = arith.constant dense<0.000000e+00> : vector<2x256xf32>
    %70 = tpu.matmul %67, %69, %cst_11 {dimension_numbers = #tpu.dot_dimension_numbers<[1], [0], [0], [1], [0, 0, 1, 1], [], []>} : vector<2x64xbf16>, vector<64x256xbf16>, vector<2x256xf32> -> vector<2x256xf32>
    %71 = arith.addf %64, %70 : vector<2x256xf32>
    %72 = vector.extract_strided_slice %49 {offsets = [0, 3, 0], sizes = [2, 1, 64], strides = [1, 1, 1]} : vector<2x16x64xf32> to vector<2x1x64xf32>
    %73 = vector.shape_cast %72 : vector<2x1x64xf32> to vector<2x64xf32>
    %74 = arith.truncf %73 : vector<2x64xf32> to vector<2x64xbf16>
    %c3 = arith.constant 3 : index
    %c0_12 = arith.constant 0 : index
    %c0_13 = arith.constant 0 : index
    %75 = vector.load %arg1[%c3, %c0_12, %c0_13] : memref<16x64x256xbf16, #tpu.memory_space<vmem>>, vector<1x64x256xbf16>
    %76 = vector.shape_cast %75 : vector<1x64x256xbf16> to vector<64x256xbf16>
    %cst_14 = arith.constant dense<0.000000e+00> : vector<2x256xf32>
    %77 = tpu.matmul %74, %76, %cst_14 {dimension_numbers = #tpu.dot_dimension_numbers<[1], [0], [0], [1], [0, 0, 1, 1], [], []>} : vector<2x64xbf16>, vector<64x256xbf16>, vector<2x256xf32> -> vector<2x256xf32>
    %78 = arith.addf %71, %77 : vector<2x256xf32>
    %79 = vector.extract_strided_slice %49 {offsets = [0, 4, 0], sizes = [2, 1, 64], strides = [1, 1, 1]} : vector<2x16x64xf32> to vector<2x1x64xf32>
    %80 = vector.shape_cast %79 : vector<2x1x64xf32> to vector<2x64xf32>
    %81 = arith.truncf %80 : vector<2x64xf32> to vector<2x64xbf16>
    %c4 = arith.constant 4 : index
    %c0_15 = arith.constant 0 : index
    %c0_16 = arith.constant 0 : index
    %82 = vector.load %arg1[%c4, %c0_15, %c0_16] : memref<16x64x256xbf16, #tpu.memory_space<vmem>>, vector<1x64x256xbf16>
    %83 = vector.shape_cast %82 : vector<1x64x256xbf16> to vector<64x256xbf16>
    %cst_17 = arith.constant dense<0.000000e+00> : vector<2x256xf32>
    %84 = tpu.matmul %81, %83, %cst_17 {dimension_numbers = #tpu.dot_dimension_numbers<[1], [0], [0], [1], [0, 0, 1, 1], [], []>} : vector<2x64xbf16>, vector<64x256xbf16>, vector<2x256xf32> -> vector<2x256xf32>
    %85 = arith.addf %78, %84 : vector<2x256xf32>
    %86 = vector.extract_strided_slice %49 {offsets = [0, 5, 0], sizes = [2, 1, 64], strides = [1, 1, 1]} : vector<2x16x64xf32> to vector<2x1x64xf32>
    %87 = vector.shape_cast %86 : vector<2x1x64xf32> to vector<2x64xf32>
    %88 = arith.truncf %87 : vector<2x64xf32> to vector<2x64xbf16>
    %c5 = arith.constant 5 : index
    %c0_18 = arith.constant 0 : index
    %c0_19 = arith.constant 0 : index
    %89 = vector.load %arg1[%c5, %c0_18, %c0_19] : memref<16x64x256xbf16, #tpu.memory_space<vmem>>, vector<1x64x256xbf16>
    %90 = vector.shape_cast %89 : vector<1x64x256xbf16> to vector<64x256xbf16>
    %cst_20 = arith.constant dense<0.000000e+00> : vector<2x256xf32>
    %91 = tpu.matmul %88, %90, %cst_20 {dimension_numbers = #tpu.dot_dimension_numbers<[1], [0], [0], [1], [0, 0, 1, 1], [], []>} : vector<2x64xbf16>, vector<64x256xbf16>, vector<2x256xf32> -> vector<2x256xf32>
    %92 = arith.addf %85, %91 : vector<2x256xf32>
    %93 = vector.extract_strided_slice %49 {offsets = [0, 6, 0], sizes = [2, 1, 64], strides = [1, 1, 1]} : vector<2x16x64xf32> to vector<2x1x64xf32>
    %94 = vector.shape_cast %93 : vector<2x1x64xf32> to vector<2x64xf32>
    %95 = arith.truncf %94 : vector<2x64xf32> to vector<2x64xbf16>
    %c6 = arith.constant 6 : index
    %c0_21 = arith.constant 0 : index
    %c0_22 = arith.constant 0 : index
    %96 = vector.load %arg1[%c6, %c0_21, %c0_22] : memref<16x64x256xbf16, #tpu.memory_space<vmem>>, vector<1x64x256xbf16>
    %97 = vector.shape_cast %96 : vector<1x64x256xbf16> to vector<64x256xbf16>
    %cst_23 = arith.constant dense<0.000000e+00> : vector<2x256xf32>
    %98 = tpu.matmul %95, %97, %cst_23 {dimension_numbers = #tpu.dot_dimension_numbers<[1], [0], [0], [1], [0, 0, 1, 1], [], []>} : vector<2x64xbf16>, vector<64x256xbf16>, vector<2x256xf32> -> vector<2x256xf32>
    %99 = arith.addf %92, %98 : vector<2x256xf32>
    %100 = vector.extract_strided_slice %49 {offsets = [0, 7, 0], sizes = [2, 1, 64], strides = [1, 1, 1]} : vector<2x16x64xf32> to vector<2x1x64xf32>
    %101 = vector.shape_cast %100 : vector<2x1x64xf32> to vector<2x64xf32>
    %102 = arith.truncf %101 : vector<2x64xf32> to vector<2x64xbf16>
    %c7 = arith.constant 7 : index
    %c0_24 = arith.constant 0 : index
    %c0_25 = arith.constant 0 : index
    %103 = vector.load %arg1[%c7, %c0_24, %c0_25] : memref<16x64x256xbf16, #tpu.memory_space<vmem>>, vector<1x64x256xbf16>
    %104 = vector.shape_cast %103 : vector<1x64x256xbf16> to vector<64x256xbf16>
    %cst_26 = arith.constant dense<0.000000e+00> : vector<2x256xf32>
    %105 = tpu.matmul %102, %104, %cst_26 {dimension_numbers = #tpu.dot_dimension_numbers<[1], [0], [0], [1], [0, 0, 1, 1], [], []>} : vector<2x64xbf16>, vector<64x256xbf16>, vector<2x256xf32> -> vector<2x256xf32>
    %106 = arith.addf %99, %105 : vector<2x256xf32>
    %107 = vector.extract_strided_slice %49 {offsets = [0, 8, 0], sizes = [2, 1, 64], strides = [1, 1, 1]} : vector<2x16x64xf32> to vector<2x1x64xf32>
    %108 = vector.shape_cast %107 : vector<2x1x64xf32> to vector<2x64xf32>
    %109 = arith.truncf %108 : vector<2x64xf32> to vector<2x64xbf16>
    %c8 = arith.constant 8 : index
    %c0_27 = arith.constant 0 : index
    %c0_28 = arith.constant 0 : index
    %110 = vector.load %arg1[%c8, %c0_27, %c0_28] : memref<16x64x256xbf16, #tpu.memory_space<vmem>>, vector<1x64x256xbf16>
    %111 = vector.shape_cast %110 : vector<1x64x256xbf16> to vector<64x256xbf16>
    %cst_29 = arith.constant dense<0.000000e+00> : vector<2x256xf32>
    %112 = tpu.matmul %109, %111, %cst_29 {dimension_numbers = #tpu.dot_dimension_numbers<[1], [0], [0], [1], [0, 0, 1, 1], [], []>} : vector<2x64xbf16>, vector<64x256xbf16>, vector<2x256xf32> -> vector<2x256xf32>
    %113 = arith.addf %106, %112 : vector<2x256xf32>
    %114 = vector.extract_strided_slice %49 {offsets = [0, 9, 0], sizes = [2, 1, 64], strides = [1, 1, 1]} : vector<2x16x64xf32> to vector<2x1x64xf32>
    %115 = vector.shape_cast %114 : vector<2x1x64xf32> to vector<2x64xf32>
    %116 = arith.truncf %115 : vector<2x64xf32> to vector<2x64xbf16>
    %c9 = arith.constant 9 : index
    %c0_30 = arith.constant 0 : index
    %c0_31 = arith.constant 0 : index
    %117 = vector.load %arg1[%c9, %c0_30, %c0_31] : memref<16x64x256xbf16, #tpu.memory_space<vmem>>, vector<1x64x256xbf16>
    %118 = vector.shape_cast %117 : vector<1x64x256xbf16> to vector<64x256xbf16>
    %cst_32 = arith.constant dense<0.000000e+00> : vector<2x256xf32>
    %119 = tpu.matmul %116, %118, %cst_32 {dimension_numbers = #tpu.dot_dimension_numbers<[1], [0], [0], [1], [0, 0, 1, 1], [], []>} : vector<2x64xbf16>, vector<64x256xbf16>, vector<2x256xf32> -> vector<2x256xf32>
    %120 = arith.addf %113, %119 : vector<2x256xf32>
    %121 = vector.extract_strided_slice %49 {offsets = [0, 10, 0], sizes = [2, 1, 64], strides = [1, 1, 1]} : vector<2x16x64xf32> to vector<2x1x64xf32>
    %122 = vector.shape_cast %121 : vector<2x1x64xf32> to vector<2x64xf32>
    %123 = arith.truncf %122 : vector<2x64xf32> to vector<2x64xbf16>
    %c10 = arith.constant 10 : index
    %c0_33 = arith.constant 0 : index
    %c0_34 = arith.constant 0 : index
    %124 = vector.load %arg1[%c10, %c0_33, %c0_34] : memref<16x64x256xbf16, #tpu.memory_space<vmem>>, vector<1x64x256xbf16>
    %125 = vector.shape_cast %124 : vector<1x64x256xbf16> to vector<64x256xbf16>
    %cst_35 = arith.constant dense<0.000000e+00> : vector<2x256xf32>
    %126 = tpu.matmul %123, %125, %cst_35 {dimension_numbers = #tpu.dot_dimension_numbers<[1], [0], [0], [1], [0, 0, 1, 1], [], []>} : vector<2x64xbf16>, vector<64x256xbf16>, vector<2x256xf32> -> vector<2x256xf32>
    %127 = arith.addf %120, %126 : vector<2x256xf32>
    %128 = vector.extract_strided_slice %49 {offsets = [0, 11, 0], sizes = [2, 1, 64], strides = [1, 1, 1]} : vector<2x16x64xf32> to vector<2x1x64xf32>
    %129 = vector.shape_cast %128 : vector<2x1x64xf32> to vector<2x64xf32>
    %130 = arith.truncf %129 : vector<2x64xf32> to vector<2x64xbf16>
    %c11 = arith.constant 11 : index
    %c0_36 = arith.constant 0 : index
    %c0_37 = arith.constant 0 : index
    %131 = vector.load %arg1[%c11, %c0_36, %c0_37] : memref<16x64x256xbf16, #tpu.memory_space<vmem>>, vector<1x64x256xbf16>
    %132 = vector.shape_cast %131 : vector<1x64x256xbf16> to vector<64x256xbf16>
    %cst_38 = arith.constant dense<0.000000e+00> : vector<2x256xf32>
    %133 = tpu.matmul %130, %132, %cst_38 {dimension_numbers = #tpu.dot_dimension_numbers<[1], [0], [0], [1], [0, 0, 1, 1], [], []>} : vector<2x64xbf16>, vector<64x256xbf16>, vector<2x256xf32> -> vector<2x256xf32>
    %134 = arith.addf %127, %133 : vector<2x256xf32>
    %135 = vector.extract_strided_slice %49 {offsets = [0, 12, 0], sizes = [2, 1, 64], strides = [1, 1, 1]} : vector<2x16x64xf32> to vector<2x1x64xf32>
    %136 = vector.shape_cast %135 : vector<2x1x64xf32> to vector<2x64xf32>
    %137 = arith.truncf %136 : vector<2x64xf32> to vector<2x64xbf16>
    %c12 = arith.constant 12 : index
    %c0_39 = arith.constant 0 : index
    %c0_40 = arith.constant 0 : index
    %138 = vector.load %arg1[%c12, %c0_39, %c0_40] : memref<16x64x256xbf16, #tpu.memory_space<vmem>>, vector<1x64x256xbf16>
    %139 = vector.shape_cast %138 : vector<1x64x256xbf16> to vector<64x256xbf16>
    %cst_41 = arith.constant dense<0.000000e+00> : vector<2x256xf32>
    %140 = tpu.matmul %137, %139, %cst_41 {dimension_numbers = #tpu.dot_dimension_numbers<[1], [0], [0], [1], [0, 0, 1, 1], [], []>} : vector<2x64xbf16>, vector<64x256xbf16>, vector<2x256xf32> -> vector<2x256xf32>
    %141 = arith.addf %134, %140 : vector<2x256xf32>
    %142 = vector.extract_strided_slice %49 {offsets = [0, 13, 0], sizes = [2, 1, 64], strides = [1, 1, 1]} : vector<2x16x64xf32> to vector<2x1x64xf32>
    %143 = vector.shape_cast %142 : vector<2x1x64xf32> to vector<2x64xf32>
    %144 = arith.truncf %143 : vector<2x64xf32> to vector<2x64xbf16>
    %c13 = arith.constant 13 : index
    %c0_42 = arith.constant 0 : index
    %c0_43 = arith.constant 0 : index
    %145 = vector.load %arg1[%c13, %c0_42, %c0_43] : memref<16x64x256xbf16, #tpu.memory_space<vmem>>, vector<1x64x256xbf16>
    %146 = vector.shape_cast %145 : vector<1x64x256xbf16> to vector<64x256xbf16>
    %cst_44 = arith.constant dense<0.000000e+00> : vector<2x256xf32>
    %147 = tpu.matmul %144, %146, %cst_44 {dimension_numbers = #tpu.dot_dimension_numbers<[1], [0], [0], [1], [0, 0, 1, 1], [], []>} : vector<2x64xbf16>, vector<64x256xbf16>, vector<2x256xf32> -> vector<2x256xf32>
    %148 = arith.addf %141, %147 : vector<2x256xf32>
    %149 = vector.extract_strided_slice %49 {offsets = [0, 14, 0], sizes = [2, 1, 64], strides = [1, 1, 1]} : vector<2x16x64xf32> to vector<2x1x64xf32>
    %150 = vector.shape_cast %149 : vector<2x1x64xf32> to vector<2x64xf32>
    %151 = arith.truncf %150 : vector<2x64xf32> to vector<2x64xbf16>
    %c14 = arith.constant 14 : index
    %c0_45 = arith.constant 0 : index
    %c0_46 = arith.constant 0 : index
    %152 = vector.load %arg1[%c14, %c0_45, %c0_46] : memref<16x64x256xbf16, #tpu.memory_space<vmem>>, vector<1x64x256xbf16>
    %153 = vector.shape_cast %152 : vector<1x64x256xbf16> to vector<64x256xbf16>
    %cst_47 = arith.constant dense<0.000000e+00> : vector<2x256xf32>
    %154 = tpu.matmul %151, %153, %cst_47 {dimension_numbers = #tpu.dot_dimension_numbers<[1], [0], [0], [1], [0, 0, 1, 1], [], []>} : vector<2x64xbf16>, vector<64x256xbf16>, vector<2x256xf32> -> vector<2x256xf32>
    %155 = arith.addf %148, %154 : vector<2x256xf32>
    %156 = vector.extract_strided_slice %49 {offsets = [0, 15, 0], sizes = [2, 1, 64], strides = [1, 1, 1]} : vector<2x16x64xf32> to vector<2x1x64xf32>
    %157 = vector.shape_cast %156 : vector<2x1x64xf32> to vector<2x64xf32>
    %158 = arith.truncf %157 : vector<2x64xf32> to vector<2x64xbf16>
    %c15 = arith.constant 15 : index
    %c0_48 = arith.constant 0 : index
    %c0_49 = arith.constant 0 : index
    %159 = vector.load %arg1[%c15, %c0_48, %c0_49] : memref<16x64x256xbf16, #tpu.memory_space<vmem>>, vector<1x64x256xbf16>
    %160 = vector.shape_cast %159 : vector<1x64x256xbf16> to vector<64x256xbf16>
    %cst_50 = arith.constant dense<0.000000e+00> : vector<2x256xf32>
    %161 = tpu.matmul %158, %160, %cst_50 {dimension_numbers = #tpu.dot_dimension_numbers<[1], [0], [0], [1], [0, 0, 1, 1], [], []>} : vector<2x64xbf16>, vector<64x256xbf16>, vector<2x256xf32> -> vector<2x256xf32>
    %162 = arith.addf %155, %161 : vector<2x256xf32>
    %c0_51 = arith.constant 0 : index
    %c0_52 = arith.constant 0 : index
    %163 = vector.load %arg2[%c0_51, %c0_52] : memref<1x256xf32, #tpu.memory_space<vmem>>, vector<1x256xf32>
    %164 = vector.broadcast %163 : vector<1x256xf32> to vector<2x256xf32>
    %165 = arith.addf %162, %164 : vector<2x256xf32>
    %cst_53 = arith.constant 0.000000e+00 : f32
    %166 = vector.broadcast %cst_53 : f32 to vector<2x256xf32>
    %167 = arith.maximumf %165, %166 : vector<2x256xf32>
    %168 = arith.truncf %167 : vector<2x256xf32> to vector<2x256xbf16>
    %c0_54 = arith.constant 0 : index
    %c0_55 = arith.constant 0 : index
    %169 = vector.load %arg3[%c0_54, %c0_55] : memref<256x64xbf16, #tpu.memory_space<vmem>>, vector<256x64xbf16>
    %cst_56 = arith.constant dense<0.000000e+00> : vector<2x64xf32>
    %170 = tpu.matmul %168, %169, %cst_56 {dimension_numbers = #tpu.dot_dimension_numbers<[1], [0], [0], [1], [0, 0, 1, 1], [], []>} : vector<2x256xbf16>, vector<256x64xbf16>, vector<2x64xf32> -> vector<2x64xf32>
    %c0_57 = arith.constant 0 : index
    %c0_58 = arith.constant 0 : index
    %171 = vector.load %arg4[%c0_57, %c0_58] : memref<1x64xf32, #tpu.memory_space<vmem>>, vector<1x64xf32>
    %172 = vector.broadcast %171 : vector<1x64xf32> to vector<2x64xf32>
    %173 = arith.addf %170, %172 : vector<2x64xf32>
    %cst_59 = arith.constant 0.000000e+00 : f32
    %174 = vector.broadcast %cst_59 : f32 to vector<2x64xf32>
    %175 = arith.maximumf %173, %174 : vector<2x64xf32>
    %c0_60 = arith.constant 0 : index
    %c0_61 = arith.constant 0 : index
    %176 = vector.load %arg5[%c0_60, %c0_61] : memref<64x3xf32, #tpu.memory_space<vmem>>, vector<64x3xf32>
    %cst_62 = arith.constant dense<0.000000e+00> : vector<2x3xf32>
    %177 = tpu.matmul %175, %176, %cst_62 {dimension_numbers = #tpu.dot_dimension_numbers<[1], [0], [0], [1], [0, 0, 1, 1], [], []>} : vector<2x64xf32>, vector<64x3xf32>, vector<2x3xf32> -> vector<2x3xf32>
    %c0_63 = arith.constant 0 : index
    %c0_64 = arith.constant 0 : index
    %178 = vector.load %arg6[%c0_63, %c0_64] : memref<1x3xf32, #tpu.memory_space<vmem>>, vector<1x3xf32>
    %179 = vector.broadcast %178 : vector<1x3xf32> to vector<2x3xf32>
    %180 = arith.addf %177, %179 : vector<2x3xf32>
    %181 = arith.negf %180 : vector<2x3xf32>
    %182 = math.exp %181 : vector<2x3xf32>
    %cst_65 = arith.constant 1.000000e+00 : f32
    %183 = vector.broadcast %cst_65 : f32 to vector<2x3xf32>
    %184 = arith.addf %183, %182 : vector<2x3xf32>
    %185 = arith.divf %183, %184 : vector<2x3xf32>
    %c0_66 = arith.constant 0 : index
    %c0_67 = arith.constant 0 : index
    %186 = vector.load %arg7[%c0_66, %c0_67] : memref<2x3xf32, #tpu.memory_space<vmem>>, vector<2x3xf32>
    tpu.vector_store %arg7[%c0_66, %c0_67], %185 {strides = array<i32>} : memref<2x3xf32, #tpu.memory_space<vmem>>, vector<2x3xf32>,
    return
  }
}

</mosaic_0001>

<bundles_post_ra>
// kernel: predictor3d_forward.1
= control target key start
LH: loop header
LB: loop body
LE: loop exit
PB: predicated region body
PF: predicated region fallthrough
CT: control target
= control target key end

     0   :  { %s4369_s13 = smov 127   ;;  %s6467_s0 = inlined_call_operand.vmem [shape: f32[32,6,36], index: 0, kind: input, shape index: {}]   ;;  %s6468_s1 = inlined_call_operand.vmem [shape: bf16[16,64,256], index: 1, kind: input, shape index: {}]   ;;  %s6469_s2 = inlined_call_operand.vmem [shape: f32[1,256], index: 2, kind: input, shape index: {}]   ;;  %s6470_s3 = inlined_call_operand.vmem [shape: bf16[256,64], index: 3, kind: input, shape index: {}]   ;;  %s6471_s4 = inlined_call_operand.vmem [shape: f32[1,64], index: 4, kind: input, shape index: {}]   ;;  %s6472_s5 = inlined_call_operand.vmem [shape: f32[64,3], index: 5, kind: input, shape index: {}]   ;;  %s6473_s6 = inlined_call_operand.vmem [shape: f32[1,3], index: 6, kind: input, shape index: {}]   ;;  %s6474_s7 = inlined_call_operand.hbm [shape: f32[2,3], index: 7, kind: output, shape index: {}]  }
   0x1   :  { %v4430_v0 = vld [vmem:[%s6467_s0 + $0x20] sm:$0x3f]  ;;  %v4435_v1 = vld [vmem:[%s6467_s0 + $0x88] sm:$0x3f]  ;;  %v4447_v4 = vld [vmem:[%s6467_s0 + $0x10] sm:$0x3f] }
   0x2   :  { %v3875_v2 = vpack.i.bf16 %v4430_v0, %v4435_v1  ;;  %v4442_v3 = vld [vmem:[%s6467_s0 + $0x8] sm:$0x3f]  ;;  %v4459_v7 = vld [vmem:[%s6467_s0 + $0x90] sm:$0x3f]  ;;  %v4468_v9 = vld [vmem:[%s6467_s0] sm:$0x3f] }
   0x3   :  { %v3865_v5 = vpack.i.bf16 %v4447_v4, %v4442_v3  ;;  %v4454_v6 = vld [vmem:[%s6467_s0 + $0x28] sm:$0x3f]  ;;  %v4473_v10 = vld [vmem:[%s6467_s0 + $0x18] sm:$0x3f]  ;;  %v4479_v11 = vld [vmem:[%s6467_s0 + $0x80] sm:$0x3f] }
   0x4   :  { %3876 = vrot.lane.b32.xlu1 %v3875_v2, %s4369_s13  ;;  %v3885_v8 = vpack.i.bf16 %v4454_v6, %v4459_v7  ;;  %v4484_v12 = vld [vmem:[%s6467_s0 + $0x98] sm:$0x3f] }
   0x5   :  { %3866 = vrot.lane.b32.xlu0 %v3865_v5, %s4369_s13 }
   0x6   :  { %3886 = vrot.lane.b32.xlu2 %v3885_v8, %s4369_s13 }
   0x7   :  { %12 = vsyncpa [#allocation3], 0  ;;  %v3870_v13 = vpack.i.bf16 %v4473_v10, %v4468_v9  ;;  %v3890_v14 = vpack.i.bf16 %v4484_v12, %v4479_v11  ;;  %s4370_s22 = smov 126   ;;  %v4496_v15 = vld [vmem:[%s6467_s0 + $0x30] sm:$0x3f]  ;;  %s4372_s25 = smov 116  }
   0x8   :  { %v4501_v16 = vld [vmem:[%s6467_s0 + $0xa0] sm:$0x3f]  ;;  %v4510_v18 = vld [vmem:[%s6467_s0 + $0x38] sm:$0x3f]  ;;  %v4515_v19 = vld [vmem:[%s6467_s0 + $0xa8] sm:$0x3f] }
   0x9   :  { %v3905_v17 = vpack.i.bf16 %v4501_v16, %v4496_v15  ;;  %v3915_v20 = vpack.i.bf16 %v4515_v19, %v4510_v18  ;;  %v4525_v21 = vld [vmem:[%s6467_s0 + $0xb0] sm:$0x3f]  ;;  %v4530_v22 = vld [vmem:[%s6467_s0 + $0xb8] sm:$0x3f]  ;;  %v4540_v24 = vld [vmem:[%s6467_s0 + $0x60] sm:$0x3f] }
   0xa   :  { %v3925_v23 = vpack.i.bf16 %v4530_v22, %v4525_v21  ;;  %v4545_v25 = vld [vmem:[%s6467_s0 + $0xc8] sm:$0x3f]  ;;  %v4556_v27 = vld [vmem:[%s6467_s0 + $0x50] sm:$0x3f]  ;;  %v4567_v30 = vld [vmem:[%s6467_s0 + $0xc0] sm:$0x3f] }
   0xb   :  { %v4551_v26 = vld [vmem:[%s6467_s0 + $0x48] sm:$0x3f]  ;;  %v3955_v28 = vpack.i.bf16 %v4540_v24, %v4545_v25  ;;  %v4572_v31 = vld [vmem:[%s6467_s0 + $0xd8] sm:$0x3f]  ;;  %v4577_v32 = vld [vmem:[%s6467_s0 + $0x40] sm:$0x3f] }
   0xc   :  { %3881 = vrot.lane.b32.xlu1 %v3865_v5, %s4370_s22  ;;  %v3945_v29 = vpack.i.bf16 %v4556_v27, %v4551_v26  ;;  %v4582_v33 = vld [vmem:[%s6467_s0 + $0x58] sm:$0x3f]  ;;  %v3970_v34 = vpack.i.bf16 %v4572_v31, %v4567_v30  ;;  %v4594_v36 = vld [vmem:[%s6467_s0 + $0x70] sm:$0x3f]  ;;  %v4599_v37 = vld [vmem:[%s6467_s0 + $0xe0] sm:$0x3f] }
   0xd   :  { %3871 = vrot.lane.b32.xlu0 %v3870_v13, %s4369_s13  ;;  %v3950_v35 = vpack.i.bf16 %v4582_v33, %v4577_v32  ;;  %v4604_v38 = vld [vmem:[%s6467_s0 + $0x68] sm:$0x3f]  ;;  %v4609_v39 = vld [vmem:[%s6467_s0 + $0xd0] sm:$0x3f]  ;;  %v3985_v40 = vpack.i.bf16 %v4599_v37, %v4594_v36  ;;  %v4624_v42 = vld [vmem:[%s6467_s0 + $0x78] sm:$0x3f] }
   0xe   :  { %3891 = vrot.lane.b32.xlu2 %v3890_v14, %s4369_s13  ;;  %v3965_v41 = vpack.i.bf16 %v4604_v38, %v4609_v39  ;;  %v4629_v43 = vld [vmem:[%s6467_s0 + $0xe8] sm:$0x3f]  ;;  %v58_v46 = vld [vmem:[%s6467_s0 + $0xf0] sm:$0x3f]  ;;  %v59_v47 = vld [vmem:[%s6467_s0 + $0xf8] sm:$0x3f] }
   0xf   :  { %v3995_v44 = vpack.i.bf16 %v4629_v43, %v4624_v42  ;;  %v4643_v48 = vpack.i.bf16 %v59_v47, %v58_v46  ;;  %vm893_vm0 = vcmask 1041409   ;;  %vm896_vm1 = vcmask 1042434   ;;  %s4373_s26 = smov 124   ;;  %s4374_s27 = smov 12  }
  0x10   :  { %vm899_vm2 = vcmask 1043459   ;;  %vm902_vm3 = vcmask 1044484   ;;  %vm905_vm4 = vcmask 1045509   ;;  %vm908_vm5 = vcmask 1046534   ;;  %s4375_s28 = smov 14   ;;  %s4376_s29 = smov 16  }
  0x11   :  { %vm911_vm6 = vcmask 1047559   ;;  %s4377_s30 = smov 30   ;;  %s4378_s8 = smov 32   ;;  %vm1307_vm7 = vcmask 31744   ;;  %vm1312_vm8 = vcmask 64512   ;;  %vm1317_vm9 = vcmask 97280  }
  0x12   :  { %s4379_s9 = smov 10   ;;  %s4380_s10 = smov 48   ;;  %vm6478_vm10 = vcmask 130048   ;;  %vm6482_vm11 = vcmask 162816   ;;  %vm6481_vm12 = vcmask 195584   ;;  %vm6479_vm13 = vcmask 228352  }
  0x13   :  { %s4381_s11 = smov 26   ;;  %s4382_s12 = smov 28   ;;  %vm6480_vm14 = vcmask 261120   ;;  %vm6483_vm15 = vcmask 293888  }
  0x14   :  { %3901 = vrot.lane.b32.xlu1 %v3875_v2, %s4370_s22  ;;  %s4383_s14 = smov 42   ;;  %s4384_s15 = smov 44  }
  0x15   :  { %3896 = vrot.lane.b32.xlu0 %v3870_v13, %s4370_s22  ;;  %s6477_s16 = smov 46  }
  0x16   :  { %3906 = vrot.lane.b32.xlu2 %v3905_v17, %s4369_s13 }
  0x1c   :  { %3916 = vrot.lane.b32.xlu1 %v3915_v20, %s4369_s13 }
  0x1d   :  { %3911 = vrot.lane.b32.xlu0 %v3885_v8, %s4370_s22 }
  0x1e   :  { %3921 = vrot.lane.b32.xlu2 %v3890_v14, %s4370_s22 }
  0x24   :  { %3931 = vrot.lane.b32.xlu1 %v3905_v17, %s4370_s22 }
  0x25   :  { %3926 = vrot.lane.b32.xlu0 %v3925_v23, %s4369_s13 }
  0x26   :  { %3936 = vrot.lane.b32.xlu2 %v3915_v20, %s4370_s22 }
  0x2c   :  { %3956 = vrot.lane.b32.xlu1 %v3955_v28, %s4369_s13 }
  0x2d   :  { %3941 = vrot.lane.b32.xlu0 %v3925_v23, %s4370_s22 }
  0x2e   :  { %3946 = vrot.lane.b32.xlu2 %v3945_v29, %s4369_s13 }
  0x34   :  { %3971 = vrot.lane.b32.xlu1 %v3970_v34, %s4369_s13 }
  0x35   :  { %3951 = vrot.lane.b32.xlu0 %v3950_v35, %s4369_s13 }
  0x36   :  { %3961 = vrot.lane.b32.xlu2 %v3945_v29, %s4370_s22 }
  0x3c   :  { %3986 = vrot.lane.b32.xlu1 %v3985_v40, %s4369_s13 }
  0x3d   :  { %3966 = vrot.lane.b32.xlu0 %v3965_v41, %s4369_s13 }
  0x3e   :  { %3976 = vrot.lane.b32.xlu2 %v3950_v35, %s4370_s22 }
  0x44   :  { %4001 = vrot.lane.b32.xlu1 %v3970_v34, %s4370_s22 }
  0x45   :  { %3981 = vrot.lane.b32.xlu0 %v3955_v28, %s4370_s22 }
  0x46   :  { %3991 = vrot.lane.b32.xlu2 %v3965_v41, %s4370_s22 }
  0x4c   :  { %4016 = vrot.lane.b32.xlu1 %v3995_v44, %s4370_s22 }
  0x4d   :  { %3996 = vrot.lane.b32.xlu0 %v3995_v44, %s4369_s13 }
  0x4e   :  { %4006 = vrot.lane.b32.xlu2 %v4643_v48, %s4369_s13  ;;  %s4371_s13 = smov 122  }
  0x55   :  { %4011 = vrot.lane.b32.xlu0 %v3985_v40, %s4370_s22 }
  0x60   :  { %v3887_v45 = vpop.permute.xlu2 %3886 }
  0x68   :  { %v3892_v49 = vpop.permute.xlu2 %3891 }
  0x70   :  { %v4647_v51 = vpop.permute.xlu2 %3906 }
  0x76   :  { %v3877_v50 = vpop.permute.xlu1 %3876 }
  0x77   :  { %v3867_v52 = vpop.permute.xlu0 %3866  ;;  %v3879_v2 = vunpack.i.h.bf16 %v3877_v50  ;;  %v3878_v5 = vunpack.i.l.bf16 %v3877_v50 }
  0x78   :  { %v3869_v53 = vunpack.i.h.bf16 %v3867_v52  ;;  %v3868_v54 = vunpack.i.l.bf16 %v3867_v52  ;;  %v3922_v61 = vpop.permute.xlu2 %3921 }
  0x79   :  { %v192_v20 = vmax.f32 %v4430_v0, %v3879_v2  ;;  %v205_v23 = vmax.f32 %v4435_v1, %v3878_v5  ;;  %v3909_v5 = vunpack.i.h.bf16 %v4647_v51 }
  0x7a   :  { %v190_v56 = vmax.f32 %v4447_v4, %v3869_v53  ;;  %v189_v57 = vmax.f32 %v4442_v3, %v3868_v54  ;;  %v3894_v4 = vunpack.i.h.bf16 %v3892_v49  ;;  %v3893_v3 = vunpack.i.l.bf16 %v3892_v49 }
  0x7b   :  { %v3924_v53 = vunpack.i.h.bf16 %v3922_v61  ;;  %v3923_v54 = vunpack.i.l.bf16 %v3922_v61 }
  0x7c   :  { %v207_v49 = vmax.f32 %v4484_v12, %v3894_v4  ;;  %v204_v0 = vmax.f32 %v4479_v11, %v3893_v3 }
  0x7e   :  { %v3882_v55 = vpop.permute.xlu1 %3881  ;;  %v4679_v12 = vmax.f32 %v204_v0, %v3923_v54 }
  0x7f   :  { %v3884_v58 = vunpack.i.h.bf16 %v3882_v55  ;;  %v3883_v59 = vunpack.i.l.bf16 %v3882_v55  ;;  %v3872_v60 = vpop.permute.xlu0 %3871  ;;  %v3888_v55 = vunpack.i.l.bf16 %v3887_v45 }
  0x80   :  { %v3874_v13 = vunpack.i.h.bf16 %v3872_v60  ;;  %v3873_v14 = vunpack.i.l.bf16 %v3872_v60  ;;  %v3937_v46 = vpop.permute.xlu2 %3936 }
  0x81   :  { %v4651_v62 = vmax.f32 %v189_v57, %v3883_v59  ;;  %v4653_v63 = vmax.f32 %v190_v56, %v3884_v58  ;;  %v4681_v57 = vmax.f32 %v207_v49, %v3924_v53 }
  0x82   :  { %v191_v35 = vmax.f32 %v4473_v10, %v3874_v13  ;;  %v188_v40 = vmax.f32 %v4468_v9, %v3873_v14  ;;  %v3889_v10 = vunpack.i.h.bf16 %v3887_v45  ;;  %v206_v45 = vmax.f32 %v4459_v7, %v3888_v55 }
  0x83   :  { %v4020_v8 = vpack.i.bf16 %v4653_v63, %v4651_v62  ;;  %v4045_v4 = vpack.i.bf16 %v4681_v57, %v4679_v12 }
  0x84   :  { %v193_v59 = vmax.f32 %v4454_v6, %v3889_v10  ;;  %v208_v6 = vmax.f32 %v4501_v16, %v3909_v5 }
  0x85   :  { %4021 = vrot.lane.b32.xlu1 %v4020_v8, %s4371_s13 }
  0x86   :  { %v3902_v17 = vpop.permute.xlu1 %3901 }
  0x87   :  { %v3904_v28 = vunpack.i.h.bf16 %v3902_v17  ;;  %v3903_v29 = vunpack.i.l.bf16 %v3902_v17  ;;  %v3897_v34 = vpop.permute.xlu0 %3896 }
  0x88   :  { %v3899_v41 = vunpack.i.h.bf16 %v3897_v34  ;;  %v3898_v44 = vunpack.i.l.bf16 %v3897_v34  ;;  %v3947_v2 = vpop.permute.xlu2 %3946 }
  0x89   :  { %v4662_v47 = vmax.f32 %v192_v20, %v3904_v28  ;;  %v4664_v50 = vmax.f32 %v205_v23, %v3903_v29  ;;  %v3948_v5 = vunpack.i.l.bf16 %v3947_v2 }
  0x8a   :  { %v4668_v52 = vmax.f32 %v188_v40, %v3898_v44  ;;  %v4670_v1 = vmax.f32 %v191_v35, %v3899_v41  ;;  %v3939_v40 = vunpack.i.h.bf16 %v3937_v46  ;;  %v3938_v41 = vunpack.i.l.bf16 %v3937_v46 }
  0x8b   :  { %v4030_v9 = vpack.i.bf16 %v4662_v47, %v4664_v50 }
  0x8c   :  { %v4025_v56 = vpack.i.bf16 %v4670_v1, %v4668_v52 }
  0x8d   :  { %4036 = vrot.lane.b32.xlu1 %v4020_v8, %s4372_s25  ;;  %4031 = vrot.lane.b32.xlu0 %v4030_v9, %s4371_s13  ;;  %v3908_v8 = vunpack.i.l.bf16 %v4647_v51 }
  0x8e   :  { %4026 = vrot.lane.b32.xlu2 %v4025_v56, %s4371_s13  ;;  %v3917_v11 = vpop.permute.xlu1 %3916 }
  0x8f   :  { %v3912_v58 = vpop.permute.xlu0 %3911  ;;  %v194_v7 = vmax.f32 %v4496_v15, %v3908_v8  ;;  %v3919_v17 = vunpack.i.h.bf16 %v3917_v11  ;;  %v3918_v20 = vunpack.i.l.bf16 %v3917_v11 }
  0x90   :  { %v3914_v60 = vunpack.i.h.bf16 %v3912_v58  ;;  %v3913_v61 = vunpack.i.l.bf16 %v3912_v58  ;;  %v3962_v44 = vpop.permute.xlu2 %3961 }
  0x91   :  { %v209_v49 = vmax.f32 %v4515_v19, %v3919_v17  ;;  %v195_v16 = vmax.f32 %v4510_v18, %v3918_v20  ;;  %v3963_v17 = vunpack.i.l.bf16 %v3962_v44 }
  0x92   :  { %v4687_v13 = vmax.f32 %v193_v59, %v3914_v60  ;;  %v4689_v14 = vmax.f32 %v206_v45, %v3913_v61  ;;  %v3949_v61 = vunpack.i.h.bf16 %v3947_v2 }
  0x93   :  { %v4711_v10 = vmax.f32 %v195_v16, %v3938_v41  ;;  %v4713_v46 = vmax.f32 %v209_v49, %v3939_v40 }
  0x94   :  { %v4040_v3 = vpack.i.bf16 %v4687_v13, %v4689_v14 }
  0x95   :  { %4046 = vrot.lane.b32.xlu0 %v4045_v4, %s4371_s13  ;;  %4051 = vrot.lane.b32.xlu1 %v4025_v56, %s4372_s25 }
  0x96   :  { %4041 = vrot.lane.b32.xlu2 %v4040_v3, %s4371_s13  ;;  %v3932_v51 = vpop.permute.xlu1 %3931 }
  0x97   :  { %v3934_v23 = vunpack.i.h.bf16 %v3932_v51  ;;  %v3933_v28 = vunpack.i.l.bf16 %v3932_v51  ;;  %v3927_v29 = vpop.permute.xlu0 %3926  ;;  %v3964_v51 = vunpack.i.h.bf16 %v3962_v44 }
  0x98   :  { %v3929_v0 = vunpack.i.h.bf16 %v3927_v29  ;;  %v3928_v53 = vunpack.i.l.bf16 %v3927_v29  ;;  %v3977_v60 = vpop.permute.xlu2 %3976 }
  0x99   :  { %v4700_v34 = vmax.f32 %v208_v6, %v3934_v23  ;;  %v4702_v35 = vmax.f32 %v194_v7, %v3933_v28  ;;  %v198_v6 = vmax.f32 %v4556_v27, %v3949_v61  ;;  %v197_v7 = vmax.f32 %v4551_v26, %v3948_v5 }
  0x9a   :  { %v211_v19 = vmax.f32 %v4530_v22, %v3929_v0  ;;  %v210_v18 = vmax.f32 %v4525_v21, %v3928_v53  ;;  %v3979_v23 = vunpack.i.h.bf16 %v3977_v60 }
  0x9b   :  { %v4060_v15 = vpack.i.bf16 %v4700_v34, %v4702_v35  ;;  %v4732_v28 = vmax.f32 %v197_v7, %v3963_v17  ;;  %v4734_v29 = vmax.f32 %v198_v6, %v3964_v51 }
  0x9d   :  { %4061 = vrot.lane.b32.xlu0 %v4060_v15, %s4371_s13  ;;  %4066 = vrot.lane.b32.xlu1 %v4040_v3, %s4372_s25  ;;  %v4105_v16 = vpack.i.bf16 %v4734_v29, %v4732_v28 }
  0x9e   :  { %4056 = vrot.lane.b32.xlu2 %v4030_v9, %s4372_s25  ;;  %v3957_v54 = vpop.permute.xlu1 %3956  ;;  %v4070_v9 = vpack.i.bf16 %v4713_v46, %v4711_v10 }
  0x9f   :  { %v3942_v55 = vpop.permute.xlu0 %3941  ;;  %v3959_v49 = vunpack.i.h.bf16 %v3957_v54 }
  0xa0   :  { %v3944_v56 = vunpack.i.h.bf16 %v3942_v55  ;;  %v3943_v11 = vunpack.i.l.bf16 %v3942_v55  ;;  %v3992_v40 = vpop.permute.xlu2 %3991  ;;  %v3958_v55 = vunpack.i.l.bf16 %v3957_v54 }
  0xa1   :  { %v3994_v0 = vunpack.i.h.bf16 %v3992_v40  ;;  %v3993_v53 = vunpack.i.l.bf16 %v3992_v40 }
  0xa2   :  { %v4717_v58 = vmax.f32 %v210_v18, %v3943_v11  ;;  %v4719_v59 = vmax.f32 %v211_v19, %v3944_v56  ;;  %v213_v61 = vmax.f32 %v4545_v25, %v3958_v55 }
  0xa4   :  { %v4080_v45 = vpack.i.bf16 %v4719_v59, %v4717_v58 }
  0xa5   :  { %4076 = vrot.lane.b32.xlu0 %v4045_v4, %s4372_s25  ;;  %v3978_v4 = vunpack.i.l.bf16 %v3977_v60  ;;  %v200_v60 = vmax.f32 %v4540_v24, %v3959_v49 }
  0xa6   :  { %4081 = vrot.lane.b32.xlu1 %v4080_v45, %s4371_s13  ;;  %4071 = vrot.lane.b32.xlu2 %v4070_v9, %s4371_s13  ;;  %v3972_v21 = vpop.permute.xlu1 %3971 }
  0xa7   :  { %v3952_v22 = vpop.permute.xlu0 %3951  ;;  %v3974_v56 = vunpack.i.h.bf16 %v3972_v21  ;;  %v3973_v11 = vunpack.i.l.bf16 %v3972_v21 }
  0xa8   :  { %v3954_v8 = vunpack.i.h.bf16 %v3952_v22  ;;  %v3953_v3 = vunpack.i.l.bf16 %v3952_v22 }
  0xa9   :  { %v215_v21 = vmax.f32 %v4572_v31, %v3974_v56  ;;  %v212_v22 = vmax.f32 %v4567_v30, %v3973_v11 }
  0xaa   :  { %v199_v20 = vmax.f32 %v4582_v33, %v3954_v8  ;;  %v196_v2 = vmax.f32 %v4577_v32, %v3953_v3 }
  0xac   :  { %v4739_v27 = vmax.f32 %v196_v2, %v3978_v4  ;;  %v4741_v26 = vmax.f32 %v199_v20, %v3979_v23 }
  0xad   :  { %4096 = vrot.lane.b32.xlu0 %v4070_v9, %s4372_s25 }
  0xae   :  { %4101 = vrot.lane.b32.xlu1 %v4080_v45, %s4372_s25  ;;  %4086 = vrot.lane.b32.xlu2 %v4060_v15, %s4372_s25  ;;  %v3987_v33 = vpop.permute.xlu1 %3986  ;;  %v4110_v18 = vpack.i.bf16 %v4741_v26, %v4739_v27 }
  0xaf   :  { %v3967_v41 = vpop.permute.xlu0 %3966  ;;  %v3989_v51 = vunpack.i.h.bf16 %v3987_v33  ;;  %v3988_v17 = vunpack.i.l.bf16 %v3987_v33 }
  0xb0   :  { %v3969_v32 = vunpack.i.h.bf16 %v3967_v41  ;;  %v3968_v44 = vunpack.i.l.bf16 %v3967_v41 }
  0xb1   :  { %v216_v2 = vmax.f32 %v4599_v37, %v3989_v51  ;;  %v202_v23 = vmax.f32 %v4594_v36, %v3988_v17 }
  0xb2   :  { %v201_v19 = vmax.f32 %v4604_v38, %v3969_v32  ;;  %v214_v15 = vmax.f32 %v4609_v39, %v3968_v44 }
  0xb4   :  { %v4750_v45 = vmax.f32 %v201_v19, %v3994_v0  ;;  %v4752_v9 = vmax.f32 %v214_v15, %v3993_v53 }
  0xb5   :  { %4106 = vrot.lane.b32.xlu0 %v4105_v16, %s4371_s13 }
  0xb6   :  { %6485 = vst [vmem:[#allocation5_spill] sm:$0xff] %v4750_v45  ;;  %4111 = vrot.lane.b32.xlu1 %v4110_v18, %s4371_s13  ;;  %4091 = vrot.lane.b32.xlu2 %v4643_v48, %s4370_s22  ;;  %v4002_v39 = vpop.permute.xlu1 %4001  ;;  %v4763_v8 = vpack.i.bf16 %v4750_v45, %v4752_v9 }
  0xb7   :  { %6486 = vst [vmem:[#allocation6_spill] sm:$0xff] %v4752_v9  ;;  %v3982_v38 = vpop.permute.xlu0 %3981  ;;  %v4004_v3 = vunpack.i.h.bf16 %v4002_v39  ;;  %v4003_v6 = vunpack.i.l.bf16 %v4002_v39 }
  0xb8   :  { %v3984_v54 = vunpack.i.h.bf16 %v3982_v38  ;;  %v3983_v5 = vunpack.i.l.bf16 %v3982_v38 }
  0xb9   :  { %v4775_v30 = vmax.f32 %v212_v22, %v4003_v6  ;;  %v4777_v31 = vmax.f32 %v215_v21, %v4004_v3 }
  0xba   :  { %v4765_v24 = vmax.f32 %v200_v60, %v3984_v54  ;;  %v4767_v25 = vmax.f32 %v213_v61, %v3983_v5 }
  0xbb   :  { %v4781_v20 = vpack.i.bf16 %v4777_v31, %v4775_v30 }
  0xbc   :  { %v4115_v48 = vpack.i.bf16 %v4765_v24, %v4767_v25 }
  0xbd   :  { %4121 = vrot.lane.b32.xlu0 %v4105_v16, %s4372_s25 }
  0xbe   :  { %4126 = vrot.lane.b32.xlu1 %v4763_v8, %s4371_s13  ;;  %4116 = vrot.lane.b32.xlu2 %v4115_v48, %s4371_s13  ;;  %v4017_v0 = vpop.permute.xlu1 %4016 }
  0xbf   :  { %v3997_v7 = vpop.permute.xlu0 %3996  ;;  %v4019_v53 = vunpack.i.h.bf16 %v4017_v0  ;;  %v4018_v55 = vunpack.i.l.bf16 %v4017_v0 }
  0xc0   :  { %v3999_v32 = vunpack.i.h.bf16 %v3997_v7  ;;  %v3998_v33 = vunpack.i.l.bf16 %v3997_v7 }
  0xc2   :  { %v217_v36 = vmax.f32 %v4629_v43, %v3999_v32  ;;  %v203_v37 = vmax.f32 %v4624_v42, %v3998_v33 }
  0xc4   :  { %v4801_v19 = vmax.f32 %v203_v37, %v4018_v55  ;;  %v4803_v15 = vmax.f32 %v217_v36, %v4019_v53 }
  0xc5   :  { %4136 = vrot.lane.b32.xlu0 %v4110_v18, %s4372_s25  ;;  %v4805_v18 = vpop.permute.xlu2 %4006 }
  0xc6   :  { %4141 = vrot.lane.b32.xlu1 %v4115_v48, %s4372_s25  ;;  %4131 = vrot.lane.b32.xlu2 %v4781_v20, %s4371_s13 }
  0xc7   :  { %v4012_v4 = vpop.permute.xlu0 %4011 }
  0xc8   :  { %v4014_v40 = vunpack.i.h.bf16 %v4012_v4  ;;  %v4013_v41 = vunpack.i.l.bf16 %v4012_v4 }
  0xca   :  { %v4789_v44 = vmax.f32 %v216_v2, %v4014_v40  ;;  %v4791_v49 = vmax.f32 %v202_v23, %v4013_v41 }
  0xcc   :  { %v4795_v16 = vpack.i.bf16 %v4789_v44, %v4791_v49 }
  0xce   :  { %4146 = vrot.lane.b32.xlu2 %v4795_v16, %s4371_s13 }
  0xe8   :  { %v4027_v56 = vpop.permute.xlu2 %4026 }
  0xe9   :  { %v4028_v22 = vunpack.i.l.bf16 %v4027_v56  ;;  %v4029_v48 = vunpack.i.h.bf16 %v4027_v56 }
  0xeb   :  { %v476_v32 = vmax.f32 %v4668_v52, %v4028_v22 }
  0xf0   :  { %v4042_v11 = vpop.permute.xlu2 %4041 }
  0xf1   :  { %v4044_v53 = vunpack.i.h.bf16 %v4042_v11 }
  0xf3   :  { %v481_v52 = vmax.f32 %v4687_v13, %v4044_v53 }
  0xf7   :  { %v4022_v60 = vpop.permute.xlu1 %4021 }
  0xf8   :  { %v4057_v43 = vpop.permute.xlu2 %4056  ;;  %v4024_v42 = vunpack.i.h.bf16 %v4022_v60  ;;  %v4023_v54 = vunpack.i.l.bf16 %v4022_v60 }
  0xf9   :  { %v4058_v23 = vunpack.i.l.bf16 %v4057_v43  ;;  %v4059_v55 = vunpack.i.h.bf16 %v4057_v43 }
  0xfa   :  { %v478_v7 = vmax.f32 %v4653_v63, %v4024_v42  ;;  %v477_v51 = vmax.f32 %v4651_v62, %v4023_v54  ;;  %v4043_v63 = vunpack.i.l.bf16 %v4042_v11 }
  0xff   :  { %v4037_v61 = vpop.permute.xlu1 %4036  ;;  %v4032_v38 = vpop.permute.xlu0 %4031 }
 0x100   :  { %v4033_v39 = vunpack.i.l.bf16 %v4032_v38  ;;  %v4039_v5 = vunpack.i.h.bf16 %v4037_v61  ;;  %v4038_v21 = vunpack.i.l.bf16 %v4037_v61  ;;  %v4034_v3 = vunpack.i.h.bf16 %v4032_v38  ;;  %v4812_v37 = vpop.permute.xlu2 %4071 }
 0x101   :  { %v4073_v13 = vunpack.i.l.bf16 %v4812_v37 }
 0x102   :  { %v493_v6 = vmax.f32 %v4664_v50, %v4033_v39  ;;  %v605_v4 = vmax.f32 %v477_v51, %v4038_v21  ;;  %v606_v40 = vmax.f32 %v478_v7, %v4039_v5  ;;  %v480_v33 = vmax.f32 %v4662_v47, %v4034_v3 }
 0x103   :  { %v479_v50 = vmax.f32 %v4670_v1, %v4029_v48  ;;  %v494_v47 = vmax.f32 %v4689_v14, %v4043_v63  ;;  %v4074_v1 = vunpack.i.h.bf16 %v4812_v37 }
 0x104   :  { %v621_v36 = vmax.f32 %v493_v6, %v4058_v23  ;;  %v669_v56 = vrot.slane %v605_v4, 1  ;;  %v670_v60 = vrot.slane %v606_v40, 1  ;;  %v608_v61 = vmax.f32 %v480_v33, %v4059_v55 }
 0x105   :  { %v765_v11 = vrot.slane %v605_v4, 2  ;;  %v766_v7 = vrot.slane %v606_v40, 2 }
 0x106   :  { %v685_v38 = vrot.slane %v621_v36, 1  ;;  %v733_v21 = vmax.f32 %v605_v4, %v669_v56  ;;  %v734_v22 = vmax.f32 %v606_v40, %v670_v60  ;;  %v672_v43 = vrot.slane %v608_v61, 1 }
 0x107   :  { %v4047_v17 = vpop.permute.xlu0 %4046  ;;  %v4052_v2 = vpop.permute.xlu1 %4051 }
 0x108   :  { %v4053_v41 = vunpack.i.l.bf16 %v4052_v2  ;;  %v4054_v0 = vunpack.i.h.bf16 %v4052_v2  ;;  %v749_v6 = vmax.f32 %v621_v36, %v685_v38  ;;  %v4049_v51 = vunpack.i.h.bf16 %v4047_v17  ;;  %v4087_v33 = vpop.permute.xlu2 %4086 }
 0x109   :  { %v736_v63 = vmax.f32 %v608_v61, %v672_v43  ;;  %v4088_v60 = vunpack.i.l.bf16 %v4087_v33 }
 0x10a   :  { %v604_v62 = vmax.f32 %v476_v32, %v4053_v41  ;;  %v607_v39 = vmax.f32 %v479_v50, %v4054_v0  ;;  %v781_v41 = vrot.slane %v621_v36, 2  ;;  %v4048_v32 = vunpack.i.l.bf16 %v4047_v17 }
 0x10b   :  { %v4819_v0 = vmax.f32 %v733_v21, %v765_v11  ;;  %v4821_v50 = vmax.f32 %v734_v22, %v766_v7  ;;  %v495_v36 = vmax.f32 %v4681_v57, %v4049_v51  ;;  %v497_v57 = vmax.f32 %v4713_v46, %v4074_v1 }
 0x10c   :  { %v668_v5 = vrot.slane %v604_v62, 1  ;;  %v671_v48 = vrot.slane %v607_v39, 1  ;;  %v4824_v55 = vmax.f32 %v749_v6, %v781_v41  ;;  %v764_v56 = vrot.slane %v604_v62, 2 }
 0x10d   :  { %v768_v6 = vrot.slane %v608_v61, 2 }
 0x10e   :  { %v732_v14 = vmax.f32 %v604_v62, %v668_v5  ;;  %v735_v40 = vmax.f32 %v607_v39, %v671_v48  ;;  %v767_v5 = vrot.slane %v607_v39, 2  ;;  %v892_v62 = vrot.slane %v4819_v0, 7 }
 0x10f   :  { %v4062_v42 = vpop.permute.xlu0 %4061  ;;  %v4067_v54 = vpop.permute.xlu1 %4066  ;;  %v895_v39 = vrot.slane %v4821_v50, 6  ;;  %v4836_v51 = vmax.f32 %v736_v63, %v768_v6 }
 0x110   :  { %v4063_v3 = vunpack.i.l.bf16 %v4062_v42  ;;  %v4064_v2 = vunpack.i.h.bf16 %v4062_v42  ;;  %v4068_v23 = vunpack.i.l.bf16 %v4067_v54  ;;  %v4069_v53 = vunpack.i.h.bf16 %v4067_v54 }
 0x111   :  { %v492_v42 = vmax.f32 %v4679_v12, %v4048_v32  ;;  %v4829_v21 = vmax.f32 %v732_v14, %v764_v56  ;;  %v4833_v48 = vmax.f32 %v735_v40, %v767_v5 }
 0x112   :  { %v482_v4 = vmax.f32 %v4702_v35, %v4063_v3  ;;  %v496_v17 = vmax.f32 %v4700_v34, %v4064_v2  ;;  %v622_v37 = vmax.f32 %v494_v47, %v4068_v23  ;;  %v4089_v35 = vunpack.i.h.bf16 %v4087_v33 }
 0x113   :  { %v609_v3 = vmax.f32 %v481_v52, %v4069_v53  ;;  %v927_v2 = vrot.slane %v4824_v55, 7  ;;  %v483_v52 = vmax.f32 %v4711_v10, %v4073_v13  ;;  %v894_v23 = vsel %vm893_vm0, %v892_v62, %v4829_v21 }
 0x114   :  { %v610_v22 = vmax.f32 %v482_v4, %v4088_v60  ;;  %v624_v34 = vmax.f32 %v496_v17, %v4089_v35  ;;  %v686_v47 = vrot.slane %v622_v37, 1  ;;  %v898_v1 = vrot.slane %v4833_v48, 5 }
 0x115   :  { %v673_v41 = vrot.slane %v609_v3, 1  ;;  %v769_v14 = vrot.slane %v609_v3, 2  ;;  %v782_v63 = vrot.slane %v622_v37, 2  ;;  %v897_v17 = vsel %vm896_vm1, %v895_v39, %v894_v23 }
 0x116   :  { %v674_v61 = vrot.slane %v610_v22, 1  ;;  %v770_v32 = vrot.slane %v610_v22, 2  ;;  %v688_v4 = vrot.slane %v624_v34, 1  ;;  %v750_v53 = vmax.f32 %v622_v37, %v686_v47 }
 0x117   :  { %v4077_v38 = vpop.permute.xlu0 %4076 }
 0x118   :  { %v4082_v54 = vpop.permute.xlu1 %4081  ;;  %v4079_v11 = vunpack.i.h.bf16 %v4077_v38  ;;  %v4078_v43 = vunpack.i.l.bf16 %v4077_v38  ;;  %v738_v38 = vmax.f32 %v610_v22, %v674_v61  ;;  %v752_v9 = vmax.f32 %v624_v34, %v688_v4 }
 0x119   :  { %v4083_v40 = vunpack.i.l.bf16 %v4082_v54  ;;  %v4844_v47 = vmax.f32 %v750_v53, %v782_v63  ;;  %v900_v63 = vsel %vm899_vm2, %v898_v1, %v897_v17 }
 0x11a   :  { %v620_v7 = vmax.f32 %v492_v42, %v4078_v43  ;;  %v623_v12 = vmax.f32 %v495_v36, %v4079_v11  ;;  %v4084_v36 = vunpack.i.h.bf16 %v4082_v54  ;;  %v737_v42 = vmax.f32 %v609_v3, %v673_v41 }
 0x11b   :  { %v498_v54 = vmax.f32 %v4717_v58, %v4083_v40  ;;  %v4852_v61 = vmax.f32 %v738_v38, %v770_v32 }
 0x11c   :  { %v684_v46 = vrot.slane %v620_v7, 1  ;;  %v687_v33 = vrot.slane %v623_v12, 1  ;;  %v780_v37 = vrot.slane %v620_v7, 2  ;;  %v783_v45 = vrot.slane %v623_v12, 2 }
 0x11d   :  { %v499_v39 = vmax.f32 %v4719_v59, %v4084_v36  ;;  %v4848_v3 = vmax.f32 %v737_v42, %v769_v14 }
 0x11e   :  { %v748_v5 = vmax.f32 %v620_v7, %v684_v46  ;;  %v751_v11 = vmax.f32 %v623_v12, %v687_v33  ;;  %v901_v7 = vrot.slane %v4836_v51, 4 }
 0x11f   :  { %v4097_v56 = vpop.permute.xlu0 %4096  ;;  %v904_v36 = vrot.slane %v4848_v3, 3 }
 0x120   :  { %v4099_v60 = vunpack.i.h.bf16 %v4097_v56  ;;  %v4098_v10 = vunpack.i.l.bf16 %v4097_v56  ;;  %v4102_v13 = vpop.permute.xlu1 %4101  ;;  %v784_v56 = vrot.slane %v624_v34, 2  ;;  %v4850_v23 = vmax.f32 %v748_v5, %v780_v37 }
 0x121   :  { %v4103_v35 = vunpack.i.l.bf16 %v4102_v13  ;;  %v4104_v6 = vunpack.i.h.bf16 %v4102_v13  ;;  %v4854_v41 = vmax.f32 %v751_v11, %v783_v45  ;;  %v929_v34 = vrot.slane %v4844_v47, 6 }
 0x122   :  { %v611_v43 = vmax.f32 %v483_v52, %v4098_v10  ;;  %v625_v62 = vmax.f32 %v497_v57, %v4099_v60  ;;  %v4857_v58 = vmax.f32 %v752_v9, %v784_v56  ;;  %v928_v32 = vsel %vm893_vm0, %v927_v2, %v4850_v23 }
 0x123   :  { %v626_v57 = vmax.f32 %v498_v54, %v4103_v35  ;;  %v627_v46 = vmax.f32 %v499_v39, %v4104_v6  ;;  %v931_v9 = vrot.slane %v4854_v41, 5  ;;  %v995_v2 = vrot.slane %v4829_v21, 1 }
 0x124   :  { %v675_v22 = vrot.slane %v611_v43, 1  ;;  %v689_v52 = vrot.slane %v625_v62, 1  ;;  %v785_v4 = vrot.slane %v625_v62, 2  ;;  %v771_v60 = vrot.slane %v611_v43, 2 }
 0x125   :  { %v690_v59 = vrot.slane %v626_v57, 1  ;;  %v691_v53 = vrot.slane %v627_v46, 1  ;;  %v786_v40 = vrot.slane %v626_v57, 2  ;;  %v787_v38 = vrot.slane %v627_v46, 2 }
 0x126   :  { %v753_v12 = vmax.f32 %v625_v62, %v689_v52  ;;  %v739_v14 = vmax.f32 %v611_v43, %v675_v22  ;;  %v903_v17 = vsel %vm902_vm3, %v901_v7, %v900_v63  ;;  %v930_v62 = vsel %vm896_vm1, %v929_v34, %v928_v32 }
 0x127   :  { %v4107_v33 = vpop.permute.xlu0 %4106  ;;  %v754_v45 = vmax.f32 %v626_v57, %v690_v59  ;;  %v755_v13 = vmax.f32 %v627_v46, %v691_v53  ;;  %v906_v43 = vsel %vm905_vm4, %v904_v36, %v903_v17  ;;  %v932_v6 = vsel %vm899_vm2, %v931_v9, %v930_v62 }
 0x128   :  { %v4865_v10 = vmax.f32 %v753_v12, %v785_v4  ;;  %v4109_v5 = vunpack.i.h.bf16 %v4107_v33  ;;  %v4108_v35 = vunpack.i.l.bf16 %v4107_v33  ;;  %v4869_v11 = vmax.f32 %v739_v14, %v771_v60  ;;  %v4886_v59 = vpop.permute.xlu1 %4111 }
 0x129   :  { %v4867_v42 = vmax.f32 %v754_v45, %v786_v40  ;;  %v4872_v1 = vmax.f32 %v755_v13, %v787_v38  ;;  %v933_v37 = vrot.slane %v4857_v58, 4  ;;  %v907_v52 = vrot.slane %v4852_v61, 2 }
 0x12a   :  { %v935_v54 = vrot.slane %v4865_v10, 3  ;;  %v486_v56 = vmax.f32 %v4734_v29, %v4109_v5  ;;  %v485_v39 = vmax.f32 %v4732_v28, %v4108_v35  ;;  %v910_v34 = vrot.slane %v4869_v11, 1 }
 0x12b   :  { %v937_v57 = vrot.slane %v4867_v42, 2  ;;  %v934_v12 = vsel %vm902_vm3, %v933_v37, %v932_v6  ;;  %v939_v29 = vrot.slane %v4872_v1, 1  ;;  %v1023_v53 = vrot.slane %v4850_v23, 1 }
 0x12c   :  { %v936_v33 = vsel %vm905_vm4, %v935_v54, %v934_v12  ;;  %v909_v63 = vsel %vm908_vm5, %v907_v52, %v906_v43  ;;  %v4113_v45 = vunpack.i.l.bf16 %v4886_v59  ;;  %v996_v36 = vsel %vm893_vm0, %v4819_v0, %v995_v2 }
 0x12d   :  { %v938_v4 = vsel %vm908_vm5, %v937_v57, %v936_v33  ;;  %v4900_v40 = vsel %vm911_vm6, %v910_v34, %v909_v63  ;;  %v997_v13 = vrot.slane %v4821_v50, 7  ;;  %v1025_v38 = vrot.slane %v4844_v47, 7 }
 0x12e   :  { %v4896_v32 = vsel %vm911_vm6, %v939_v29, %v938_v4  ;;  %v1024_v35 = vsel %vm893_vm0, %v4824_v55, %v1023_v53  ;;  %v999_v62 = vrot.slane %v4833_v48, 6  ;;  %v484_v43 = vmax.f32 %v4739_v27, %v4113_v45 }
 0x12f   :  { %v4122_v22 = vpop.permute.xlu0 %4121  ;;  %v4160_v60 = vpack.i.bf16 %v4896_v32, %v4900_v40  ;;  %v998_v17 = vsel %vm896_vm1, %v997_v13, %v996_v36  ;;  %v1026_v37 = vsel %vm896_vm1, %v1025_v38, %v1024_v35  ;;  %v1027_v54 = vrot.slane %v4854_v41, 6 }
 0x130   :  { %v4124_v46 = vunpack.i.h.bf16 %v4122_v22  ;;  %v4123_v7 = vunpack.i.l.bf16 %v4122_v22  ;;  %v1000_v22 = vsel %vm899_vm2, %v999_v62, %v998_v17  ;;  %v1003_v52 = vrot.slane %v4848_v3, 4 }
 0x131   :  { %4161 = vrot.lane.b32.xlu2 %v4160_v60, %s4371_s13  ;;  %4156 = vrot.lane.b32.xlu1 %v4160_v60, %s4373_s26  ;;  %v1099_v57 = vrot.slane %v4829_v21, 2  ;;  %v1031_v34 = vrot.slane %v4865_v10, 4  ;;  %v1029_v33 = vrot.slane %v4857_v58, 5  ;;  %v1033_v29 = vrot.slane %v4867_v42, 3 }
 0x132   :  { %v613_v14 = vmax.f32 %v485_v39, %v4123_v7  ;;  %v4890_v28 = vmax.f32 %v486_v56, %v4124_v46  ;;  %4151 = vrot.lane.b32.xlu0 %v4160_v60, %s4370_s22  ;;  %v1001_v46 = vrot.slane %v4836_v51, 5  ;;  %v1028_v7 = vsel %vm899_vm2, %v1027_v54, %v1026_v37 }
 0x133   :  { %v1030_v36 = vsel %vm902_vm3, %v1029_v33, %v1028_v7  ;;  %v1007_v60 = vrot.slane %v4869_v11, 2  ;;  %v1035_v62 = vrot.slane %v4872_v1, 2  ;;  %v1103_v54 = vrot.slane %v4833_v48, 7 }
 0x134   :  { %v677_v9 = vrot.slane %v613_v14, 1  ;;  %v773_v56 = vrot.slane %v613_v14, 2  ;;  %v1002_v4 = vsel %vm902_vm3, %v1001_v46, %v1000_v22  ;;  %v1032_v13 = vsel %vm905_vm4, %v1031_v34, %v1030_v36 }
 0x135   :  { %v1004_v45 = vsel %vm905_vm4, %v1003_v52, %v1002_v4  ;;  %v1034_v17 = vsel %vm908_vm5, %v1033_v29, %v1032_v13  ;;  %v1204_v22 = vrot.slane %v4819_v0, 2  ;;  %v1206_v52 = vrot.slane %v4821_v50, 1 }
 0x136   :  { %v741_v6 = vmax.f32 %v613_v14, %v677_v9  ;;  %v1100_v14 = vrot.slane %v4819_v0, 1  ;;  %v1005_v9 = vrot.slane %v4852_v61, 3  ;;  %v1203_v7 = vrot.slane %v4829_v21, 3 }
 0x137   :  { %v4910_v5 = vpop.permute.xlu0 %4136  ;;  %v1131_v33 = vrot.slane %v4854_v41, 7  ;;  %v1105_v29 = vrot.slane %v4836_v51, 6  ;;  %v1109_v0 = vrot.slane %v4852_v61, 4  ;;  %v1135_v4 = vrot.slane %v4865_v10, 5 }
 0x138   :  { %v4138_v2 = vunpack.i.l.bf16 %v4910_v5  ;;  %v4927_v27 = vmax.f32 %v741_v6, %v773_v56  ;;  %v1101_v38 = vsel %vm893_vm0, %v1100_v14, %v1099_v57  ;;  %v1036_v6 = vsel %vm911_vm6, %v1035_v62, %v1034_v17 }
 0x139   :  { %v1102_v37 = vsel %vm896_vm1, %v4821_v50, %v1101_v38  ;;  %v1127_v56 = vrot.slane %v4850_v23, 2  ;;  %v1128_v57 = vrot.slane %v4824_v55, 1  ;;  %v1107_v14 = vrot.slane %v4848_v3, 5 }
 0x13a   :  { %v612_v39 = vmax.f32 %v484_v43, %v4138_v2  ;;  %v913_v35 = vrot.slane %v4927_v27, 7  ;;  %v1111_v50 = vrot.slane %v4869_v11, 3  ;;  %v1137_v36 = vrot.slane %v4867_v42, 4 }
 0x13b   :  { %v1129_v21 = vsel %vm893_vm0, %v1128_v57, %v1127_v56  ;;  %v1205_v38 = vsel %vm893_vm0, %v1204_v22, %v1203_v7  ;;  %v1232_v62 = vrot.slane %v4824_v55, 2  ;;  %v1209_v22 = vrot.slane %v4836_v51, 7 }
 0x13c   :  { %v676_v12 = vrot.slane %v612_v39, 1  ;;  %v772_v63 = vrot.slane %v612_v39, 2  ;;  %v1207_v17 = vsel %vm896_vm1, %v1206_v52, %v1205_v38  ;;  %v1211_v55 = vrot.slane %v4848_v3, 6 }
 0x13d   :  { %v1208_v52 = vsel %vm899_vm2, %v4833_v48, %v1207_v17  ;;  %v1241_v51 = vrot.slane %v4867_v42, 5  ;;  %v1213_v3 = vrot.slane %v4852_v61, 5  ;;  %v1243_v42 = vrot.slane %v4872_v1, 4 }
 0x13e   :  { %v740_v53 = vmax.f32 %v612_v39, %v676_v12  ;;  %v1006_v39 = vsel %vm908_vm5, %v1005_v9, %v1004_v45  ;;  %v1104_v12 = vsel %vm899_vm2, %v1103_v54, %v1102_v37  ;;  %v1133_v45 = vrot.slane %v4857_v58, 6 }
 0x13f   :  { %v1008_v46 = vsel %vm911_vm6, %v1007_v60, %v1006_v39  ;;  %v1231_v9 = vrot.slane %v4850_v23, 3  ;;  %v1139_v54 = vrot.slane %v4872_v1, 3  ;;  %v1234_v23 = vrot.slane %v4844_v47, 1 }
 0x140   :  { %v4940_v2 = vmax.f32 %v740_v53, %v772_v63  ;;  %v4175_v34 = vpack.i.bf16 %v1036_v6, %v1008_v46  ;;  %v1106_v53 = vsel %vm902_vm3, %v1105_v29, %v1104_v12  ;;  %v1130_v63 = vsel %vm896_vm1, %v4844_v47, %v1129_v21 }
 0x141   :  { %v1108_v60 = vsel %vm905_vm4, %v1107_v14, %v1106_v53  ;;  %v1132_v13 = vsel %vm899_vm2, %v1131_v33, %v1130_v63  ;;  %v1233_v46 = vsel %vm893_vm0, %v1232_v62, %v1231_v9  ;;  %v1237_v47 = vrot.slane %v4857_v58, 7 }
 0x142   :  { %v4946_v43 = vsel %vm893_vm0, %v913_v35, %v4940_v2  ;;  %4176 = vrot.lane.b32.xlu2 %v4175_v34, %s4374_s27  ;;  %4171 = vrot.lane.b32.xlu1 %v4175_v34, %s4375_s28  ;;  %v1134_v35 = vsel %vm902_vm3, %v1133_v45, %v1132_v13  ;;  %v1110_v6 = vsel %vm908_vm5, %v1109_v0, %v1108_v60  ;;  %v1239_v29 = vrot.slane %v4865_v10, 6  ;;  %v4342_v60 = vld [vmem:[%s6467_s0 + $0xf0] sm:$0x3f] }
 0x143   :  { %4166 = vrot.lane.b32.xlu0 %v4175_v34, %s4376_s29  ;;  %v1136_v37 = vsel %vm905_vm4, %v1135_v4, %v1134_v35  ;;  %v1112_v56 = vsel %vm911_vm6, %v1111_v50, %v1110_v6  ;;  %v1235_v12 = vsel %vm896_vm1, %v1234_v23, %v1233_v46  ;;  %v1210_v48 = vsel %vm902_vm3, %v1209_v22, %v1208_v52 }
 0x144   :  { %v1138_v39 = vsel %vm908_vm5, %v1137_v36, %v1136_v37  ;;  %v1236_v33 = vsel %vm899_vm2, %v4854_v41, %v1235_v12  ;;  %v1212_v41 = vsel %vm905_vm4, %v1211_v55, %v1210_v48  ;;  %v1215_v58 = vrot.slane %v4869_v11, 4  ;;  %v4092_v11 = vpop.permute.xlu2 %4091  ;;  %v4341_v36 = vld [vmem:[%s6467_s0 + $0xf8] sm:$0x3f] }
 0x145   :  { %v1140_v57 = vsel %vm911_vm6, %v1139_v54, %v1138_v39  ;;  %v1238_v14 = vsel %vm902_vm3, %v1237_v47, %v1236_v33  ;;  %v1214_v21 = vsel %vm908_vm5, %v1213_v3, %v1212_v41  ;;  %v4009_v1 = vunpack.i.h.bf16 %v4805_v18 }
 0x146   :  { %v4190_v7 = vpack.i.bf16 %v1140_v57, %v1112_v56  ;;  %v1240_v10 = vsel %vm905_vm4, %v1239_v29, %v1238_v14  ;;  %v1216_v61 = vsel %vm911_vm6, %v1215_v58, %v1214_v21  ;;  %v4225_v53 = vpack.i.bf16 %v4803_v15, %v4801_v19 }
 0x147   :  { %v1242_v0 = vsel %vm908_vm5, %v1241_v51, %v1240_v10  ;;  %v4094_v63 = vunpack.i.h.bf16 %v4092_v11  ;;  %v4093_v45 = vunpack.i.l.bf16 %v4092_v11  ;;  %v219_v9 = vmax.f32 %v4341_v36, %v4009_v1 }
 0x148   :  { %v1244_v50 = vsel %vm911_vm6, %v1243_v42, %v1242_v0  ;;  %v4114_v62 = vunpack.i.h.bf16 %v4886_v59  ;;  %v4139_v37 = vunpack.i.h.bf16 %v4910_v5  ;;  %v774_v12 = vrot.slane %v4890_v28, 2 }
 0x149   :  { %v4205_v4 = vpack.i.bf16 %v1244_v50, %v1216_v61  ;;  %v5035_v13 = vmax.f32 %v219_v9, %v4094_v63  ;;  %v1009_v51 = vrot.slane %v4940_v2, 1  ;;  %v1113_v48 = vrot.slane %v4940_v2, 2 }
 0x14a   :  { %4191 = vrot.lane.b32.xlu2 %v4190_v7, %s4377_s30  ;;  %4186 = vrot.lane.b32.xlu1 %v4190_v7, %s4378_s8  ;;  %v487_v23 = vmax.f32 %v4741_v26, %v4114_v62  ;;  %v1217_v3 = vrot.slane %v4940_v2, 3  ;;  %v1114_v10 = vrot.slane %v4927_v27, 1  ;;  %v1218_v42 = vrot.slane %v4927_v27, 2 }
 0x14b   :  { %4181 = vrot.lane.b32.xlu0 %v4175_v34, %s4379_s9  ;;  %v4008_v34 = vunpack.i.l.bf16 %v4805_v18  ;;  %v1010_v2 = vsel %vm893_vm0, %v4927_v27, %v1009_v51 }
 0x14c   :  { %v4117_v17 = vpop.permute.xlu2 %4116  ;;  %v615_v39 = vmax.f32 %v487_v23, %v4139_v37 }
 0x14d   :  { %v218_v18 = vmax.f32 %v4342_v60, %v4008_v34  ;;  %v4119_v6 = vunpack.i.h.bf16 %v4117_v17  ;;  %v1115_v34 = vsel %vm893_vm0, %v1114_v10, %v1113_v48  ;;  %v4118_v23 = vunpack.i.l.bf16 %v4117_v17  ;;  %v3717_v17 = vld [vmem:[%s6468_s1 + $0x74] sm:$0xf] }
 0x14e   :  { %v679_v57 = vrot.slane %v615_v39, 1  ;;  %v775_v5 = vrot.slane %v615_v39, 2  ;;  %v3725_v48 = vld [vmem:[%s6468_s1 + $0xb4] sm:$0xf] }
 0x14f   :  { %v5037_v38 = vmax.f32 %v218_v18, %v4093_v45  ;;  %v488_v56 = vmax.f32 %v4765_v24, %v4119_v6 }
 0x150   :  { %v743_v55 = vmax.f32 %v615_v39, %v679_v57  ;;  %v501_v39 = vmax.f32 %v4767_v25, %v4118_v23  ;;  %v3075_v23 = vld [vmem:[%s6468_s1 + $0xa0] sm:$0xf] }
 0x151   :  { %v4240_v35 = vpack.i.bf16 %v5035_v13, %v5037_v38 }
 0x152   :  { %4206 = vrot.lane.b32.xlu2 %v4205_v4, %s4380_s10  ;;  %4201 = vrot.lane.b32.xlu1 %v4190_v7, %s4381_s11  ;;  %v839_v47 = vmax.f32 %v743_v55, %v775_v5  ;;  %v3009_v5 = vld [vmem:[%s6468_s1 + $0x78] sm:$0xf0] }
 0x153   :  { %4196 = vrot.lane.b32.xlu0 %v4190_v7, %s4382_s12 }
 0x154   :  { %v5054_v7 = vpop.permute.xlu2 %4131  ;;  %v917_v24 = vrot.slane %v839_v47, 5  ;;  %v1117_v50 = vrot.slane %v839_v47, 7 }
 0x15a   :  { %4231 = vrot.lane.b32.xlu2 %v4205_v4, %s4383_s14  ;;  %4221 = vrot.lane.b32.xlu1 %v4205_v4, %s4384_s15 }
 0x15b   :  { %4211 = vrot.lane.b32.xlu0 %v4205_v4, %s6477_s16 }
 0x15c   :  { %v5064_v11 = vpop.permute.xlu2 %4146 }
 0x162   :  { %4236 = vrot.lane.b32.xlu2 %v4781_v20, %s4372_s25  ;;  %4226 = vrot.lane.b32.xlu1 %v4225_v53, %s4371_s13  ;;  %v5039_v20 = vpop.permute.xlu1 %4126 }
 0x163   :  { %4216 = vrot.lane.b32.xlu0 %v4763_v8, %s4372_s25 }
 0x16a   :  { %4251 = vrot.lane.b32.xlu2 %v4225_v53, %s4372_s25  ;;  %4246 = vrot.lane.b32.xlu1 %v4795_v16, %s4372_s25  ;;  %v4142_v8 = vpop.permute.xlu1 %4141  ;;  %v678_v16 = vrot.slane %v4890_v28, 1  ;;  %v1219_v53 = vsel %vm893_vm0, %v1218_v42, %v1217_v3  ;;  %v3085_v3 = vld [vmem:[%s6468_s1 + $0xb8] sm:$0xf0] }
 0x16b   :  { %4241 = vrot.lane.b32.xlu0 %v4240_v35, %s4371_s13  ;;  %v4144_v54 = vunpack.i.h.bf16 %v4142_v8 }
 0x16c   :  { %v742_v59 = vmax.f32 %v4890_v28, %v678_v16  ;;  %v1013_v28 = vrot.slane %v839_v47, 6 }
 0x16d   :  { %v616_v22 = vmax.f32 %v488_v56, %v4144_v54  ;;  %v4143_v56 = vunpack.i.l.bf16 %v4142_v8 }
 0x16e   :  { %v838_v33 = vmax.f32 %v742_v59, %v774_v12  ;;  %v3007_v59 = vld [vmem:[%s6468_s1 + $0x70] sm:$0xf] }
 0x16f   :  { %v680_v52 = vrot.slane %v616_v22, 1  ;;  %v776_v26 = vrot.slane %v616_v22, 2  ;;  %v3083_v12 = vld [vmem:[%s6468_s1 + $0xb0] sm:$0xf] }
 0x170   :  { %v915_v14 = vrot.slane %v838_v33, 6  ;;  %v1011_v41 = vrot.slane %v838_v33, 7  ;;  %v1220_v0 = vrot.slane %v838_v33, 1  ;;  %v1116_v36 = vsel %vm896_vm1, %v838_v33, %v1115_v34 }
 0x171   :  { %v744_v46 = vmax.f32 %v616_v22, %v680_v52  ;;  %v1118_v18 = vsel %vm899_vm2, %v1117_v50, %v1116_v36  ;;  %v629_v22 = vmax.f32 %v501_v39, %v4143_v56  ;;  %v4134_v50 = vunpack.i.h.bf16 %v5054_v7  ;;  %v3724_v56 = vld [vmem:[%s6468_s1 + $0xa4] sm:$0xf0] }
 0x172   :  { %v916_v4 = vsel %vm896_vm1, %v915_v14, %v4946_v43  ;;  %v1012_v45 = vsel %vm896_vm1, %v1011_v41, %v1010_v2  ;;  %v1221_v43 = vsel %vm896_vm1, %v1220_v0, %v1219_v53  ;;  %v3088_v41 = vor.u32 %v3725_v48, %v3085_v3  ;;  %v3067_v48 = vld [vmem:[%s6468_s1 + $0x90] sm:$0xf]  ;;  %v3722_v3 = vld [vmem:[%s6468_s1 + $0x94] sm:$0xf0] }
 0x173   :  { %4256 = vrot.lane.b32.xlu0 %v4240_v35, %s4372_s25  ;;  %v840_v29 = vmax.f32 %v744_v46, %v776_v26  ;;  %v918_v1 = vsel %vm899_vm2, %v917_v24, %v916_v4  ;;  %v1014_v60 = vsel %vm899_vm2, %v1013_v28, %v1012_v45  ;;  %v1222_v62 = vsel %vm899_vm2, %v839_v47, %v1221_v43  ;;  %v3718_v46 = vld [vmem:[%s6468_s1 + $0x74] sm:$0xf0]  ;;  %v2999_v43 = vld [vmem:[%s6468_s1 + $0x60] sm:$0xf] }
 0x174   :  { %v693_v16 = vrot.slane %v629_v22, 1  ;;  %v3008_v25 = vor.u32 %v3718_v46, %v3007_v59  ;;  %v3726_v26 = vld [vmem:[%s6468_s1 + $0xb4] sm:$0xf0]  ;;  %v3012_v24 = vor.u32 %v3717_v17, %v3009_v5  ;;  %v789_v14 = vrot.slane %v629_v22, 2  ;;  %1623 = vmatpush.bf16.msra.mxu1 %v3088_v41  ;;  %v3077_v59 = vld [vmem:[%s6468_s1 + $0xa8] sm:$0xf0] }
 0x175   :  { %v919_v58 = vrot.slane %v840_v29, 4  ;;  %v1015_v21 = vrot.slane %v840_v29, 5  ;;  %v1119_v61 = vrot.slane %v840_v29, 6  ;;  %v1223_v9 = vrot.slane %v840_v29, 7  ;;  %v2991_v46 = vld [vmem:[%s6468_s1 + $0x50] sm:$0xf] }
 0x176   :  { %v757_v8 = vmax.f32 %v629_v22, %v693_v16  ;;  %v3084_v51 = vor.u32 %v3726_v26, %v3083_v12  ;;  %1456 = vmatpush.bf16.msra.mxu3 %v3008_v25  ;;  %1469 = vmatpush.bf16.msra.mxu2 %v3012_v24  ;;  %v4133_v45 = vunpack.i.l.bf16 %v5054_v7  ;;  %v3001_v7 = vld [vmem:[%s6468_s1 + $0x68] sm:$0xf0]  ;;  %v503_v17 = vmax.f32 %v4777_v31, %v4134_v50  ;;  %v3714_v12 = vld [vmem:[%s6468_s1 + $0x54] sm:$0xf0]  ;;  %v3713_v26 = vld [vmem:[%s6468_s1 + $0x54] sm:$0xf] }
 0x177   :  { %v5072_v63 = vsel %vm902_vm3, %v919_v58, %v918_v1  ;;  %v5080_v27 = vsel %vm902_vm3, %v1015_v21, %v1014_v60  ;;  %v5083_v35 = vsel %vm902_vm3, %v1119_v61, %v1118_v18  ;;  %v5087_v6 = vsel %vm902_vm3, %v1223_v9, %v1222_v62  ;;  %v3716_v9 = vld [vmem:[%s6468_s1 + $0x64] sm:$0xf0]  ;;  %v3715_v60 = vld [vmem:[%s6468_s1 + $0x64] sm:$0xf] }
 0x178   :  { %1610 = vmatpush.bf16.msra.mxu0 %v3084_v51  ;;  %v5120_v58 = vmax.f32 %v757_v8, %v789_v14  ;;  %v3004_v16 = vor.u32 %v3715_v60, %v3001_v7  ;;  %v500_v31 = vmax.f32 %v4775_v30, %v4133_v45  ;;  %v4148_v24 = vunpack.i.l.bf16 %v5064_v11  ;;  %v3721_v14 = vld [vmem:[%s6468_s1 + $0x94] sm:$0xf] }
 0x179   :  { %v2992_v51 = vor.u32 %v3714_v12, %v2991_v46  ;;  %v4129_v7 = vunpack.i.h.bf16 %v5039_v20 }
 0x17a   :  { %v941_v21 = vrot.slane %v5120_v58, 7  ;;  %1470 = vmatpush.bf16.msra.mxu2 %v3004_v16  ;;  %v1142_v30 = vrot.slane %v5120_v58, 1  ;;  %v3712_v16 = vld [vmem:[%s6468_s1 + $0x44] sm:$0xf0] }
 0x18b   :  { %v4162_v37 = vpop.permute.xlu2 %4161 }
 0x18c   :  { %v4164_v2 = vunpack.i.h.bf16 %v4162_v37  ;;  %v4163_v34 = vunpack.i.l.bf16 %v4162_v37  ;;  %v3000_v37 = vor.u32 %v3716_v9, %v2999_v43 }
 0x18e   :  { %1457 = vmatpush.bf16.msra.mxu3 %v3000_v37 }
 0x192   :  { %1458 = vmatpush.bf16.msra.mxu3 %v2992_v51  ;;  %v3719_v51 = vld [vmem:[%s6468_s1 + $0x84] sm:$0xf] }
 0x19c   :  { %v5089_v54 = vpop.permute.xlu2 %4176 }
 0x1a3   :  { %v4157_v52 = vpop.permute.xlu1 %4156 }
 0x1a4   :  { %v5092_v57 = vpop.permute.xlu2 %4191  ;;  %v4152_v55 = vpop.permute.xlu0 %4151  ;;  %v4159_v10 = vunpack.i.h.bf16 %v4157_v52  ;;  %v4158_v42 = vunpack.i.l.bf16 %v4157_v52  ;;  %v3076_v52 = vor.u32 %v3724_v56, %v3075_v23  ;;  %v4128_v23 = vunpack.i.l.bf16 %v5039_v20 }
 0x1a5   :  { %v4154_v33 = vunpack.i.h.bf16 %v4152_v55  ;;  %v4153_v29 = vunpack.i.l.bf16 %v4152_v55  ;;  %v3723_v55 = vld [vmem:[%s6468_s1 + $0xa4] sm:$0xf] }
 0x1a6   :  { %v3080_v5 = vor.u32 %v3723_v55, %v3077_v59  ;;  %1611 = vmatpush.bf16.msra.mxu0 %v3076_v52  ;;  %v3711_v52 = vld [vmem:[%s6468_s1 + $0x44] sm:$0xf] }
 0x1a7   :  { %v1310_v0 = vsel %vm1307_vm7, %v4896_v32, %v4154_v33  ;;  %v1308_v28 = vsel %vm1307_vm7, %v4900_v40, %v4153_v29  ;;  %v2993_v33 = vld [vmem:[%s6468_s1 + $0x58] sm:$0xf0]  ;;  %v4149_v29 = vunpack.i.h.bf16 %v5064_v11  ;;  %v3739_v11 = vld [vmem:[%s6468_s1 + $0x124] sm:$0xf] }
 0x1a8   :  { %v1315_v61 = vsel %vm1312_vm8, %v1310_v0, %v4159_v10  ;;  %v1313_v4 = vsel %vm1312_vm8, %v1308_v28, %v4158_v42  ;;  %1624 = vmatpush.bf16.msra.mxu1 %v3080_v5  ;;  %v2996_v10 = vor.u32 %v3713_v26, %v2993_v33  ;;  %v3068_v42 = vor.u32 %v3722_v3, %v3067_v48  ;;  %v3069_v0 = vld [vmem:[%s6468_s1 + $0x98] sm:$0xf0]  ;;  %v3059_v33 = vld [vmem:[%s6468_s1 + $0x80] sm:$0xf] }
 0x1a9   :  { %v1318_v18 = vsel %vm1317_vm9, %v1313_v4, %v4163_v34  ;;  %v1320_v62 = vsel %vm1317_vm9, %v1315_v61, %v4164_v2  ;;  %v3072_v61 = vor.u32 %v3721_v14, %v3069_v0  ;;  %v4179_v4 = vunpack.i.h.bf16 %v5089_v54  ;;  %v3710_v0 = vld [vmem:[%s6468_s1 + $0x34] sm:$0xf0] }
 0x1aa   :  { %1471 = vmatpush.bf16.msra.mxu2 %v2996_v10  ;;  %1612 = vmatpush.bf16.msra.mxu0 %v3068_v42  ;;  %v4193_v5 = vunpack.i.l.bf16 %v5092_v57  ;;  %v3061_v10 = vld [vmem:[%s6468_s1 + $0x88] sm:$0xf0]  ;;  %v3041_v42 = vld [vmem:[%s6468_s1 + $0x30] sm:$0xf] }
 0x1ac   :  { %v5112_v47 = vpop.permute.xlu2 %4206  ;;  %1625 = vmatpush.bf16.msra.mxu1 %v3072_v61  ;;  %v3064_v61 = vor.u32 %v3719_v51, %v3061_v10  ;;  %v6488_v51 = vld [vmem:[#allocation6_spill] sm:$0xff]  ;;  %v3706_v10 = vld [vmem:[%s6468_s1 + $0x14] sm:$0xf0] }
 0x1b0   :  { %1626 = vmatpush.bf16.msra.mxu1 %v3064_v61 }
 0x1b4   :  { %v4172_v1 = vpop.permute.xlu1 %4171  ;;  %v5130_v53 = vpop.permute.xlu2 %4231 }
 0x1b5   :  { %v4167_v32 = vpop.permute.xlu0 %4166  ;;  %v4174_v39 = vunpack.i.h.bf16 %v4172_v1  ;;  %v4173_v22 = vunpack.i.l.bf16 %v4172_v1  ;;  %v4178_v1 = vunpack.i.l.bf16 %v5089_v54 }
 0x1b6   :  { %v4169_v40 = vunpack.i.h.bf16 %v4167_v32  ;;  %v4168_v36 = vunpack.i.l.bf16 %v4167_v32 }
 0x1b8   :  { %v1323_v8 = vsel %vm6478_vm10, %v1318_v18, %v4168_v36  ;;  %v1325_v25 = vsel %vm6478_vm10, %v1320_v62, %v4169_v40  ;;  %vm1352_vm10 = vcmask 326656  }
 0x1b9   :  { %v1328_v28 = vsel %vm6482_vm11, %v1323_v8, %v4173_v22  ;;  %v1330_v50 = vsel %vm6482_vm11, %v1325_v25, %v4174_v39  ;;  %v2983_v22 = vld [vmem:[%s6468_s1 + $0x40] sm:$0xf]  ;;  %v2985_v8 = vld [vmem:[%s6468_s1 + $0x48] sm:$0xf0]  ;;  %v4194_v25 = vunpack.i.h.bf16 %v5092_v57  ;;  %vm6484_vm11 = vcmask 457728  }
 0x1ba   :  { %v1333_v9 = vsel %vm6481_vm12, %v1328_v28, %v4178_v1  ;;  %v1335_v60 = vsel %vm6481_vm12, %v1330_v50, %v4179_v4  ;;  %v2984_v12 = vor.u32 %v3712_v16, %v2983_v22  ;;  %v2988_v26 = vor.u32 %v3711_v52, %v2985_v8  ;;  %v3169_v22 = vld [vmem:[%s6468_s1 + $0x138] sm:$0xf0] }
 0x1bb   :  { %v3042_v4 = vor.u32 %v3710_v0, %v3041_v42  ;;  %vm1367_vm12 = vcmask 424960   ;;  %v4208_v42 = vunpack.i.l.bf16 %v5112_v47 }
 0x1bc   :  { %v4237_v2 = vpop.permute.xlu2 %4236  ;;  %v4187_v34 = vpop.permute.xlu1 %4186  ;;  %1459 = vmatpush.bf16.msra.mxu3 %v2984_v12  ;;  %1472 = vmatpush.bf16.msra.mxu2 %v2988_v26  ;;  %v3708_v12 = vld [vmem:[%s6468_s1 + $0x24] sm:$0xf0]  ;;  %v3707_v26 = vld [vmem:[%s6468_s1 + $0x24] sm:$0xf] }
 0x1bd   :  { %v4239_v32 = vunpack.i.h.bf16 %v4237_v2  ;;  %v4238_v45 = vunpack.i.l.bf16 %v4237_v2  ;;  %v4182_v40 = vpop.permute.xlu0 %4181  ;;  %v4189_v62 = vunpack.i.h.bf16 %v4187_v34  ;;  %v4188_v37 = vunpack.i.l.bf16 %v4187_v34 }
 0x1be   :  { %v4184_v36 = vunpack.i.h.bf16 %v4182_v40  ;;  %v4183_v43 = vunpack.i.l.bf16 %v4182_v40 }
 0x1bf   :  { %v631_v54 = vmax.f32 %v503_v17, %v4239_v32  ;;  %v628_v18 = vmax.f32 %v500_v31, %v4238_v45  ;;  %v3720_v31 = vld [vmem:[%s6468_s1 + $0x84] sm:$0xf0]  ;;  %v3709_v32 = vld [vmem:[%s6468_s1 + $0x34] sm:$0xf] }
 0x1c0   :  { %v1338_v56 = vsel %vm6479_vm13, %v1333_v9, %v4183_v43  ;;  %v1340_v39 = vsel %vm6479_vm13, %v1335_v60, %v4184_v36  ;;  %vm1357_vm13 = vcmask 359424   ;;  %v3060_v50 = vor.u32 %v3720_v31, %v3059_v33  ;;  %v3043_v9 = vld [vmem:[%s6468_s1 + $0x38] sm:$0xf0]  ;;  %v3167_v60 = vld [vmem:[%s6468_s1 + $0x130] sm:$0xf]  ;;  %1528 = vmatpush.bf16.msrb.mxu2 %v3042_v4 }
 0x1c1   :  { %v695_v55 = vrot.slane %v631_v54, 1  ;;  %v791_v59 = vrot.slane %v631_v54, 2  ;;  %v692_v46 = vrot.slane %v628_v18, 1  ;;  %v788_v17 = vrot.slane %v628_v18, 2  ;;  %v3035_v33 = vld [vmem:[%s6468_s1 + $0x28] sm:$0xf0] }
 0x1c2   :  { %v1343_v14 = vsel %vm6480_vm14, %v1338_v56, %v4188_v37  ;;  %v1345_v57 = vsel %vm6480_vm14, %v1340_v39, %v4189_v62  ;;  %vm1362_vm14 = vcmask 392192   ;;  %1613 = vmatpush.bf16.msra.mxu0 %v3060_v50  ;;  %v3741_v39 = vld [vmem:[%s6468_s1 + $0x134] sm:$0xf] }
 0x1c3   :  { %v759_v48 = vmax.f32 %v631_v54, %v695_v55  ;;  %v756_v3 = vmax.f32 %v628_v18, %v692_v46  ;;  %v1348_v36 = vsel %vm6483_vm15, %v1343_v14, %v4193_v5  ;;  %v1350_v43 = vsel %vm6483_vm15, %v1345_v57, %v4194_v25  ;;  %v3742_v54 = vld [vmem:[%s6468_s1 + $0x134] sm:$0xf0]  ;;  %v3033_v46 = vld [vmem:[%s6468_s1 + $0x20] sm:$0xf]  ;;  %v3025_v57 = vld [vmem:[%s6468_s1 + $0x10] sm:$0xf] }
 0x1c4   :  { %v4202_v28 = vpop.permute.xlu1 %4201  ;;  %vm1377_vm15 = vcmask 490496   ;;  %v3046_v25 = vor.u32 %v3709_v32, %v3043_v9  ;;  %v3168_v5 = vor.u32 %v3742_v54, %v3167_v60  ;;  %v3159_v14 = vld [vmem:[%s6468_s1 + $0x120] sm:$0xf]  ;;  %v3034_v20 = vor.u32 %v3708_v12, %v3033_v46  ;;  %v3705_v4 = vld [vmem:[%s6468_s1 + $0x14] sm:$0xf] }
 0x1c5   :  { %v5235_v1 = vmax.f32 %v759_v48, %v791_v59  ;;  %v5237_v2 = vmax.f32 %v756_v3, %v788_v17  ;;  %v4197_v34 = vpop.permute.xlu0 %4196  ;;  %v4204_v37 = vunpack.i.h.bf16 %v4202_v28  ;;  %v4203_v56 = vunpack.i.l.bf16 %v4202_v28  ;;  %v3151_v32 = vld [vmem:[%s6468_s1 + $0x110] sm:$0xf]  ;;  %v3738_v54 = vld [vmem:[%s6468_s1 + $0x114] sm:$0xf0]  ;;  %v3017_v46 = vld [vmem:[%s6468_s1] sm:$0xf] }
 0x1c6   :  { %v4199_v45 = vunpack.i.h.bf16 %v4197_v34  ;;  %v4198_v40 = vunpack.i.l.bf16 %v4197_v34  ;;  %v5271_v17 = vmax.f32 %v4789_v44, %v4149_v29  ;;  %v5286_v44 = vmax.f32 %v4791_v49, %v4148_v24  ;;  %v6487_v29 = vld [vmem:[#allocation5_spill] sm:$0xff]  ;;  %1541 = vmatpush.bf16.msrb.mxu3 %v3046_v25  ;;  %1778 = vmatpush.bf16.msrb.mxu0 %v3168_v5  ;;  %v3027_v34 = vld [vmem:[%s6468_s1 + $0x18] sm:$0xf0] }
 0x1c7   :  { %v1141_v55 = vrot.slane %v5237_v2, 2  ;;  %v5291_v31 = vmax.f32 %v6487_v29, %v4129_v7  ;;  %v5296_v48 = vmax.f32 %v6488_v51, %v4128_v23  ;;  %v3172_v3 = vor.u32 %v3741_v39, %v3169_v22  ;;  %v3740_v49 = vld [vmem:[%s6468_s1 + $0x124] sm:$0xf0]  ;;  %v3161_v23 = vld [vmem:[%s6468_s1 + $0x128] sm:$0xf0]  ;;  %1529 = vmatpush.bf16.msrb.mxu2 %v3034_v20 }
 0x1c8   :  { %v1353_v59 = vsel %vm1352_vm10, %v1348_v36, %v4198_v40  ;;  %v1355_v8 = vsel %vm1352_vm10, %v1350_v43, %v4199_v45  ;;  %v3038_v7 = vor.u32 %v3707_v26, %v3035_v33  ;;  %v3160_v50 = vor.u32 %v3740_v49, %v3159_v14  ;;  %v5329_v40 = vpop.permute.xlu2 %4251  ;;  %v5351_v25 = vld [vmem:[%s6468_s1 + $0x4] sm:$0xf]  ;;  %v3019_v29 = vld [vmem:[%s6468_s1 + $0x8] sm:$0xf0]  ;;  %v3143_v51 = vld [vmem:[%s6468_s1 + $0x100] sm:$0xf] }
 0x1c9   :  { %v1358_v24 = vsel %vm1357_vm13, %v1353_v59, %v4203_v56  ;;  %v1360_v0 = vsel %vm1357_vm13, %v1355_v8, %v4204_v37  ;;  %1791 = vmatpush.bf16.msrb.mxu1 %v3172_v3  ;;  %v3164_v61 = vor.u32 %v3739_v11, %v3161_v23  ;;  %v4209_v45 = vunpack.i.h.bf16 %v5112_v47  ;;  %v3737_v37 = vld [vmem:[%s6468_s1 + $0x114] sm:$0xf]  ;;  %v3153_v56 = vld [vmem:[%s6468_s1 + $0x118] sm:$0xf0]  ;;  %v3704_v8 = vld [vmem:[%s6468_s1 + $0x4] sm:$0xf0] }
 0x1ca   :  { %v3026_v60 = vor.u32 %v3706_v10, %v3025_v57  ;;  %v4234_v47 = vunpack.i.h.bf16 %v5130_v53  ;;  %v1363_v59 = vsel %vm1362_vm14, %v1358_v24, %v4208_v42  ;;  %v4233_v5 = vunpack.i.l.bf16 %v5130_v53  ;;  %1542 = vmatpush.bf16.msrb.mxu3 %v3038_v7  ;;  %1779 = vmatpush.bf16.msrb.mxu0 %v3160_v50  ;;  %v3736_v3 = vld [vmem:[%s6468_s1 + $0x104] sm:$0xf0]  ;;  %v3735_v24 = vld [vmem:[%s6468_s1 + $0x104] sm:$0xf]  ;;  %v3145_v20 = vld [vmem:[%s6468_s1 + $0x108] sm:$0xf0] }
 0x1cb   :  { %v1365_v12 = vsel %vm1362_vm14, %v1360_v0, %v4209_v45  ;;  %v3030_v26 = vor.u32 %v3705_v4, %v3027_v34  ;;  %v3152_v33 = vor.u32 %v3738_v54, %v3151_v32  ;;  %v4254_v53 = vunpack.i.h.bf16 %v5329_v40  ;;  %v5376_v7 = vld [vmem:[%s6468_s1 + $0xf0] sm:$0xf]  ;;  %v5389_v0 = vld [vmem:[%s6468_s1 + $0xf4] sm:$0xf0]  ;;  %v5419_v54 = vld [vmem:[%s6468_s1 + $0x1b4] sm:$0xf] }
 0x1cc   :  { %v4222_v28 = vpop.permute.xlu1 %4221  ;;  %v3156_v11 = vor.u32 %v3737_v37, %v3153_v56  ;;  %v5382_v23 = vsel %vm893_vm0, %v941_v21, %v5237_v2  ;;  %1530 = vmatpush.bf16.msrb.mxu2 %v3026_v60  ;;  %v3018_v42 = vor.u32 %v3704_v8, %v3017_v46  ;;  %v5399_v21 = vld [vmem:[%s6468_s1 + $0xf8] sm:$0xf0]  ;;  %v3022_v34 = vor.u32 %v5351_v25, %v3019_v29  ;;  %v5408_v32 = vld [vmem:[%s6468_s1 + $0x1b0] sm:$0xf]  ;;  %v5414_v60 = vld [vmem:[%s6468_s1 + $0x1b4] sm:$0xf0] }
 0x1cd   :  { %v4224_v36 = vunpack.i.h.bf16 %v4222_v28  ;;  %v4223_v43 = vunpack.i.l.bf16 %v4222_v28  ;;  %v4212_v9 = vpop.permute.xlu0 %4211  ;;  %1792 = vmatpush.bf16.msrb.mxu1 %v3164_v61  ;;  %v5394_v28 = vld [vmem:[%s6468_s1 + $0xf4] sm:$0xf]  ;;  %v4253_v45 = vunpack.i.l.bf16 %v5329_v40  ;;  %v5424_v37 = vld [vmem:[%s6468_s1 + $0x1b8] sm:$0xf0]  ;;  %v5440_v46 = vld [vmem:[%s6468_s1 + $0xe0] sm:$0xf]  ;;  %v3252_v29 = vor.u32 %v5414_v60, %v5408_v32 }
 0x1ce   :  { %v4214_v39 = vunpack.i.h.bf16 %v4212_v9  ;;  %v4213_v22 = vunpack.i.l.bf16 %v4212_v9  ;;  %1543 = vmatpush.bf16.msrb.mxu3 %v3030_v26  ;;  %1780 = vmatpush.bf16.msrb.mxu0 %v3152_v33  ;;  %v3144_v9 = vor.u32 %v3736_v3, %v3143_v51  ;;  %v5445_v8 = vld [vmem:[%s6468_s1 + $0xe4] sm:$0xf0]  ;;  %v3256_v51 = vor.u32 %v5419_v54, %v5424_v37  ;;  %v5458_v3 = vld [vmem:[%s6468_s1 + $0xe4] sm:$0xf]  ;;  %v3235_v32 = vld [vmem:[%s6468_s1 + $0x190] sm:$0xf] }
 0x1cf   :  { %v3754_v60 = vld [vmem:[%s6468_s1 + $0x194] sm:$0xf0] }
 0x1d0   :  { %v1368_v14 = vsel %vm1367_vm12, %v1363_v59, %v4213_v22  ;;  %v1370_v49 = vsel %vm1367_vm12, %v1365_v12, %v4214_v39  ;;  %v3148_v39 = vor.u32 %v3735_v24, %v3145_v20  ;;  %v3126_v22 = vor.u32 %v5389_v0, %v5376_v7  ;;  %1531 = vmatpush.bf16.msrb.mxu2 %v3018_v42 }
 0x1d1   :  { %v1373_v57 = vsel %vm6484_vm11, %v1368_v14, %v4223_v43  ;;  %v1375_v10 = vsel %vm6484_vm11, %v1370_v49, %v4224_v36  ;;  %vm1448_vm11 = vcmask 523264   ;;  %1793 = vmatpush.bf16.msrb.mxu1 %v3156_v11  ;;  %v3130_v59 = vor.u32 %v5394_v28, %v5399_v21  ;;  %v5463_v14 = vld [vmem:[%s6468_s1 + $0xe8] sm:$0xf0]  ;;  %v3729_v28 = vld [vmem:[%s6468_s1 + $0xd4] sm:$0xf] }
 0x1d2   :  { %v1378_v61 = vsel %vm1377_vm15, %v1373_v57, %v4233_v5  ;;  %v1380_v4 = vsel %vm1377_vm15, %v1375_v10, %v4234_v47  ;;  %v5431_v47 = vsel %vm893_vm0, %v1142_v30, %v1141_v55  ;;  %1544 = vmatpush.bf16.msrb.mxu3 %v3022_v34  ;;  %1781 = vmatpush.bf16.msrb.mxu0 %v3144_v9  ;;  %v5473_v57 = vld [vmem:[%s6468_s1 + $0x1a0] sm:$0xf]  ;;  %v5478_v10 = vld [vmem:[%s6468_s1 + $0x1a4] sm:$0xf0]  ;;  %v3111_v21 = vld [vmem:[%s6468_s1 + $0xd8] sm:$0xf0] }
 0x1d3   :  { %v1382_v36 = vpack.c.bf16 %v1378_v61, %v1378_v61  ;;  %v1383_v43 = vpack.c.bf16 %v1380_v4, %v1380_v4  ;;  %v3118_v20 = vor.u32 %v5445_v8, %v5440_v46 }
 0x1d4   :  { %v4227_v56 = vpop.permute.xlu1 %4226 }
 0x1d5   :  { %v5447_v30 = vunpack.c.l.b16 %v1382_v36  ;;  %v5449_v55 = vunpack.c.l.b16 %v1383_v43  ;;  %v4229_v25 = vunpack.i.h.bf16 %v4227_v56  ;;  %v4228_v5 = vunpack.i.l.bf16 %v4227_v56  ;;  %v4217_v12 = vpop.permute.xlu0 %4216  ;;  %1794 = vmatpush.bf16.msrb.mxu1 %v3148_v39 }
 0x1d6   :  { %v4219_v26 = vunpack.i.h.bf16 %v4217_v12  ;;  %v4218_v33 = vunpack.i.l.bf16 %v4217_v12  ;;  %v3122_v43 = vor.u32 %v5458_v3, %v5463_v14  ;;  %v3101_v3 = vld [vmem:[%s6468_s1 + $0xc0] sm:$0xf]  ;;  %v3728_v14 = vld [vmem:[%s6468_s1 + $0xc4] sm:$0xf0] }
 0x1d7   :  { %v505_v49 = vmax.f32 %v4803_v15, %v4229_v25  ;;  %v491_v11 = vmax.f32 %v4801_v19, %v4228_v5  ;;  %v1405_v24 = vrot.slane %v5447_v30, 1  ;;  %v1559_v42 = vrot.slane %v5447_v30, 2 }
 0x1d8   :  { %v617_v15 = vmax.f32 %v5291_v31, %v4219_v26  ;;  %v630_v19 = vmax.f32 %v5296_v48, %v4218_v33  ;;  %v1560_v61 = vrot.slane %v5449_v55, 1  ;;  %v3244_v48 = vor.u32 %v5478_v10, %v5473_v57 }
 0x1d9   :  { %v633_v4 = vmax.f32 %v505_v49, %v4254_v53  ;;  %v619_v34 = vmax.f32 %v491_v11, %v4253_v45  ;;  %v1406_v36 = vsel %vm893_vm0, %v5449_v55, %v1405_v24 }
 0x1da   :  { %v681_v9 = vrot.slane %v617_v15, 1  ;;  %v777_v56 = vrot.slane %v617_v15, 2  ;;  %v694_v31 = vrot.slane %v630_v19, 1  ;;  %v790_v39 = vrot.slane %v630_v19, 2 }
 0x1db   :  { %v697_v25 = vrot.slane %v633_v4, 1  ;;  %v793_v5 = vrot.slane %v633_v4, 2  ;;  %v683_v12 = vrot.slane %v619_v34, 1  ;;  %v1407_v53 = vpack.c.b16 %v1406_v36, %v1406_v36 }
 0x1dc   :  { %v745_v26 = vmax.f32 %v617_v15, %v681_v9  ;;  %v758_v40 = vmax.f32 %v630_v19, %v694_v31  ;;  %v1561_v45 = vsel %vm893_vm0, %v1560_v61, %v1559_v42  ;;  %v4247_v33 = vpop.permute.xlu1 %4246  ;;  %v779_v16 = vrot.slane %v619_v34, 2 }
 0x1dd   :  { %v761_v49 = vmax.f32 %v633_v4, %v697_v25  ;;  %v747_v11 = vmax.f32 %v619_v34, %v683_v12  ;;  %v1562_v24 = vpack.c.b16 %v1561_v45, %v1561_v45  ;;  %v4249_v41 = vunpack.i.h.bf16 %v4247_v33  ;;  %v4242_v50 = vpop.permute.xlu0 %4241  ;;  %3013 = vmatmul.msk.bf16.vlgmr.msra.gmra.mxu3 %vm1448_vm11, %v1407_v53  ;;  %3014 = vmatmul.msk.bf16.vlgmr.msra.gmra.mxu2 %vm1448_vm11, %v1407_v53  ;;  %v3755_v4 = vld [vmem:[%s6468_s1 + $0x1a4] sm:$0xf]  ;;  %v3245_v34 = vld [vmem:[%s6468_s1 + $0x1a8] sm:$0xf0] }
 0x1de   :  { %v5493_v62 = vmax.f32 %v758_v40, %v790_v39  ;;  %v4248_v52 = vunpack.i.l.bf16 %v4247_v33  ;;  %v4244_v18 = vunpack.i.h.bf16 %v4242_v50  ;;  %v4243_v19 = vunpack.i.l.bf16 %v4242_v50  ;;  %1694 = vmatpush.bf16.msra.mxu2 %v3126_v22  ;;  %1707 = vmatpush.bf16.msra.mxu3 %v3130_v59 }
 0x1df   :  { %3089 = vmatmul.msk.bf16.vlgmr.msra.gmra.mxu0 %vm1448_vm11, %v1562_v24  ;;  %3090 = vmatmul.msk.bf16.vlgmr.msra.gmra.mxu1 %vm1448_vm11, %v1562_v24  ;;  %v632_v15 = vmax.f32 %v5271_v17, %v4249_v41  ;;  %v1478_v42 = vrot.slane %v5449_v55, 7  ;;  %v1727_v61 = vrot.slane %v5447_v30, 4  ;;  %v5508_v36 = vmax.f32 %v761_v49, %v793_v5  ;;  %v3109_v17 = vld [vmem:[%s6468_s1 + $0xd0] sm:$0xf]  ;;  %v3103_v49 = vld [vmem:[%s6468_s1 + $0xc8] sm:$0xf0] }
 0x1e0   :  { %v5510_v9 = vmax.f32 %v747_v11, %v779_v16  ;;  %v5512_v31 = vmax.f32 %v745_v26, %v777_v56  ;;  %v943_v41 = vrot.slane %v5493_v62, 6  ;;  %v3730_v16 = vld [vmem:[%s6468_s1 + $0xd4] sm:$0xf0]  ;;  %v1039_v50 = vrot.slane %v5493_v62, 7  ;;  %1946 = vmatpush.bf16.msra.mxu0 %v3252_v29  ;;  %1959 = vmatpush.bf16.msra.mxu1 %v3256_v51 }
 0x1e1   :  { %v5531_v56 = vsel %vm896_vm1, %v5493_v62, %v5431_v47  ;;  %v696_v7 = vrot.slane %v632_v15, 1  ;;  %v618_v0 = vmax.f32 %v5286_v44, %v4248_v52  ;;  %v792_v47 = vrot.slane %v632_v15, 2 }
 0x1e2   :  { %v507_v22 = vmax.f32 %v5035_v13, %v4244_v18  ;;  %v1728_v52 = vrot.slane %v5449_v55, 3  ;;  %v3248_v44 = vor.u32 %v3755_v4, %v3245_v34  ;;  %v506_v59 = vmax.f32 %v5037_v38, %v4243_v19  ;;  %v3753_v13 = vld [vmem:[%s6468_s1 + $0x194] sm:$0xf]  ;;  %v3237_v18 = vld [vmem:[%s6468_s1 + $0x198] sm:$0xf0]  ;;  %1695 = vmatpush.bf16.msra.mxu2 %v3118_v20  ;;  %1708 = vmatpush.bf16.msra.mxu3 %v3122_v43 }
 0x1e3   :  { %v760_v54 = vmax.f32 %v632_v15, %v696_v7  ;;  %v682_v37 = vrot.slane %v618_v0, 1  ;;  %v1479_v29 = vsel %vm893_vm0, %v1478_v42, %v5447_v30  ;;  %v1248_v51 = vrot.slane %v5493_v62, 1  ;;  %v3227_v42 = vld [vmem:[%s6468_s1 + $0x180] sm:$0xf]  ;;  %v3751_v7 = vld [vmem:[%s6468_s1 + $0x184] sm:$0xf] }
 0x1e4   :  { %v1729_v25 = vsel %vm893_vm0, %v1728_v52, %v1727_v61  ;;  %v3110_v38 = vor.u32 %v3730_v16, %v3109_v17  ;;  %v3114_v5 = vor.u32 %v3729_v28, %v3111_v21  ;;  %v778_v26 = vrot.slane %v618_v0, 2  ;;  %1947 = vmatpush.bf16.msra.mxu0 %v3244_v48  ;;  %1960 = vmatpush.bf16.msra.mxu1 %v3248_v44  ;;  %v3727_v48 = vld [vmem:[%s6468_s1 + $0xc4] sm:$0xf]  ;;  %v3752_v61 = vld [vmem:[%s6468_s1 + $0x184] sm:$0xf0] }
 0x1e5   :  { %v5571_v12 = vmax.f32 %v760_v54, %v792_v47  ;;  %v746_v39 = vmax.f32 %v618_v0, %v682_v37  ;;  %v4257_v40 = vpop.permute.xlu0 %4256  ;;  %v921_v53 = vrot.slane %v5512_v31, 3  ;;  %v3236_v20 = vor.u32 %v3754_v60, %v3235_v32  ;;  %v3229_v0 = vld [vmem:[%s6468_s1 + $0x188] sm:$0xf0] }
 0x1e6   :  { %v4259_v46 = vunpack.i.h.bf16 %v4257_v40  ;;  %v4258_v8 = vunpack.i.l.bf16 %v4257_v40  ;;  %v3240_v45 = vor.u32 %v3753_v13, %v3237_v18  ;;  %v1480_v33 = vpack.c.b16 %v1479_v29, %v1479_v29  ;;  %1696 = vmatpush.bf16.msra.mxu2 %v3110_v38  ;;  %1709 = vmatpush.bf16.msra.mxu3 %v3114_v5  ;;  %v3750_v29 = vld [vmem:[%s6468_s1 + $0x174] sm:$0xf0]  ;;  %v3749_v13 = vld [vmem:[%s6468_s1 + $0x174] sm:$0xf]  ;;  %v3211_v18 = vld [vmem:[%s6468_s1 + $0x178] sm:$0xf0] }
 0x1e7   :  { %v947_v43 = vrot.slane %v5571_v12, 4  ;;  %v1730_v57 = vpack.c.b16 %v1729_v25, %v1729_v25  ;;  %v925_v10 = vrot.slane %v5510_v9, 1  ;;  %v1043_v11 = vrot.slane %v5571_v12, 5 }
 0x1e8   :  { %v5592_v24 = vmax.f32 %v746_v39, %v778_v26  ;;  %v634_v15 = vmax.f32 %v506_v59, %v4258_v8  ;;  %v635_v19 = vmax.f32 %v507_v22, %v4259_v46  ;;  %v1147_v4 = vrot.slane %v5571_v12, 6  ;;  %1948 = vmatpush.bf16.msra.mxu0 %v3236_v20  ;;  %1961 = vmatpush.bf16.msra.mxu1 %v3240_v45 }
 0x1e9   :  { %v922_v34 = vsel %vm905_vm4, %v921_v53, %v5072_v63  ;;  %v944_v17 = vsel %vm896_vm1, %v943_v41, %v5382_v23  ;;  %v3102_v16 = vor.u32 %v3728_v14, %v3101_v3  ;;  %v1643_v22 = vrot.slane %v5447_v30, 3  ;;  %v3209_v23 = vld [vmem:[%s6468_s1 + $0x170] sm:$0xf] }
 0x1ea   :  { %v698_v28 = vrot.slane %v634_v15, 1  ;;  %v699_v21 = vrot.slane %v635_v19, 1  ;;  %v794_v47 = vrot.slane %v634_v15, 2  ;;  %v795_v63 = vrot.slane %v635_v19, 2 }
 0x1eb   :  { %v923_v52 = vrot.slane %v5592_v24, 2  ;;  %v3106_v44 = vor.u32 %v3727_v48, %v3103_v49  ;;  %v3228_v32 = vor.u32 %v3752_v61, %v3227_v42  ;;  %v6489_v54 = vrot.slane %v5235_v1, 5  ;;  %1697 = vmatpush.bf16.msra.mxu2 %v3102_v16  ;;  %v3748_v42 = vld [vmem:[%s6468_s1 + $0x164] sm:$0xf0] }
 0x1ec   :  { %v762_v41 = vmax.f32 %v634_v15, %v698_v28  ;;  %v763_v60 = vmax.f32 %v635_v19, %v699_v21  ;;  %v3232_v59 = vor.u32 %v3751_v7, %v3229_v0  ;;  %v1644_v5 = vrot.slane %v5449_v55, 2  ;;  %v3747_v7 = vld [vmem:[%s6468_s1 + $0x164] sm:$0xf]  ;;  %v3203_v0 = vld [vmem:[%s6468_s1 + $0x168] sm:$0xf0] }
 0x1ed   :  { %v946_v37 = vsel %vm899_vm2, %v6489_v54, %v944_v17  ;;  %v924_v25 = vsel %vm908_vm5, %v923_v52, %v922_v34  ;;  %1710 = vmatpush.bf16.msra.mxu3 %v3106_v44  ;;  %1949 = vmatpush.bf16.msra.mxu0 %v3228_v32  ;;  %v1895_v39 = vrot.slane %v5447_v30, 6  ;;  %v949_v53 = vrot.slane %v5508_v36, 3  ;;  %v3746_v52 = vld [vmem:[%s6468_s1 + $0x154] sm:$0xf0] }
 0x1ee   :  { %v948_v38 = vsel %vm902_vm3, %v947_v43, %v946_v37  ;;  %v5634_v26 = vmax.f32 %v762_v41, %v794_v47  ;;  %v5636_v40 = vmax.f32 %v763_v60, %v795_v63  ;;  %3047 = vmatmul.msk.bf16.vlgmr.msrb.gmra.mxu2 %vm1448_vm11, %v1480_v33  ;;  %3048 = vmatmul.msk.bf16.vlgmr.msrb.gmra.mxu3 %vm1448_vm11, %v1480_v33  ;;  %v1896_v46 = vrot.slane %v5449_v55, 5  ;;  %v3193_v63 = vld [vmem:[%s6468_s1 + $0x150] sm:$0xf] }
 0x1ef   :  { %v1251_v8 = vrot.slane %v5571_v12, 7  ;;  %3173 = vmatmul.msk.bf16.vlgmr.msrb.gmra.mxu0 %vm1448_vm11, %v1730_v57  ;;  %3174 = vmatmul.msk.bf16.vlgmr.msrb.gmra.mxu1 %vm1448_vm11, %v1730_v57  ;;  %v3210_v20 = vor.u32 %v3750_v29, %v3209_v23  ;;  %v3214_v45 = vor.u32 %v3749_v13, %v3211_v18  ;;  %v1017_v3 = vrot.slane %v5512_v31, 4  ;;  %v3745_v23 = vld [vmem:[%s6468_s1 + $0x154] sm:$0xf]  ;;  %v3277_v12 = vld [vmem:[%s6468_s1 + $0x1d0] sm:$0xf] }
 0x1f0   :  { %v5647_v14 = vsel %vm911_vm6, %v925_v10, %v924_v25  ;;  %v950_v43 = vsel %vm905_vm4, %v949_v53, %v948_v38  ;;  %v951_v33 = vrot.slane %v5634_v26, 2  ;;  %v953_v48 = vrot.slane %v5636_v40, 1  ;;  %1962 = vmatpush.bf16.msra.mxu1 %v3232_v59  ;;  %v3201_v10 = vld [vmem:[%s6468_s1 + $0x160] sm:$0xf] }
 0x1f1   :  { %v1645_v49 = vsel %vm893_vm0, %v1644_v5, %v1643_v22  ;;  %v1897_v15 = vsel %vm893_vm0, %v1896_v46, %v1895_v39  ;;  %1862 = vmatpush.bf16.msrb.mxu2 %v3210_v20  ;;  %1875 = vmatpush.bf16.msrb.mxu3 %v3214_v45  ;;  %v1018_v57 = vsel %vm905_vm4, %v1017_v3, %v5080_v27  ;;  %v1019_v19 = vrot.slane %v5592_v24, 3 }
 0x1f2   :  { %v952_v61 = vsel %vm908_vm5, %v951_v33, %v950_v43  ;;  %v1021_v34 = vrot.slane %v5510_v9, 2  ;;  %v6490_v17 = vrot.slane %v5237_v2, 1  ;;  %v1045_v27 = vrot.slane %v5508_v36, 4 }
 0x1f3   :  { %v5677_v28 = vsel %vm911_vm6, %v953_v48, %v952_v61  ;;  %v1020_v21 = vsel %vm908_vm5, %v1019_v19, %v1018_v57  ;;  %v1047_v22 = vrot.slane %v5634_v26, 3  ;;  %v1049_v32 = vrot.slane %v5636_v40, 2  ;;  %v3187_v61 = vld [vmem:[%s6468_s1 + $0x148] sm:$0xf0] }
 0x1f4   :  { %v1038_v16 = vsel %vm893_vm0, %v5120_v58, %v6490_v17  ;;  %v4270_v44 = vpack.i.bf16 %v5677_v28, %v5647_v14  ;;  %v1022_v41 = vsel %vm911_vm6, %v1021_v34, %v1020_v21  ;;  %v6491_v60 = vrot.slane %v5235_v1, 6  ;;  %v3293_v34 = vld [vmem:[%s6468_s1 + $0x1f0] sm:$0xf]  ;;  %v3766_v17 = vld [vmem:[%s6468_s1 + $0x1f4] sm:$0xf0] }
 0x1f5   :  { %v1040_v47 = vsel %vm896_vm1, %v1039_v50, %v1038_v16  ;;  %v3195_v50 = vld [vmem:[%s6468_s1 + $0x158] sm:$0xf0]  ;;  %v3202_v37 = vor.u32 %v3748_v42, %v3201_v10  ;;  %v3206_v59 = vor.u32 %v3747_v7, %v3203_v0  ;;  %v3194_v13 = vor.u32 %v3746_v52, %v3193_v63  ;;  %v3743_v10 = vld [vmem:[%s6468_s1 + $0x144] sm:$0xf]  ;;  %v3765_v21 = vld [vmem:[%s6468_s1 + $0x1f4] sm:$0xf] }
 0x1f6   :  { %v1042_v54 = vsel %vm899_vm2, %v6491_v60, %v1040_v47  ;;  %4271 = vrot.lane.b32.xlu0 %v4270_v44, %s4371_s13  ;;  %4266 = vrot.lane.b32.xlu2 %v4270_v44, %s4373_s26  ;;  %v1121_v18 = vrot.slane %v5512_v31, 5  ;;  %v1123_v25 = vrot.slane %v5592_v24, 4  ;;  %v3198_v5 = vor.u32 %v3745_v23, %v3195_v50  ;;  %v3295_v47 = vld [vmem:[%s6468_s1 + $0x1f8] sm:$0xf0] }
 0x1f7   :  { %v1044_v29 = vsel %vm902_vm3, %v1043_v11, %v1042_v54  ;;  %4261 = vrot.lane.b32.xlu1 %v4270_v44, %s4370_s22  ;;  %1863 = vmatpush.bf16.msrb.mxu2 %v3202_v37  ;;  %v6492_v39 = vrot.slane %v5235_v1, 7  ;;  %v1149_v46 = vrot.slane %v5508_v36, 5  ;;  %v1151_v3 = vrot.slane %v5634_v26, 4  ;;  %v3763_v54 = vld [vmem:[%s6468_s1 + $0x1e4] sm:$0xf] }
 0x1f8   :  { %v1046_v38 = vsel %vm905_vm4, %v1045_v27, %v1044_v29  ;;  %1876 = vmatpush.bf16.msrb.mxu3 %v3206_v59  ;;  %v1122_v20 = vsel %vm905_vm4, %v1121_v18, %v5083_v35  ;;  %v1153_v48 = vrot.slane %v5636_v40, 3  ;;  %v3185_v35 = vld [vmem:[%s6468_s1 + $0x140] sm:$0xf]  ;;  %v1646_v16 = vpack.c.b16 %v1645_v49, %v1645_v49  ;;  %v3287_v37 = vld [vmem:[%s6468_s1 + $0x1e8] sm:$0xf0] }
 0x1f9   :  { %v1146_v53 = vsel %vm899_vm2, %v6492_v39, %v5531_v56  ;;  %v1048_v11 = vsel %vm908_vm5, %v1047_v22, %v1046_v38  ;;  %v1124_v33 = vsel %vm908_vm5, %v1123_v25, %v1122_v20  ;;  %v1125_v56 = vrot.slane %v5510_v9, 3 }
 0x1fa   :  { %v1148_v45 = vsel %vm902_vm3, %v1147_v4, %v1146_v53  ;;  %v1050_v43 = vsel %vm911_vm6, %v1049_v32, %v1048_v11  ;;  %v3744_v4 = vld [vmem:[%s6468_s1 + $0x144] sm:$0xf0]  ;;  %v1898_v27 = vpack.c.b16 %v1897_v15, %v1897_v15  ;;  %v1225_v52 = vrot.slane %v5512_v31, 6  ;;  %v3279_v53 = vld [vmem:[%s6468_s1 + $0x1d8] sm:$0xf0] }
 0x1fb   :  { %v5728_v57 = vpack.i.bf16 %v1050_v43, %v1022_v41  ;;  %v1150_v19 = vsel %vm905_vm4, %v1149_v46, %v1148_v45  ;;  %1864 = vmatpush.bf16.msrb.mxu2 %v3194_v13  ;;  %v1126_v7 = vsel %vm911_vm6, %v1125_v56, %v1124_v33  ;;  %v3186_v63 = vor.u32 %v3744_v4, %v3185_v35  ;;  %v3285_v41 = vld [vmem:[%s6468_s1 + $0x1e0] sm:$0xf]  ;;  %v3759_v43 = vld [vmem:[%s6468_s1 + $0x1c4] sm:$0xf]  ;;  %v3271_v33 = vld [vmem:[%s6468_s1 + $0x1c8] sm:$0xf0] }
 0x1fc   :  { %v1152_v42 = vsel %vm908_vm5, %v1151_v3, %v1150_v19  ;;  %1877 = vmatpush.bf16.msrb.mxu3 %v3198_v5  ;;  %v3190_v49 = vor.u32 %v3743_v10, %v3187_v61  ;;  %v3294_v15 = vor.u32 %v3766_v17, %v3293_v34  ;;  %v1227_v44 = vrot.slane %v5592_v24, 5  ;;  %v3760_v3 = vld [vmem:[%s6468_s1 + $0x1c4] sm:$0xf0] }
 0x1fd   :  { %v1154_v0 = vsel %vm911_vm6, %v1153_v48, %v1152_v42  ;;  %v6493_v32 = vrot.slane %v5237_v2, 3  ;;  %v6494_v23 = vrot.slane %v5120_v58, 2  ;;  %v3298_v31 = vor.u32 %v3765_v21, %v3295_v47  ;;  %v3764_v2 = vld [vmem:[%s6468_s1 + $0x1e4] sm:$0xf0]  ;;  %v3377_v47 = vld [vmem:[%s6468_s1 + $0x270] sm:$0xf] }
 0x1fe   :  { %v5758_v22 = vpack.i.bf16 %v1154_v0, %v1126_v7  ;;  %3131 = vmatmul.msk.bf16.vlgmr.msra.gmra.mxu2 %vm1448_vm11, %v1646_v16  ;;  %3132 = vmatmul.msk.bf16.vlgmr.msra.gmra.mxu3 %vm1448_vm11, %v1646_v16  ;;  %v1226_v60 = vsel %vm905_vm4, %v1225_v52, %v5087_v6  ;;  %v1229_v24 = vrot.slane %v5510_v9, 4  ;;  %v1253_v62 = vrot.slane %v5508_v36, 6 }
 0x1ff   :  { %v1247_v50 = vsel %vm893_vm0, %v6494_v23, %v6493_v32  ;;  %3257 = vmatmul.msk.bf16.vlgmr.msra.gmra.mxu0 %vm1448_vm11, %v1898_v27  ;;  %3258 = vmatmul.msk.bf16.vlgmr.msra.gmra.mxu1 %vm1448_vm11, %v1898_v27  ;;  %v1255_v9 = vrot.slane %v5634_v26, 5  ;;  %v1228_v59 = vsel %vm908_vm5, %v1227_v44, %v1226_v60  ;;  %v1979_v36 = vrot.slane %v5447_v30, 7 }
 0x200   :  { %v1249_v58 = vsel %vm896_vm1, %v1248_v51, %v1247_v50  ;;  %4286 = vrot.lane.b32.xlu0 %v5728_v57, %s4374_s27  ;;  %4281 = vrot.lane.b32.xlu2 %v5728_v57, %s4375_s28  ;;  %v1257_v51 = vrot.slane %v5636_v40, 4  ;;  %v3286_v40 = vor.u32 %v3764_v2, %v3285_v41  ;;  %v1980_v29 = vrot.slane %v5449_v55, 6 }
 0x201   :  { %v1250_v6 = vsel %vm899_vm2, %v5235_v1, %v1249_v58  ;;  %4276 = vrot.lane.b32.xlu1 %v5728_v57, %s4376_s29  ;;  %1865 = vmatpush.bf16.msrb.mxu2 %v3186_v63  ;;  %v1811_v13 = vrot.slane %v5447_v30, 5  ;;  %v3290_v25 = vor.u32 %v3763_v54, %v3287_v37  ;;  %v1812_v38 = vrot.slane %v5449_v55, 4  ;;  %v3761_v30 = vld [vmem:[%s6468_s1 + $0x1d4] sm:$0xf]  ;;  %v3269_v55 = vld [vmem:[%s6468_s1 + $0x1c0] sm:$0xf] }
 0x202   :  { %v1252_v1 = vsel %vm902_vm3, %v1251_v8, %v1250_v6  ;;  %1878 = vmatpush.bf16.msrb.mxu3 %v3190_v49  ;;  %v3762_v8 = vld [vmem:[%s6468_s1 + $0x1d4] sm:$0xf0]  ;;  %v1230_v5 = vsel %vm911_vm6, %v1229_v24, %v1228_v59  ;;  %v1981_v46 = vsel %vm893_vm0, %v1980_v29, %v1979_v36  ;;  %v3282_v45 = vor.u32 %v3761_v30, %v3279_v53  ;;  %v3773_v59 = vld [vmem:[%s6468_s1 + $0x234] sm:$0xf]  ;;  %v3369_v30 = vld [vmem:[%s6468_s1 + $0x260] sm:$0xf] }
 0x203   :  { %v1254_v26 = vsel %vm905_vm4, %v1253_v62, %v1252_v1  ;;  %v3278_v20 = vor.u32 %v3762_v8, %v3277_v12  ;;  %v1813_v56 = vsel %vm893_vm0, %v1812_v38, %v1811_v13  ;;  %v3270_v48 = vor.u32 %v3760_v3, %v3269_v55  ;;  %v3379_v12 = vld [vmem:[%s6468_s1 + $0x278] sm:$0xf0]  ;;  %v3780_v53 = vld [vmem:[%s6468_s1 + $0x264] sm:$0xf0]  ;;  %v3771_v55 = vld [vmem:[%s6468_s1 + $0x224] sm:$0xf] }
 0x204   :  { %v1256_v18 = vsel %vm908_vm5, %v1255_v9, %v1254_v26  ;;  %v3274_v19 = vor.u32 %v3759_v43, %v3271_v33  ;;  %v1814_v35 = vpack.c.b16 %v1813_v56, %v1813_v56  ;;  %v3329_v3 = vld [vmem:[%s6468_s1 + $0x228] sm:$0xf0]  ;;  %vm6496_vm1 = vcmask 130048  }
 0x205   :  { %2030 = vmatpush.bf16.msra.mxu2 %v3294_v15  ;;  %v1258_v39 = vsel %vm911_vm6, %v1257_v51, %v1256_v18  ;;  %v3337_v18 = vld [vmem:[%s6468_s1 + $0x238] sm:$0xf0]  ;;  %vm6497_vm2 = vmmov %vm6496_vm1  ;;  %vm6498_vm3 = vcmask 162816   ;;  %vm6500_vm5 = vcmask 195584  }
 0x206   :  { %2043 = vmatpush.bf16.msra.mxu3 %v3298_v31  ;;  %v4315_v11 = vpack.i.bf16 %v1258_v39, %v1230_v5  ;;  %v3340_v5 = vor.u32 %v3773_v59, %v3337_v18  ;;  %vm6499_vm4 = vmmov %vm6498_vm3  ;;  %v3798_v18 = vld [vmem:[%s6468_s1 + $0x2f4] sm:$0xf0] }
 0x207   :  { %vm6501_vm6 = vmmov %vm6500_vm5 }
 0x208   :  { %4301 = vrot.lane.b32.xlu0 %v5758_v22, %s4377_s30  ;;  %4296 = vrot.lane.b32.xlu2 %v5758_v22, %s4378_s8  ;;  %s6495_s30 = smov 46  }
 0x209   :  { %2031 = vmatpush.bf16.msra.mxu2 %v3286_v40  ;;  %4291 = vrot.lane.b32.xlu1 %v5728_v57, %s4379_s9  ;;  %v1982_v57 = vpack.c.b16 %v1981_v46, %v1981_v46  ;;  %v3327_v46 = vld [vmem:[%s6468_s1 + $0x220] sm:$0xf] }
 0x20a   :  { %2044 = vmatpush.bf16.msra.mxu3 %v3290_v25  ;;  %v3781_v25 = vld [vmem:[%s6468_s1 + $0x274] sm:$0xf]  ;;  %2132 = vmatpush.bf16.msrb.mxu1 %v3340_v5 }
 0x20b   :  { %v3382_v39 = vor.u32 %v3781_v25, %v3379_v12  ;;  %v3419_v25 = vld [vmem:[%s6468_s1 + $0x2b0] sm:$0xf] }
 0x20d   :  { %2032 = vmatpush.bf16.msra.mxu2 %v3278_v20  ;;  %v3370_v20 = vor.u32 %v3780_v53, %v3369_v30  ;;  %v3789_v30 = vld [vmem:[%s6468_s1 + $0x2b4] sm:$0xf]  ;;  %v3421_v53 = vld [vmem:[%s6468_s1 + $0x2b8] sm:$0xf0] }
 0x20e   :  { %2045 = vmatpush.bf16.msra.mxu3 %v3282_v45  ;;  %3215 = vmatmul.msk.bf16.vlgmr.msrb.gmra.mxu2 %vm1448_vm11, %v1814_v35  ;;  %v3772_v45 = vld [vmem:[%s6468_s1 + $0x224] sm:$0xf0] }
 0x20f   :  { %3216 = vmatmul.msk.bf16.vlgmr.msrb.gmra.mxu3 %vm1448_vm11, %v1814_v35  ;;  %v3328_v56 = vor.u32 %v3772_v45, %v3327_v46  ;;  %v3361_v35 = vld [vmem:[%s6468_s1 + $0x250] sm:$0xf]  ;;  %v3797_v45 = vld [vmem:[%s6468_s1 + $0x2f4] sm:$0xf] }
 0x210   :  { %4316 = vrot.lane.b32.xlu0 %v4315_v11, %s4380_s10  ;;  %4311 = vrot.lane.b32.xlu2 %v5758_v22, %s4381_s11 }
 0x211   :  { %2033 = vmatpush.bf16.msra.mxu2 %v3270_v48  ;;  %4306 = vrot.lane.b32.xlu1 %v5758_v22, %s4382_s12  ;;  %v3782_v22 = vld [vmem:[%s6468_s1 + $0x274] sm:$0xf0]  ;;  %v3779_v48 = vld [vmem:[%s6468_s1 + $0x264] sm:$0xf] }
 0x212   :  { %2046 = vmatpush.bf16.msra.mxu3 %v3274_v19  ;;  %v3378_v52 = vor.u32 %v3782_v22, %v3377_v47  ;;  %v3371_v19 = vld [vmem:[%s6468_s1 + $0x268] sm:$0xf0]  ;;  %v3769_v47 = vld [vmem:[%s6468_s1 + $0x214] sm:$0xf]  ;;  %v3321_v22 = vld [vmem:[%s6468_s1 + $0x218] sm:$0xf0] }
 0x215   :  { %2202 = vmatpush.bf16.msrb.mxu2 %v3378_v52 }
 0x216   :  { %2215 = vmatpush.bf16.msrb.mxu3 %v3382_v39  ;;  %v3790_v39 = vld [vmem:[%s6468_s1 + $0x2b4] sm:$0xf0] }
 0x218   :  { %4331 = vrot.lane.b32.xlu0 %v4315_v11, %s4383_s14  ;;  %4326 = vrot.lane.b32.xlu2 %v4315_v11, %s4384_s15 }
 0x219   :  { %4321 = vrot.lane.b32.xlu1 %v4315_v11, %s6495_s30  ;;  %2203 = vmatpush.bf16.msrb.mxu2 %v3370_v20 }
 0x21e   :  { %3299 = vmatmul.msk.bf16.vlgmr.msra.gmra.mxu2 %vm1448_vm11, %v1982_v57 }
 0x21f   :  { %3300 = vmatmul.msk.bf16.vlgmr.msra.gmra.mxu3 %vm1448_vm11, %v1982_v57 }
 0x250   :  { %v4267_v42 = vpop.permute.xlu2 %4266 }
 0x251   :  { %v4269_v41 = vunpack.i.h.bf16 %v4267_v42  ;;  %v4268_v31 = vunpack.i.l.bf16 %v4267_v42  ;;  %v3778_v42 = vld [vmem:[%s6468_s1 + $0x254] sm:$0xf0] }
 0x25a   :  { %v5856_v27 = vpop.permute.xlu2 %4281 }
 0x25b   :  { %v4283_v57 = vunpack.i.l.bf16 %v5856_v27 }
 0x25c   :  { %v1615_v4 = vpop.f32.mrf.mxu0  ;;  %v1628_v10 = vpop.f32.mrf.mxu1 }
 0x260   :  { %v1461_v61 = vpop.f32.mrf.mxu3  ;;  %v1474_v34 = vpop.f32.mrf.mxu2 }
 0x262   :  { %v5874_v6 = vpop.permute.xlu2 %4296 }
 0x264   :  { %v1617_v17 = vpop.f32.mrf.mxu0  ;;  %v1630_v16 = vpop.f32.mrf.mxu1 }
 0x265   :  { %v4284_v17 = vunpack.i.h.bf16 %v5856_v27 }
 0x268   :  { %v4272_v7 = vpop.permute.xlu0 %4271  ;;  %v1463_v0 = vpop.f32.mrf.mxu3 }
 0x269   :  { %v1476_v21 = vpop.f32.mrf.mxu2  ;;  %v4262_v63 = vpop.permute.xlu1 %4261  ;;  %v4273_v62 = vunpack.i.l.bf16 %v4272_v7  ;;  %v4274_v8 = vunpack.i.h.bf16 %v4272_v7  ;;  %v3374_v0 = vor.u32 %v3779_v48, %v3371_v19  ;;  %v3796_v48 = vld [vmem:[%s6468_s1 + $0x2e4] sm:$0xf0]  ;;  %v3411_v19 = vld [vmem:[%s6468_s1 + $0x2a0] sm:$0xf] }
 0x26a   :  { %v4264_v49 = vunpack.i.h.bf16 %v4262_v63  ;;  %v4263_v15 = vunpack.i.l.bf16 %v4262_v63  ;;  %v3362_v21 = vor.u32 %v3778_v42, %v3361_v35  ;;  %v3777_v63 = vld [vmem:[%s6468_s1 + $0x254] sm:$0xf]  ;;  %v5997_v12 = vpop.permute.xlu2 %4311  ;;  %v3788_v35 = vld [vmem:[%s6468_s1 + $0x2a4] sm:$0xf0] }
 0x26b   :  { %2216 = vmatpush.bf16.msrb.mxu3 %v3374_v0 }
 0x26c   :  { %v5864_v44 = vpop.f32.mrf.mxu0  ;;  %v5866_v32 = vpop.f32.mrf.mxu1  ;;  %v1311_v23 = vsel %vm1307_vm7, %v5677_v28, %v4264_v49  ;;  %v1309_v50 = vsel %vm1307_vm7, %v5647_v14, %v4263_v15  ;;  %v3335_v14 = vld [vmem:[%s6468_s1 + $0x230] sm:$0xf]  ;;  %v3774_v28 = vld [vmem:[%s6468_s1 + $0x234] sm:$0xf0]  ;;  %v3363_v15 = vld [vmem:[%s6468_s1 + $0x258] sm:$0xf0]  ;;  %2204 = vmatpush.bf16.msrb.mxu2 %v3362_v21 }
 0x26d   :  { %v1316_v9 = vsel %vm1312_vm8, %v1311_v23, %v4269_v41  ;;  %v1314_v51 = vsel %vm1312_vm8, %v1309_v50, %v4268_v31  ;;  %v3336_v38 = vor.u32 %v3774_v28, %v3335_v14  ;;  %v3353_v23 = vld [vmem:[%s6468_s1 + $0x240] sm:$0xf]  ;;  %v3776_v50 = vld [vmem:[%s6468_s1 + $0x244] sm:$0xf0]  ;;  %v3366_v28 = vor.u32 %v3777_v63, %v3363_v15  ;;  %v3455_v63 = vld [vmem:[%s6468_s1 + $0x2e8] sm:$0xf0] }
 0x26e   :  { %v1319_v11 = vsel %vm1317_vm9, %v1314_v51, %v4273_v62  ;;  %v1321_v43 = vsel %vm1317_vm9, %v1316_v9, %v4274_v8  ;;  %v3768_v62 = vld [vmem:[%s6468_s1 + $0x204] sm:$0xf0]  ;;  %v3767_v9 = vld [vmem:[%s6468_s1 + $0x204] sm:$0xf]  ;;  %v3354_v59 = vor.u32 %v3776_v50, %v3353_v23  ;;  %vm6502_vm7 = vcmask 228352  }
 0x26f   :  { %2119 = vmatpush.bf16.msrb.mxu0 %v3336_v38  ;;  %vm6503_vm8 = vmmov %vm6502_vm7  ;;  %2217 = vmatpush.bf16.msrb.mxu3 %v3366_v28  ;;  %vm6504_vm9 = vcmask 261120   ;;  %v3412_v15 = vor.u32 %v3788_v35, %v3411_v19  ;;  %v3445_v23 = vld [vmem:[%s6468_s1 + $0x2d0] sm:$0xf]  ;;  %v3794_v50 = vld [vmem:[%s6468_s1 + $0x2d4] sm:$0xf0] }
 0x270   :  { %2205 = vmatpush.bf16.msrb.mxu2 %v3354_v59  ;;  %v3446_v28 = vor.u32 %v3794_v50, %v3445_v23  ;;  %v3405_v59 = vld [vmem:[%s6468_s1 + $0x298] sm:$0xf0] }
 0x271   :  { %v1533_v60 = vpop.f32.mrf.mxu2  ;;  %v1546_v24 = vpop.f32.mrf.mxu3 }
 0x272   :  { %v1534_v58 = vadd.f32 %v1533_v60, %v1461_v61  ;;  %v1547_v2 = vadd.f32 %v1546_v24, %v1474_v34  ;;  %v5872_v54 = vpop.permute.xlu0 %4286  ;;  %v3319_v61 = vld [vmem:[%s6468_s1 + $0x210] sm:$0xf]  ;;  %v3770_v34 = vld [vmem:[%s6468_s1 + $0x214] sm:$0xf0] }
 0x273   :  { %v4277_v37 = vpop.permute.xlu1 %4276  ;;  %v4289_v52 = vunpack.i.h.bf16 %v5872_v54  ;;  %v4288_v41 = vunpack.i.l.bf16 %v5872_v54  ;;  %2120 = vmatpush.bf16.msrb.mxu0 %v3328_v56  ;;  %v3320_v24 = vor.u32 %v3770_v34, %v3319_v61  ;;  %v3420_v56 = vor.u32 %v3790_v39, %v3419_v25  ;;  %v3792_v25 = vld [vmem:[%s6468_s1 + $0x2c4] sm:$0xf0] }
 0x274   :  { %v4279_v1 = vunpack.i.h.bf16 %v4277_v37  ;;  %v4278_v36 = vunpack.i.l.bf16 %v4277_v37  ;;  %v1785_v26 = vpop.f32.mrf.mxu0  ;;  %v1798_v40 = vpop.f32.mrf.mxu1  ;;  %v5887_v29 = vadd.f32 %v1615_v4, %v1534_v58  ;;  %v5889_v13 = vadd.f32 %v1628_v10, %v1547_v2  ;;  %v3311_v2 = vld [vmem:[%s6468_s1 + $0x200] sm:$0xf] }
 0x275   :  { %v3332_v10 = vor.u32 %v3771_v55, %v3329_v3  ;;  %v3324_v58 = vor.u32 %v3769_v47, %v3321_v22  ;;  %v3355_v26 = vld [vmem:[%s6468_s1 + $0x248] sm:$0xf0]  ;;  %v3461_v40 = vld [vmem:[%s6468_s1 + $0x2f0] sm:$0xf]  ;;  %v3312_v46 = vor.u32 %v3768_v62, %v3311_v2  ;;  %v3463_v55 = vld [vmem:[%s6468_s1 + $0x2f8] sm:$0xf0]  ;;  %v3424_v61 = vor.u32 %v3789_v30, %v3421_v53 }
 0x276   :  { %v1324_v33 = vsel %vm6496_vm1, %v1319_v11, %v4278_v36  ;;  %v1326_v4 = vsel %vm6497_vm2, %v1321_v43, %v4279_v1  ;;  %v3313_v1 = vld [vmem:[%s6468_s1 + $0x208] sm:$0xf0]  ;;  %v3775_v36 = vld [vmem:[%s6468_s1 + $0x244] sm:$0xf]  ;;  %v3462_v5 = vor.u32 %v3798_v18, %v3461_v40  ;;  %v3453_v3 = vld [vmem:[%s6468_s1 + $0x2e0] sm:$0xf]  ;;  %v3466_v34 = vor.u32 %v3797_v45, %v3463_v55 }
 0x277   :  { %v1329_v27 = vsel %vm6498_vm3, %v1324_v33, %v4283_v57  ;;  %v1331_v31 = vsel %vm6499_vm4, %v1326_v4, %v4284_v17  ;;  %2133 = vmatpush.bf16.msrb.mxu1 %v3332_v10  ;;  %2121 = vmatpush.bf16.msrb.mxu0 %v3320_v24  ;;  %v3316_v11 = vor.u32 %v3767_v9, %v3313_v1  ;;  %v4299_v57 = vunpack.i.h.bf16 %v5874_v6  ;;  %v3787_v17 = vld [vmem:[%s6468_s1 + $0x2a4] sm:$0xf]  ;;  %vm6505_vm1 = vmmov %vm6504_vm9  ;;  %v3403_v9 = vld [vmem:[%s6468_s1 + $0x290] sm:$0xf] }
 0x278   :  { %v1334_v8 = vsel %vm6500_vm5, %v1329_v27, %v4288_v41  ;;  %v1336_v38 = vsel %vm6501_vm6, %v1331_v31, %v4289_v52  ;;  %v3358_v20 = vor.u32 %v3775_v36, %v3355_v26  ;;  %v4298_v4 = vunpack.i.l.bf16 %v5874_v6  ;;  %2370 = vmatpush.bf16.msra.mxu2 %v3462_v5  ;;  %v3413_v6 = vld [vmem:[%s6468_s1 + $0x2a8] sm:$0xf0]  ;;  %v3795_v22 = vld [vmem:[%s6468_s1 + $0x2e4] sm:$0xf]  ;;  %v3793_v1 = vld [vmem:[%s6468_s1 + $0x2d4] sm:$0xf]  ;;  %v4327_v5 = vpop.permute.xlu2 %4326 }
 0x279   :  { %v1535_v16 = vpop.f32.mrf.mxu2  ;;  %v1548_v7 = vpop.f32.mrf.mxu3  ;;  %v3454_v47 = vor.u32 %v3796_v48, %v3453_v3  ;;  %v3416_v2 = vor.u32 %v3787_v17, %v3413_v6  ;;  %v3458_v62 = vor.u32 %v3795_v22, %v3455_v63  ;;  %vm6506_vm2 = vcmask 293888   ;;  %v3447_v36 = vld [vmem:[%s6468_s1 + $0x2d8] sm:$0xf0]  ;;  %v3437_v18 = vld [vmem:[%s6468_s1 + $0x2c0] sm:$0xf] }
 0x27a   :  { %v5953_v49 = vpop.permute.xlu0 %4301  ;;  %2218 = vmatpush.bf16.msrb.mxu3 %v3358_v20  ;;  %vm6507_vm3 = vmmov %vm6506_vm2  ;;  %v3395_v30 = vld [vmem:[%s6468_s1 + $0x280] sm:$0xf]  ;;  %v3450_v20 = vor.u32 %v3793_v1, %v3447_v36  ;;  %v3784_v45 = vld [vmem:[%s6468_s1 + $0x284] sm:$0xf0]  ;;  %v4329_v19 = vunpack.i.h.bf16 %v4327_v5 }
 0x27b   :  { %v4292_v60 = vpop.permute.xlu1 %4291  ;;  %2134 = vmatpush.bf16.msrb.mxu1 %v3324_v58  ;;  %v4304_v16 = vunpack.i.h.bf16 %v5953_v49  ;;  %v4303_v52 = vunpack.i.l.bf16 %v5953_v49  ;;  %2122 = vmatpush.bf16.msrb.mxu0 %v3312_v46  ;;  %v3397_v55 = vld [vmem:[%s6468_s1 + $0x288] sm:$0xf0] }
 0x27c   :  { %v4294_v54 = vunpack.i.h.bf16 %v4292_v60  ;;  %v4293_v51 = vunpack.i.l.bf16 %v4292_v60  ;;  %v5975_v37 = vpop.f32.mrf.mxu0  ;;  %v5977_v14 = vpop.f32.mrf.mxu1  ;;  %2371 = vmatpush.bf16.msra.mxu2 %v3454_v47  ;;  %v3439_v48 = vld [vmem:[%s6468_s1 + $0x2c8] sm:$0xf0] }
 0x27e   :  { %v1339_v43 = vsel %vm6502_vm7, %v1334_v8, %v4293_v51  ;;  %v1341_v33 = vsel %vm6503_vm8, %v1336_v38, %v4294_v54  ;;  %2383 = vmatpush.bf16.msra.mxu3 %v3466_v34  ;;  %v3786_v54 = vld [vmem:[%s6468_s1 + $0x294] sm:$0xf0]  ;;  %v4314_v8 = vunpack.i.h.bf16 %v5997_v12  ;;  %v4313_v38 = vunpack.i.l.bf16 %v5997_v12  ;;  %v3783_v12 = vld [vmem:[%s6468_s1 + $0x284] sm:$0xf] }
 0x27f   :  { %2135 = vmatpush.bf16.msrb.mxu1 %v3316_v11  ;;  %2286 = vmatpush.bf16.msra.mxu0 %v3420_v56  ;;  %v3404_v39 = vor.u32 %v3786_v54, %v3403_v9  ;;  %v3791_v56 = vld [vmem:[%s6468_s1 + $0x2c4] sm:$0xf]  ;;  %v3396_v34 = vor.u32 %v3784_v45, %v3395_v30  ;;  %v3400_v17 = vor.u32 %v3783_v12, %v3397_v55  ;;  %v3545_v54 = vld [vmem:[%s6468_s1 + $0x370] sm:$0xf]  ;;  %v3497_v45 = vld [vmem:[%s6468_s1 + $0x328] sm:$0xf0] }
 0x280   :  { %2372 = vmatpush.bf16.msra.mxu2 %v3446_v28  ;;  %v3442_v47 = vor.u32 %v3791_v56, %v3439_v48  ;;  %v3813_v28 = vld [vmem:[%s6468_s1 + $0x374] sm:$0xf]  ;;  %v3811_v12 = vld [vmem:[%s6468_s1 + $0x364] sm:$0xf]  ;;  %v3539_v55 = vld [vmem:[%s6468_s1 + $0x368] sm:$0xf0] }
 0x281   :  { %v1699_v10 = vpop.f32.mrf.mxu2  ;;  %v1712_v42 = vpop.f32.mrf.mxu3  ;;  %v3810_v56 = vld [vmem:[%s6468_s1 + $0x354] sm:$0xf0] }
 0x282   :  { %v1716_v7 = vadd.f32 %v1699_v10, %v5887_v29  ;;  %v1717_v0 = vadd.f32 %v1712_v42, %v5889_v13  ;;  %v6038_v21 = vpop.permute.xlu0 %4316  ;;  %v1344_v29 = vsel %vm6504_vm9, %v1339_v43, %v4298_v4  ;;  %v1346_v13 = vsel %vm6505_vm1, %v1341_v33, %v4299_v57  ;;  %2384 = vmatpush.bf16.msra.mxu3 %v3458_v62 }
 0x283   :  { %v4307_v27 = vpop.permute.xlu1 %4306  ;;  %2299 = vmatpush.bf16.msra.mxu1 %v3424_v61  ;;  %v1351_v51 = vsel %vm6507_vm3, %v1346_v13, %v4304_v16  ;;  %2287 = vmatpush.bf16.msra.mxu0 %v3412_v15  ;;  %v3438_v33 = vor.u32 %v3792_v25, %v3437_v18  ;;  %v4319_v35 = vunpack.i.h.bf16 %v6038_v21  ;;  %v4318_v57 = vunpack.i.l.bf16 %v6038_v21 }
 0x284   :  { %v4309_v41 = vunpack.i.h.bf16 %v4307_v27  ;;  %v4308_v31 = vunpack.i.l.bf16 %v4307_v27  ;;  %v1953_v60 = vpop.f32.mrf.mxu0  ;;  %v1966_v49 = vpop.f32.mrf.mxu1  ;;  %v6059_v24 = vadd.f32 %v5864_v44, %v1716_v7  ;;  %v6062_v58 = vadd.f32 %v5866_v32, %v1717_v0  ;;  %v3785_v44 = vld [vmem:[%s6468_s1 + $0x294] sm:$0xf] }
 0x285   :  { %v1349_v32 = vsel %vm6506_vm2, %v1344_v29, %v4303_v52  ;;  %v3408_v11 = vor.u32 %v3785_v44, %v3405_v59  ;;  %v4328_v16 = vunpack.i.l.bf16 %v4327_v5  ;;  %2373 = vmatpush.bf16.msra.mxu2 %v3438_v33  ;;  %v3547_v59 = vld [vmem:[%s6468_s1 + $0x378] sm:$0xf0]  ;;  %v3529_v33 = vld [vmem:[%s6468_s1 + $0x350] sm:$0xf] }
 0x286   :  { %v1354_v26 = vsel %vm1352_vm10, %v1349_v32, %v4308_v31  ;;  %v1356_v40 = vsel %vm1352_vm10, %v1351_v51, %v4309_v41  ;;  %2385 = vmatpush.bf16.msra.mxu3 %v3450_v20  ;;  %vm6508_vm10 = vcmask 457728   ;;  %v3805_v32 = vld [vmem:[%s6468_s1 + $0x334] sm:$0xf]  ;;  %v3505_v51 = vld [vmem:[%s6468_s1 + $0x338] sm:$0xf0] }
 0x287   :  { %2300 = vmatpush.bf16.msra.mxu1 %v3416_v2  ;;  %v1359_v3 = vsel %vm1357_vm13, %v1354_v26, %v4313_v38  ;;  %v1361_v43 = vsel %vm1357_vm13, %v1356_v40, %v4314_v8  ;;  %2288 = vmatpush.bf16.msra.mxu0 %v3404_v39  ;;  %vm6509_vm13 = vmmov %vm6508_vm10  ;;  %v3537_v8 = vld [vmem:[%s6468_s1 + $0x360] sm:$0xf]  ;;  %v3812_v38 = vld [vmem:[%s6468_s1 + $0x364] sm:$0xf0]  ;;  %v3508_v30 = vor.u32 %v3805_v32, %v3505_v51 }
 0x288   :  { %v1364_v7 = vsel %vm1362_vm14, %v1359_v3, %v4318_v57  ;;  %v1366_v0 = vsel %vm1362_vm14, %v1361_v43, %v4319_v35  ;;  %v3803_v20 = vld [vmem:[%s6468_s1 + $0x324] sm:$0xf]  ;;  %v3538_v3 = vor.u32 %v3812_v38, %v3537_v8  ;;  %v3487_v35 = vld [vmem:[%s6468_s1 + $0x310] sm:$0xf]  ;;  %v3802_v57 = vld [vmem:[%s6468_s1 + $0x314] sm:$0xf0] }
 0x289   :  { %v1701_v53 = vpop.f32.mrf.mxu2  ;;  %v1714_v46 = vpop.f32.mrf.mxu3  ;;  %v3500_v48 = vor.u32 %v3803_v20, %v3497_v45  ;;  %v3822_v32 = vld [vmem:[%s6468_s1 + $0x3b4] sm:$0xf0]  ;;  %v3821_v51 = vld [vmem:[%s6468_s1 + $0x3b4] sm:$0xf]  ;;  %v3828_v8 = vld [vmem:[%s6468_s1 + $0x3e4] sm:$0xf0] }
 0x28a   :  { %v4332_v4 = vpop.permute.xlu0 %4331  ;;  %2386 = vmatpush.bf16.msra.mxu3 %v3442_v47  ;;  %v3550_v53 = vor.u32 %v3813_v28, %v3547_v59  ;;  %v3495_v46 = vld [vmem:[%s6468_s1 + $0x320] sm:$0xf]  ;;  %v3800_v47 = vld [vmem:[%s6468_s1 + $0x304] sm:$0xf0]  ;;  %v3589_v59 = vld [vmem:[%s6468_s1 + $0x3b8] sm:$0xf0] }
 0x28b   :  { %v4322_v10 = vpop.permute.xlu1 %4321  ;;  %2301 = vmatpush.bf16.msra.mxu1 %v3408_v11  ;;  %v4334_v6 = vunpack.i.h.bf16 %v4332_v4  ;;  %v4333_v22 = vunpack.i.l.bf16 %v4332_v4  ;;  %2289 = vmatpush.bf16.msra.mxu0 %v3396_v34  ;;  %v3804_v11 = vld [vmem:[%s6468_s1 + $0x324] sm:$0xf0]  ;;  %v3801_v4 = vld [vmem:[%s6468_s1 + $0x314] sm:$0xf]  ;;  %v3521_v34 = vld [vmem:[%s6468_s1 + $0x340] sm:$0xf] }
 0x28c   :  { %v4324_v42 = vunpack.i.h.bf16 %v4322_v10  ;;  %v4323_v61 = vunpack.i.l.bf16 %v4322_v10  ;;  %v3496_v43 = vor.u32 %v3804_v11, %v3495_v46  ;;  %v3489_v10 = vld [vmem:[%s6468_s1 + $0x318] sm:$0xf0]  ;;  %v3579_v46 = vld [vmem:[%s6468_s1 + $0x3a0] sm:$0xf]  ;;  %v3820_v11 = vld [vmem:[%s6468_s1 + $0x3a4] sm:$0xf0] }
 0x28d   :  { %v3819_v20 = vld [vmem:[%s6468_s1 + $0x3a4] sm:$0xf]  ;;  %v3581_v45 = vld [vmem:[%s6468_s1 + $0x3a8] sm:$0xf0]  ;;  %vm2955_vm14 = vcmask 17408  }
 0x28e   :  { %v1369_v63 = vsel %vm1367_vm12, %v1364_v7, %v4323_v61  ;;  %v1371_v21 = vsel %vm1367_vm12, %v1366_v0, %v4324_v42  ;;  %v3809_v42 = vld [vmem:[%s6468_s1 + $0x354] sm:$0xf]  ;;  %v3531_v61 = vld [vmem:[%s6468_s1 + $0x358] sm:$0xf0]  ;;  %v3808_v7 = vld [vmem:[%s6468_s1 + $0x344] sm:$0xf0] }
 0x28f   :  { %v1374_v52 = vsel %vm6508_vm10, %v1369_v63, %v4328_v16  ;;  %v1376_v29 = vsel %vm6509_vm13, %v1371_v21, %v4329_v19  ;;  %2302 = vmatpush.bf16.msra.mxu1 %v3400_v17  ;;  %v3542_v19 = vor.u32 %v3811_v12, %v3539_v55  ;;  %v3530_v17 = vor.u32 %v3810_v56, %v3529_v33  ;;  %v3479_v0 = vld [vmem:[%s6468_s1 + $0x300] sm:$0xf]  ;;  %v3827_v12 = vld [vmem:[%s6468_s1 + $0x3e4] sm:$0xf]  ;;  %v3623_v55 = vld [vmem:[%s6468_s1 + $0x3e8] sm:$0xf0] }
 0x290   :  { %v1379_v13 = vsel %vm1377_vm15, %v1374_v52, %v4333_v22  ;;  %v1381_v27 = vsel %vm1377_vm15, %v1376_v29, %v4334_v6  ;;  %v3488_v16 = vor.u32 %v3802_v57, %v3487_v35  ;;  %v3492_v52 = vor.u32 %v3801_v4, %v3489_v10  ;;  %v3613_v33 = vld [vmem:[%s6468_s1 + $0x3d0] sm:$0xf]  ;;  %v3826_v56 = vld [vmem:[%s6468_s1 + $0x3d4] sm:$0xf0]  ;;  %v3817_v4 = vld [vmem:[%s6468_s1 + $0x394] sm:$0xf] }
 0x291   :  { %v2054_v15 = vpack.c.bf16 %v1379_v13, %v1379_v13  ;;  %v2055_v23 = vpack.c.bf16 %v1381_v27, %v1381_v27  ;;  %v1867_v50 = vpop.f32.mrf.mxu2  ;;  %v3534_v29 = vor.u32 %v3809_v42, %v3531_v61  ;;  %v3799_v13 = vld [vmem:[%s6468_s1 + $0x304] sm:$0xf]  ;;  %v3481_v27 = vld [vmem:[%s6468_s1 + $0x308] sm:$0xf0]  ;;  %v3571_v35 = vld [vmem:[%s6468_s1 + $0x390] sm:$0xf] }
 0x292   :  { %v1880_v41 = vpop.f32.mrf.mxu3  ;;  %v1884_v31 = vadd.f32 %v1867_v50, %v6059_v24  ;;  %v3814_v24 = vld [vmem:[%s6468_s1 + $0x374] sm:$0xf0]  ;;  %v3573_v10 = vld [vmem:[%s6468_s1 + $0x398] sm:$0xf0]  ;;  %v3825_v42 = vld [vmem:[%s6468_s1 + $0x3d4] sm:$0xf] }
 0x293   :  { %v1885_v60 = vadd.f32 %v1880_v41, %v6062_v58  ;;  %v6126_v49 = vunpack.c.l.b16 %v2054_v15  ;;  %v6128_v2 = vunpack.c.l.b16 %v2055_v23  ;;  %v3503_v58 = vld [vmem:[%s6468_s1 + $0x330] sm:$0xf]  ;;  %v3546_v18 = vor.u32 %v3814_v24, %v3545_v54  ;;  %v3830_v24 = vld [vmem:[%s6468_s1 + $0x3f4] sm:$0xf0]  ;;  %v3615_v61 = vld [vmem:[%s6468_s1 + $0x3d8] sm:$0xf0] }
 0x294   :  { %v6131_v62 = vadd.f32 %v5975_v37, %v1884_v31  ;;  %v3807_v31 = vld [vmem:[%s6468_s1 + $0x344] sm:$0xf]  ;;  %v3522_v54 = vor.u32 %v3808_v7, %v3521_v34  ;;  %v3818_v57 = vld [vmem:[%s6468_s1 + $0x394] sm:$0xf0] }
 0x295   :  { %v6134_v9 = vadd.f32 %v5977_v14, %v1885_v60  ;;  %v2069_v44 = vrot.slane %v6128_v2, 7  ;;  %v2152_v37 = vrot.slane %v6126_v49, 1  ;;  %v3806_v14 = vld [vmem:[%s6468_s1 + $0x334] sm:$0xf0]  ;;  %v2235_v63 = vrot.slane %v6126_v49, 2 }
 0x296   :  { %v3504_v25 = vor.u32 %v3806_v14, %v3503_v58  ;;  %v2236_v21 = vrot.slane %v6128_v2, 1  ;;  %v2319_v50 = vrot.slane %v6126_v49, 3  ;;  %v2320_v41 = vrot.slane %v6128_v2, 2  ;;  %v3523_v60 = vld [vmem:[%s6468_s1 + $0x348] sm:$0xf0] }
 0x297   :  { %v2070_v1 = vsel %vm893_vm0, %v2069_v44, %v6126_v49  ;;  %v2153_v36 = vsel %vm893_vm0, %v6128_v2, %v2152_v37  ;;  %v3484_v44 = vor.u32 %v3799_v13, %v3481_v27  ;;  %v3526_v37 = vor.u32 %v3807_v31, %v3523_v60  ;;  %v3587_v14 = vld [vmem:[%s6468_s1 + $0x3b0] sm:$0xf]  ;;  %v3815_v13 = vld [vmem:[%s6468_s1 + $0x384] sm:$0xf]  ;;  %v3565_v27 = vld [vmem:[%s6468_s1 + $0x388] sm:$0xf0] }
 0x298   :  { %v2071_v26 = vpack.c.b16 %v2070_v1, %v2070_v1  ;;  %v2154_v40 = vpack.c.b16 %v2153_v36, %v2153_v36  ;;  %v2237_v58 = vsel %vm893_vm0, %v2236_v21, %v2235_v63  ;;  %v2321_v28 = vsel %vm893_vm0, %v2320_v41, %v2319_v50  ;;  %v3829_v1 = vld [vmem:[%s6468_s1 + $0x3f4] sm:$0xf]  ;;  %v3631_v36 = vld [vmem:[%s6468_s1 + $0x3f8] sm:$0xf0]  ;;  %v3823_v50 = vld [vmem:[%s6468_s1 + $0x3c4] sm:$0xf] }
 0x299   :  { %v1869_v5 = vpop.f32.mrf.mxu2  ;;  %v2403_v34 = vrot.slane %v6126_v49, 4  ;;  %v2488_v7 = vrot.slane %v6128_v2, 4  ;;  %v3576_v63 = vor.u32 %v3817_v4, %v3573_v10  ;;  %v3618_v21 = vor.u32 %v3825_v42, %v3615_v61  ;;  %v3607_v41 = vld [vmem:[%s6468_s1 + $0x3c8] sm:$0xf0] }
 0x29a   :  { %v1882_v39 = vpop.f32.mrf.mxu3  ;;  %3341 = vmatmul.msk.bf16.vlgmr.msrb.gmra.mxu0 %vm1448_vm11, %v2071_v26  ;;  %3342 = vmatmul.msk.bf16.vlgmr.msrb.gmra.mxu1 %vm1448_vm11, %v2071_v26  ;;  %v2238_v26 = vpack.c.b16 %v2237_v58, %v2237_v58  ;;  %v3832_v4 = vld [vmem:[%s6470_s3 + $0x8] sm:$0xff] }
 0x29b   :  { %3383 = vmatmul.msk.bf16.vlgmr.msrb.gmra.mxu2 %vm1448_vm11, %v2154_v40  ;;  %3384 = vmatmul.msk.bf16.vlgmr.msrb.gmra.mxu3 %vm1448_vm11, %v2154_v40  ;;  %v2322_v39 = vpack.c.b16 %v2321_v28, %v2321_v28  ;;  %v3840_v10 = vld [vmem:[%s6470_s3 + $0x48] sm:$0xff] }
 0x29c   :  { %2538 = vmatpush.bf16.msrb.mxu2 %v3546_v18  ;;  %2454 = vmatpush.bf16.msrb.mxu0 %v3504_v25  ;;  %v3588_v18 = vor.u32 %v3822_v32, %v3587_v14  ;;  %v3621_v25 = vld [vmem:[%s6468_s1 + $0x3e0] sm:$0xf]  ;;  %v2572_v14 = vrot.slane %v6128_v2, 5  ;;  %v2655_v32 = vrot.slane %v6126_v49, 7 }
 0x29d   :  { %2467 = vmatpush.bf16.msrb.mxu1 %v3508_v30  ;;  %2551 = vmatpush.bf16.msrb.mxu3 %v3550_v53  ;;  %v3592_v30 = vor.u32 %v3821_v51, %v3589_v59  ;;  %v3634_v53 = vor.u32 %v3829_v1, %v3631_v36  ;;  %v2656_v51 = vrot.slane %v6128_v2, 6 }
 0x29f   :  { %v2657_v59 = vsel %vm893_vm0, %v2656_v51, %v2655_v32  ;;  %v2730_v51 = vld [vmem:[%s6469_s2] sm:$0x3] }
 0x2a0   :  { %2539 = vmatpush.bf16.msrb.mxu2 %v3538_v3  ;;  %2455 = vmatpush.bf16.msrb.mxu0 %v3496_v43  ;;  %v3622_v3 = vor.u32 %v3828_v8, %v3621_v25  ;;  %v3580_v43 = vor.u32 %v3820_v11, %v3579_v46  ;;  %v2658_v36 = vpack.c.b16 %v2657_v59, %v2657_v59  ;;  %v3845_v25 = vld [vmem:[%s6470_s3 + $0x70] sm:$0xff]  ;;  %v3835_v46 = vld [vmem:[%s6470_s3 + $0x20] sm:$0xff] }
 0x2a1   :  { %v2035_v6 = vpop.f32.mrf.mxu2  ;;  %2468 = vmatpush.bf16.msrb.mxu1 %v3500_v48  ;;  %2552 = vmatpush.bf16.msrb.mxu3 %v3542_v19  ;;  %v3584_v48 = vor.u32 %v3819_v20, %v3581_v45  ;;  %v3626_v19 = vor.u32 %v3827_v12, %v3623_v55  ;;  %v3843_v11 = vld [vmem:[%s6470_s3 + $0x60] sm:$0xff] }
 0x2a2   :  { %v2048_v22 = vpop.f32.mrf.mxu3  ;;  %v6239_v15 = vadd.f32 %v2035_v6, %v6131_v62  ;;  %v3480_v62 = vor.u32 %v3800_v47, %v3479_v0  ;;  %v3614_v0 = vor.u32 %v3826_v56, %v3613_v33  ;;  %v3572_v47 = vor.u32 %v3818_v57, %v3571_v35  ;;  %v3605_v6 = vld [vmem:[%s6468_s1 + $0x3c0] sm:$0xf]  ;;  %v3833_v33 = vld [vmem:[%s6470_s3 + $0x10] sm:$0xff] }
 0x2a3   :  { %v6242_v23 = vadd.f32 %v2048_v22, %v6134_v9  ;;  %v3629_v9 = vld [vmem:[%s6468_s1 + $0x3f0] sm:$0xf]  ;;  %v3824_v22 = vld [vmem:[%s6468_s1 + $0x3c4] sm:$0xf0] }
 0x2a4   :  { %2540 = vmatpush.bf16.msrb.mxu2 %v3530_v17  ;;  %2456 = vmatpush.bf16.msrb.mxu0 %v3488_v16  ;;  %v3630_v40 = vor.u32 %v3830_v24, %v3629_v9  ;;  %v2404_v17 = vrot.slane %v6128_v2, 3  ;;  %v2487_v16 = vrot.slane %v6126_v49, 5  ;;  %v3606_v31 = vor.u32 %v3824_v22, %v3605_v6  ;;  %v3846_v2 = vld [vmem:[%s6470_s3 + $0x78] sm:$0xff]  ;;  %v3841_v56 = vld [vmem:[%s6470_s3 + $0x50] sm:$0xff]  ;;  %v2906_v6 = vld [vmem:[%s6472_s5 + $0x28] sm:$0xff] }
 0x2a5   :  { %2469 = vmatpush.bf16.msrb.mxu1 %v3492_v52  ;;  %2553 = vmatpush.bf16.msrb.mxu3 %v3534_v29  ;;  %v3563_v52 = vld [vmem:[%s6468_s1 + $0x380] sm:$0xf]  ;;  %v3816_v29 = vld [vmem:[%s6468_s1 + $0x384] sm:$0xf0]  ;;  %v3610_v9 = vor.u32 %v3823_v50, %v3607_v41 }
 0x2a6   :  { %v3564_v60 = vor.u32 %v3816_v29, %v3563_v52  ;;  %v2489_v24 = vsel %vm893_vm0, %v2488_v7, %v2487_v16  ;;  %v3839_v7 = vld [vmem:[%s6470_s3 + $0x40] sm:$0xff] }
 0x2a7   :  { %v2905_v22 = vld [vmem:[%s6472_s5 + $0x20] sm:$0xff] }
 0x2a8   :  { %2541 = vmatpush.bf16.msrb.mxu2 %v3522_v54  ;;  %2457 = vmatpush.bf16.msrb.mxu0 %v3480_v62  ;;  %v2405_v54 = vsel %vm893_vm0, %v2404_v17, %v2403_v34  ;;  %v3568_v62 = vor.u32 %v3815_v13, %v3565_v27  ;;  %v3831_v34 = vld [vmem:[%s6470_s3] sm:$0xff] }
 0x2a9   :  { %v2037_v38 = vpop.f32.mrf.mxu2  ;;  %2470 = vmatpush.bf16.msrb.mxu1 %v3484_v44  ;;  %2554 = vmatpush.bf16.msrb.mxu3 %v3526_v37  ;;  %v2406_v58 = vpack.c.b16 %v2405_v54, %v2405_v54  ;;  %v2490_v44 = vpack.c.b16 %v2489_v24, %v2489_v24  ;;  %v2571_v37 = vrot.slane %v6126_v49, 6  ;;  %v3838_v49 = vld [vmem:[%s6470_s3 + $0x38] sm:$0xff] }
 0x2aa   :  { %v2050_v5 = vpop.f32.mrf.mxu3  ;;  %3425 = vmatmul.msk.bf16.vlgmr.msra.gmra.mxu0 %vm1448_vm11, %v2238_v26  ;;  %3426 = vmatmul.msk.bf16.vlgmr.msra.gmra.mxu1 %vm1448_vm11, %v2238_v26 }
 0x2ab   :  { %3467 = vmatmul.msk.bf16.vlgmr.msra.gmra.mxu2 %vm1448_vm11, %v2322_v39  ;;  %3468 = vmatmul.msk.bf16.vlgmr.msra.gmra.mxu3 %vm1448_vm11, %v2322_v39  ;;  %v2573_v28 = vsel %vm893_vm0, %v2572_v14, %v2571_v37 }
 0x2ac   :  { %2706 = vmatpush.bf16.msra.mxu2 %v3630_v40  ;;  %2622 = vmatpush.bf16.msra.mxu0 %v3588_v18  ;;  %v2574_v1 = vpack.c.b16 %v2573_v28, %v2573_v28  ;;  %v3837_v18 = vld [vmem:[%s6470_s3 + $0x30] sm:$0xff] }
 0x2ad   :  { %2635 = vmatpush.bf16.msra.mxu1 %v3592_v30  ;;  %2719 = vmatpush.bf16.msra.mxu3 %v3634_v53  ;;  %v3836_v30 = vld [vmem:[%s6470_s3 + $0x28] sm:$0xff] }
 0x2ae   :  { %v3844_v53 = vld [vmem:[%s6470_s3 + $0x68] sm:$0xff] }
 0x2b0   :  { %2707 = vmatpush.bf16.msra.mxu2 %v3622_v3  ;;  %2623 = vmatpush.bf16.msra.mxu0 %v3580_v43  ;;  %v3834_v3 = vld [vmem:[%s6470_s3 + $0x18] sm:$0xff] }
 0x2b1   :  { %2636 = vmatpush.bf16.msra.mxu1 %v3584_v48  ;;  %2720 = vmatpush.bf16.msra.mxu3 %v3626_v19  ;;  %v3842_v43 = vld [vmem:[%s6470_s3 + $0x58] sm:$0xff] }
 0x2b4   :  { %2708 = vmatpush.bf16.msra.mxu2 %v3614_v0  ;;  %2624 = vmatpush.bf16.msra.mxu0 %v3572_v47  ;;  %v2908_v0 = vld [vmem:[%s6472_s5 + $0x38] sm:$0xff]  ;;  %v2907_v47 = vld [vmem:[%s6472_s5 + $0x30] sm:$0xff] }
 0x2b5   :  { %2637 = vmatpush.bf16.msra.mxu1 %v3576_v63  ;;  %2721 = vmatpush.bf16.msra.mxu3 %v3618_v21  ;;  %v2904_v63 = vld [vmem:[%s6472_s5 + $0x18] sm:$0xff] }
 0x2b8   :  { %2709 = vmatpush.bf16.msra.mxu2 %v3606_v31  ;;  %2625 = vmatpush.bf16.msra.mxu0 %v3564_v60 }
 0x2b9   :  { %2638 = vmatpush.bf16.msra.mxu1 %v3568_v62  ;;  %2722 = vmatpush.bf16.msra.mxu3 %v3610_v9 }
 0x2ba   :  { %3509 = vmatmul.msk.bf16.vlgmr.msrb.gmra.mxu0 %vm1448_vm11, %v2406_v58  ;;  %3510 = vmatmul.msk.bf16.vlgmr.msrb.gmra.mxu1 %vm1448_vm11, %v2406_v58 }
 0x2bb   :  { %3551 = vmatmul.msk.bf16.vlgmr.msrb.gmra.mxu2 %vm1448_vm11, %v2490_v44  ;;  %3552 = vmatmul.msk.bf16.vlgmr.msrb.gmra.mxu3 %vm1448_vm11, %v2490_v44 }
 0x2bc   :  { %2874 = vmatpush.bf16.msrb.mxu0 %v3838_v49  ;;  %2924 = vmatpush.msrb.mxu2 %v2908_v0 }
 0x2bd   :  { %2887 = vmatpush.bf16.msrb.mxu1 %v3846_v2 }
 0x2be   :  { %2925 = vmatpush.msrb.mxu2 %v2907_v47 }
 0x2c0   :  { %2875 = vmatpush.bf16.msrb.mxu0 %v3837_v18  ;;  %2926 = vmatpush.msrb.mxu2 %v2906_v6 }
 0x2c1   :  { %2888 = vmatpush.bf16.msrb.mxu1 %v3845_v25 }
 0x2c2   :  { %2927 = vmatpush.msrb.mxu2 %v2905_v22 }
 0x2c4   :  { %2876 = vmatpush.bf16.msrb.mxu0 %v3836_v30  ;;  %2928 = vmatpush.msrb.mxu2 %v2904_v63 }
 0x2c5   :  { %2889 = vmatpush.bf16.msrb.mxu1 %v3844_v53 }
 0x2c8   :  { %2877 = vmatpush.bf16.msrb.mxu0 %v3835_v46 }
 0x2c9   :  { %2890 = vmatpush.bf16.msrb.mxu1 %v3843_v11 }
 0x2ca   :  { %3593 = vmatmul.msk.bf16.vlgmr.msra.gmra.mxu0 %vm1448_vm11, %v2574_v1  ;;  %3594 = vmatmul.msk.bf16.vlgmr.msra.gmra.mxu1 %vm1448_vm11, %v2574_v1  ;;  %v2732_v1 = vperm.slane %v2730_v51, 0 }
 0x2cb   :  { %3635 = vmatmul.msk.bf16.vlgmr.msra.gmra.mxu2 %vm1448_vm11, %v2658_v36  ;;  %3636 = vmatmul.msk.bf16.vlgmr.msra.gmra.mxu3 %vm1448_vm11, %v2658_v36  ;;  %v2733_v36 = vperm.slane %v2730_v51, 1 }
 0x2cc   :  { %2878 = vmatpush.bf16.msrb.mxu0 %v3834_v3 }
 0x2cd   :  { %2891 = vmatpush.bf16.msrb.mxu1 %v3842_v43 }
 0x2d0   :  { %2879 = vmatpush.bf16.msrb.mxu0 %v3833_v33 }
 0x2d1   :  { %2892 = vmatpush.bf16.msrb.mxu1 %v3841_v56 }
 0x2d4   :  { %2880 = vmatpush.bf16.msrb.mxu0 %v3832_v4 }
 0x2d5   :  { %2893 = vmatpush.bf16.msrb.mxu1 %v3840_v10 }
 0x2d8   :  { %2881 = vmatpush.bf16.msrb.mxu0 %v3831_v34 }
 0x2d9   :  { %2894 = vmatpush.bf16.msrb.mxu1 %v3839_v7 }
 0x317   :  { %v6374_v26 = vpop.f32.mrf.mxu0  ;;  %v6376_v40 = vpop.f32.mrf.mxu1 }
 0x318   :  { %v2141_v27 = vadd.f32 %v6374_v26, %v6239_v15  ;;  %v2142_v50 = vadd.f32 %v6376_v40, %v6242_v23 }
 0x31e   :  { %v2207_v8 = vpop.f32.mrf.mxu2  ;;  %v2220_v38 = vpop.f32.mrf.mxu3 }
 0x31f   :  { %v2126_v5 = vpop.f32.mrf.mxu0  ;;  %v2139_v39 = vpop.f32.mrf.mxu1  ;;  %v2224_v41 = vadd.f32 %v2207_v8, %v2141_v27  ;;  %v2225_v31 = vadd.f32 %v2220_v38, %v2142_v50 }
 0x326   :  { %v2209_v20 = vpop.f32.mrf.mxu2  ;;  %v2222_v45 = vpop.f32.mrf.mxu3 }
 0x327   :  { %v2291_v12 = vpop.f32.mrf.mxu0  ;;  %v2304_v55 = vpop.f32.mrf.mxu1  ;;  %v2903_v20 = vld [vmem:[%s6472_s5 + $0x10] sm:$0xff]  ;;  %v2902_v45 = vld [vmem:[%s6472_s5 + $0x8] sm:$0xff] }
 0x328   :  { %v2308_v60 = vadd.f32 %v2291_v12, %v2224_v41  ;;  %v2309_v54 = vadd.f32 %v2304_v55, %v2225_v31  ;;  %2929 = vmatpush.msrb.mxu2 %v2903_v20  ;;  %v2901_v12 = vld [vmem:[%s6472_s5] sm:$0xff] }
 0x329   :  { %v4335_v55 = vld [vmem:[%s6471_s4] ss:$0 sm:$0xff]  ;;  %s4386_s4 = smov [#allocation2]  }
 0x32a   :  { %2930 = vmatpush.msrb.mxu2 %v2902_v45  ;;  %s2962_s5 = sshll.u32 %s4386_s4, 4  ;;  %s2963_s5 = int_to_ptr.vmem [resolvable:$true] %s2962_s5 }
 0x32c   :  { %2931 = vmatpush.msrb.mxu2 %v2901_v12 }
 0x32e   :  { %v2375_v48 = vpop.f32.mrf.mxu2  ;;  %v2388_v19 = vpop.f32.mrf.mxu3 }
 0x32f   :  { %v2293_v35 = vpop.f32.mrf.mxu0  ;;  %v2306_v57 = vpop.f32.mrf.mxu1  ;;  %v2392_v24 = vadd.f32 %v2375_v48, %v2308_v60  ;;  %v2393_v58 = vadd.f32 %v2388_v19, %v2309_v54 }
 0x330   :  { %v4336_v57 = vld [vmem:[%s6473_s6] ss:$0 sm:$0xff]  ;;  %s2964_s6 = sshll.u32 %s6474_s7, 4  ;;  %s2965_s6 = int_to_ptr.hbm [resolvable:$true] %s2964_s6 }
 0x336   :  { %v2377_v42 = vpop.f32.mrf.mxu2  ;;  %v2390_v61 = vpop.f32.mrf.mxu3 }
 0x337   :  { %v2459_v17 = vpop.f32.mrf.mxu0  ;;  %v2472_v16 = vpop.f32.mrf.mxu1 }
 0x338   :  { %v2476_v14 = vadd.f32 %v2459_v17, %v2392_v24  ;;  %v2477_v32 = vadd.f32 %v2472_v16, %v2393_v58 }
 0x33e   :  { %v2543_v21 = vpop.f32.mrf.mxu2  ;;  %v2556_v52 = vpop.f32.mrf.mxu3 }
 0x33f   :  { %v2461_v29 = vpop.f32.mrf.mxu0  ;;  %v2474_v13 = vpop.f32.mrf.mxu1  ;;  %v2560_v15 = vadd.f32 %v2543_v21, %v2476_v14  ;;  %v2561_v28 = vadd.f32 %v2556_v52, %v2477_v32 }
 0x346   :  { %v2545_v62 = vpop.f32.mrf.mxu2  ;;  %v2558_v9 = vpop.f32.mrf.mxu3 }
 0x347   :  { %v2627_v44 = vpop.f32.mrf.mxu0  ;;  %v2640_v37 = vpop.f32.mrf.mxu1 }
 0x348   :  { %v2644_v59 = vadd.f32 %v2627_v44, %v2560_v15  ;;  %v2645_v23 = vadd.f32 %v2640_v37, %v2561_v28 }
 0x34e   :  { %v2711_v26 = vpop.f32.mrf.mxu2  ;;  %v2724_v40 = vpop.f32.mrf.mxu3 }
 0x34f   :  { %v2728_v49 = vadd.f32 %v2711_v26, %v2644_v59  ;;  %v2729_v2 = vadd.f32 %v2724_v40, %v2645_v23  ;;  %v2629_v18 = vpop.f32.mrf.mxu0  ;;  %v2642_v25 = vpop.f32.mrf.mxu1 }
 0x351   :  { %v2736_v8 = vadd.f32 %v2732_v1, %v2728_v49  ;;  %v2737_v38 = vadd.f32 %v2733_v36, %v2729_v2 }
 0x353   :  { %v2738_v5 = vmax.f32 %v2736_v8, 0.0  ;;  %v2739_v39 = vmax.f32 %v2737_v38, 0.0 }
 0x355   :  { %v2740_v30 = vpack.c.bf16 %v2738_v5, %v2738_v5  ;;  %v2741_v53 = vpack.c.bf16 %v2739_v39, %v2739_v39 }
 0x356   :  { %v2713_v46 = vpop.f32.mrf.mxu2  ;;  %v2726_v11 = vpop.f32.mrf.mxu3 }
 0x357   :  { %2882 = vmatmul.bf16.vlgmr.msrb.gmra.mxu0 %v2740_v30  ;;  %2895 = vmatmul.bf16.vlgmr.msrb.gmra.mxu1 %v2741_v53 }
 0x3d4   :  { %v2883_v3 = vpop.f32.mrf.mxu0  ;;  %v2896_v43 = vpop.f32.mrf.mxu1 }
 0x3d5   :  { %v2884_v33 = vadd.f32 %v4335_v55, %v2883_v3 }
 0x3d7   :  { %v2897_v56 = vadd.f32 %v2896_v43, %v2884_v33 }
 0x3d9   :  { %v2900_v48 = vmax.f32 %v2897_v56, 0.0 }
 0x3db   :  { %3701 = vmatmul.msk.f32.vlgmr.msrb.gmra.mxu2 %vm1448_vm11, %v2900_v48 }
 0x3dc   :  { %v2885_v19 = vpop.f32.mrf.mxu0  ;;  %v2898_v35 = vpop.f32.mrf.mxu1 }
 0x45e   :  { %v2933_v4 = vpop.f32.mrf.mxu2 }
 0x45f   :  { %v2934_v10 = vadd.f32 %v4336_v57, %v2933_v4 }
 0x461   :  { %v3702_v42 = vmul.f32 -1.442695, %v2934_v10 }
 0x463   :  { %4337 = vpow2.f32 %v3702_v42 }
 0x469   :  { %v4338_v61 = vpop.eup %4337 }
 0x46a   :  { %v2939_v34 = vadd.f32 1.0, %v4338_v61 }
 0x46c   :  { %4339 = vrcp.f32 %v2939_v34  ;;  %v2951_v0 = vand.u32 2147483648, %v2939_v34  ;;  %v2949_v6 = vand.u32 2147483647, %v2939_v34  ;;  %vm2945_vm11 = vweird.f32 %v2939_v34 }
 0x46e   :  { %v2952_v63 = vor.u32 1.1754944e-38, %v2951_v0  ;;  %vm2950_vm15 = vcmp.eq.f32.partialorder %v2949_v6, 8.507059e+37 }
 0x472   :  { %v4340_v17 = vpop.eup %4339 }
 0x473   :  { %v2941_v16 = vmul.f32 %v4340_v17, %v2939_v34  ;;  %vm2946_vm0 = vweird.f32 %v4340_v17 }
 0x474   :  { %vm2947_vm12 = vmor %vm2945_vm11, %vm2946_vm0 }
 0x475   :  { %v2942_v7 = vsub.f32 1.0, %v2941_v16 }
 0x477   :  { %v2943_v47 = vmul.f32 %v4340_v17, %v2942_v7 }
 0x479   :  { %v2944_v22 = vadd.f32 %v4340_v17, %v2943_v47 }
 0x47b   :  { %v2948_v21 = vsel %vm2947_vm12, %v4340_v17, %v2944_v22 }
 0x47c   :  { %v2953_v52 = vsel %vm2950_vm15, %v2952_v63, %v2948_v21 }
 0x47d   :  { %2956 = vst.msk [vmem:[#allocation2] sm:$0x3] %vm2955_vm14, %v2953_v52 }
 0x47e   :  { %2967 = dma.vmem_to_hbm [thread:$0]  %s2963_s5, 32, %s2965_s6, [#allocation3]  }
 0x47f   :  { %4367 = dma.done.wait [#allocation3], 32  }
 0x480   :  { %4368 = vsyncadd [#allocation3], 4294967264 }
 0x481   :  { %2972 = vsyncpa [#allocation3], 1 }

</bundles_post_ra>
